<compile_context>
chip_gen: v7x
topology: tpu7x:2x2x1
jax: 0.10.0
libtpu: 0.0.40
codegen_flags: <defaults>
</compile_context>

<pallas_src>
import functools

import jax
import jax.numpy as jnp
import numpy as np
from jax import lax
from jax.experimental import pallas as pl
from jax.experimental.pallas import tpu as pltpu


def _round_up(x, m):
    return ((x + m - 1) // m) * m


# =============================================================================
# Fused Pallas kernel: whole demo forward for ONE batch element, VMEM-resident.
# =============================================================================
def _fused_unrolled_lr_kernel(L_ref, R_ref, w_ref, b_ref, out_ref,
                              pad2_ref, pad1_ref, *,
                              num_unrolls, num_resblocks, H, W, T,
                              num_basis, ksize, circular, cmax):
    f32 = jnp.float32
    nb = num_basis
    Cs = 2 * nb                       # real|imag channel count (num_emaps == 1)
    HW = H * W
    p = ksize // 2

    # Zero the padded scratch buffers once: borders stay zero (zero padding);
    # interiors are fully rewritten by every conv at the uniform width cmax.
    # Circular rows of the temporal buffer are rewritten per conv.
    pad2_ref[...] = jnp.zeros(pad2_ref.shape, f32)
    pad1_ref[...] = jnp.zeros(pad1_ref.shape, f32)
    # Zero the lane-dense output block once so padding lanes are defined.
    out_ref[...] = jnp.zeros(out_ref.shape, f32)

    # Static (python-int) cursors into the packed weight / bias slabs.
    cur = {"w": 0, "b": 0}

    def next_wt():
        r0 = cur["w"]; cur["w"] = r0 + cmax
        return w_ref[r0:r0 + cmax, :]                 # (cmax, cmax) tap weights

    def next_bias():
        r0 = cur["b"]; cur["b"] = r0 + 1
        return b_ref[r0:r0 + 1, :]                    # (1, cmax)

    def conv2d(x, relu):
        """Same-size KxK conv, zero pad.  x: (HW, cmax) -> (HW, cmax).
        Per-tap MXU accumulation; tap windows read straight from the padded
        scratch Ref (no value-level slicing, no lane concatenation)."""
        pad2_ref[p:p + H, p:p + W, :] = x.reshape(H, W, cmax)
        acc = None
        for kh in range(ksize):
            for kw in range(ksize):
                win = pad2_ref[kh:kh + H, kw:kw + W, :].reshape(HW, cmax)
                t = jnp.dot(win, next_wt(), preferred_element_type=f32)
                acc = t if acc is None else acc + t
        acc = acc + next_bias()
        return jnp.maximum(acc, 0.0) if relu else acc

    def conv1d(x, relu):
        """Same-size K conv, zero / circular pad.  x: (T, cmax) -> (T, cmax)."""
        pad1_ref[p:p + T, :] = x
        if circular and p > 0:
            pad1_ref[0:p, :] = x[T - p:T, :]
            pad1_ref[p + T:2 * p + T, :] = x[0:p, :]
        acc = None
        for k in range(ksize):
            win = pad1_ref[k:k + T, :]
            t = jnp.dot(win, next_wt(), preferred_element_type=f32)
            acc = t if acc is None else acc + t
        acc = acc + next_bias()
        return jnp.maximum(acc, 0.0) if relu else acc

    def resnet(x, conv):
        h = conv(x, True)
        for _ in range(num_resblocks):
            r = conv(h, True)
            r = conv(r, False)
            h = h + r
        return x + conv(h, False)                     # global residual

    # ---- unrolled CNN proximal updates; all activations stay in VMEM --------
    xL = L_ref[...]                                   # (HW, cmax), cols >= Cs are 0
    xR = R_ref[...]                                   # (T,  cmax), cols >= Cs are 0
    for _ in range(num_unrolls):
        xL = resnet(xL, conv2d)
        xR = resnet(xR, conv1d)

    # Trace-time sanity: packed weights fully consumed in order.
    assert cur["w"] == w_ref.shape[0] and cur["b"] == b_ref.shape[0]

    yL = xL[:, 0:Cs]                                  # (HW, 2nb)
    yR = xR[:, 0:Cs]                                  # (T,  2nb)

    # ---- blocks = L @ conj(R)^T, computed TRANSPOSED so the natural matmul
    # output is lane-dense.  Direct 2-matmul complex product (no Gauss trick).
    def dotT(a, b):   # a @ b.T, f32 accumulation on the MXU
        return lax.dot_general(a, b, (((1,), (1,)), ((), ())),
                               preferred_element_type=f32)

    btr = dotT(yR, yL)                                            # (T, HW) = real(blocks)^T
    yR_rot = jnp.concatenate([-yR[:, nb:Cs], yR[:, 0:nb]], axis=-1)   # [-Ri | Rr]
    bti = dotT(yR_rot, yL)                                        # (T, HW) = imag(blocks)^T

    # ---- lane-dense packed output slab (last dim >= 128) ---------------------
    #   rows [0, Cs)     : lanes [0, HW) = yL^T,  lanes [HW, HW+T) = yR^T
    #   rows [Cs, Cs+T)  : lanes [0, HW) = real(blocks)^T, [HW, 2HW) = imag^T
    out_ref[0:Cs, 0:HW] = yL.T
    out_ref[0:Cs, HW:HW + T] = yR.T
    out_ref[Cs:Cs + T, 0:HW] = btr
    out_ref[Cs:Cs + T, HW:2 * HW] = bti


# =============================================================================
# UnrolledLRNet (Pallas version)
# =============================================================================
class UnrolledLRNetPallas:
    def __init__(self, key, *, num_unrolls=2, num_resblocks=1, num_features=16,
                 kernel_size=3, num_emaps=1, block_size=8, num_basis=4,
                 circular_pad=True, share_weights=False):
        self.num_unrolls = num_unrolls
        self.num_resblocks = num_resblocks
        self.num_features = num_features
        self.kernel_size = kernel_size
        self.num_emaps = num_emaps
        self.block_size = block_size
        self.num_basis = num_basis
        self.circular_pad = circular_pad
        self.share_weights = share_weights
        self.use_complex_layers = False  # real layers -> 2x channels (real/imag)

        spatial_in = 2 * num_emaps * num_basis
        temporal_in = 2 * num_basis
        # Uniform in-kernel channel width (all convs padded to this width).
        self.cmax = max(num_features, spatial_in, temporal_in)

        k_sp, k_tm = jax.random.split(key)
        if share_weights:
            sp = self._init_resnet2d_params(k_sp, spatial_in)
            tm = self._init_resnet1d_params(k_tm, temporal_in)
            self.spatial_params = [sp] * num_unrolls
            self.temporal_params = [tm] * num_unrolls
        else:
            sp_keys = jax.random.split(k_sp, num_unrolls)
            tm_keys = jax.random.split(k_tm, num_unrolls)
            self.spatial_params = [self._init_resnet2d_params(k, spatial_in)
                                   for k in sp_keys]
            self.temporal_params = [self._init_resnet1d_params(k, temporal_in)
                                    for k in tm_keys]

    # -- deterministic synthetic parameter init (no checkpoint loading) -------
    def _conv2d_init(self, key, cin, cout):
        ks = self.kernel_size
        kw, kb = jax.random.split(key)
        scale = 1.0 / jnp.sqrt(jnp.float32(cin * ks * ks))
        w = scale * jax.random.normal(kw, (ks, ks, cin, cout), jnp.float32)
        b = 0.01 * jax.random.normal(kb, (cout,), jnp.float32)
        return w, b

    def _conv1d_init(self, key, cin, cout):
        ks = self.kernel_size
        kw, kb = jax.random.split(key)
        scale = 1.0 / jnp.sqrt(jnp.float32(cin * ks))
        w = scale * jax.random.normal(kw, (ks, cin, cout), jnp.float32)
        b = 0.01 * jax.random.normal(kb, (cout,), jnp.float32)
        return w, b

    def _init_resnet2d_params(self, key, in_chans):
        chans = self.num_features
        keys = jax.random.split(key, 2 + 2 * self.num_resblocks)
        w_in, b_in = self._conv2d_init(keys[0], in_chans, chans)
        blocks = []
        for r in range(self.num_resblocks):
            w1, b1 = self._conv2d_init(keys[1 + 2 * r], chans, chans)
            w2, b2 = self._conv2d_init(keys[2 + 2 * r], chans, chans)
            blocks.append(dict(w1=w1, b1=b1, w2=w2, b2=b2))
        w_out, b_out = self._conv2d_init(keys[-1], chans, in_chans)
        return dict(w_in=w_in, b_in=b_in, blocks=blocks, w_out=w_out, b_out=b_out)

    def _init_resnet1d_params(self, key, in_chans):
        chans = self.num_features
        keys = jax.random.split(key, 2 + 2 * self.num_resblocks)
        w_in, b_in = self._conv1d_init(keys[0], in_chans, chans)
        blocks = []
        for r in range(self.num_resblocks):
            w1, b1 = self._conv1d_init(keys[1 + 2 * r], chans, chans)
            w2, b2 = self._conv1d_init(keys[2 + 2 * r], chans, chans)
            blocks.append(dict(w1=w1, b1=b1, w2=w2, b2=b2))
        w_out, b_out = self._conv1d_init(keys[-1], chans, in_chans)
        return dict(w_in=w_in, b_in=b_in, blocks=blocks, w_out=w_out, b_out=b_out)

    # -- weight packing: 2 operands total, in kernel consumption order ---------
    def _layer_list(self, params):
        layers = [(params["w_in"], params["b_in"])]
        for blk in params["blocks"]:
            layers.append((blk["w1"], blk["b1"]))
            layers.append((blk["w2"], blk["b2"]))
        layers.append((params["w_out"], params["b_out"]))
        return layers

    def _pack_weights(self):
        cmax = self.cmax
        wrows, brows = [], []
        for it in range(self.num_unrolls):
            for params, is2d in ((self.spatial_params[it], True),
                                 (self.temporal_params[it], False)):
                for w, b in self._layer_list(params):
                    if is2d:
                        kh, kw, cin, cout = w.shape
                        wp = jnp.pad(w, ((0, 0), (0, 0),
                                         (0, cmax - cin), (0, cmax - cout)))
                        wrows.append(wp.reshape(kh * kw * cmax, cmax))
                    else:
                        k, cin, cout = w.shape
                        wp = jnp.pad(w, ((0, 0), (0, cmax - cin), (0, cmax - cout)))
                        wrows.append(wp.reshape(k * cmax, cmax))
                    brows.append(jnp.pad(b, (0, cmax - b.shape[0])).reshape(1, cmax))
        return jnp.concatenate(wrows, axis=0), jnp.concatenate(brows, axis=0)

    # -- reference-method equivalent -------------------------------------------
    def btranspose(self, matrix):
        return jnp.transpose(jnp.conj(matrix), (0, 2, 1))

    # -- fused forward ----------------------------------------------------------
    def demo_forward(self, L0, R0):
        # TODO(synk): the reference forward() is abstract and depends on y/A/BlockOp
        # data-consistency operators not defined in this module; this demo applies
        # the CNN proximal updates per unroll and returns the composed LR blocks.
        if self.num_emaps != 1:
            # TODO(synk): num_emaps > 1 needs the emap-interleaved channel
            # permutation of the PyTorch reshape; not wired into the fused kernel.
            raise NotImplementedError("fused kernel implemented for num_emaps == 1")

        B, M, nb = L0.shape
        T = R0.shape[1]
        bs = self.block_size
        assert M == bs * bs and nb == self.num_basis
        Cs = 2 * nb
        p = self.kernel_size // 2
        cmax = self.cmax

        # Complex -> stacked real/imag channels, zero-padded to the uniform
        # kernel channel width cmax (all convs then share one static shape).
        def to_real(x, n):
            xr = jnp.concatenate([jnp.real(x), jnp.imag(x)], axis=-1)
            return jnp.pad(xr.astype(jnp.float32),
                           ((0, 0), (0, 0), (0, cmax - 2 * n)))

        L_in = to_real(L0, nb)                        # (B, M, cmax)
        R_in = to_real(R0, nb)                        # (B, T, cmax)
        wpack, bpack = self._pack_weights()           # 2 packed weight operands

        out_rows = Cs + T
        out_lanes = _round_up(max(2 * M, M + T), 128)  # lane-dense output slab

        kern = functools.partial(
            _fused_unrolled_lr_kernel,
            num_unrolls=self.num_unrolls, num_resblocks=self.num_resblocks,
            H=bs, W=bs, T=T, num_basis=nb, ksize=self.kernel_size,
            circular=self.circular_pad, cmax=cmax)

        packed = pl.pallas_call(
            kern,
            out_shape=jax.ShapeDtypeStruct((B, out_rows, out_lanes), jnp.float32),
            grid=(B,),
            in_specs=[
                pl.BlockSpec((None, M, cmax), lambda i: (i, 0, 0)),   # L (squeezed B)
                pl.BlockSpec((None, T, cmax), lambda i: (i, 0, 0)),   # R (squeezed B)
                pl.BlockSpec(wpack.shape, lambda i: (0, 0)),          # packed weights
                pl.BlockSpec(bpack.shape, lambda i: (0, 0)),          # packed biases
            ],
            out_specs=pl.BlockSpec((None, out_rows, out_lanes),
                                   lambda i: (i, 0, 0)),
            scratch_shapes=[
                pltpu.VMEM((bs + 2 * p, bs + 2 * p, cmax), jnp.float32),  # 2-D pad
                pltpu.VMEM((T + 2 * p, cmax), jnp.float32),               # 1-D pad
            ],
            compiler_params=pltpu.CompilerParams(
                dimension_semantics=("parallel",),
                vmem_limit_bytes=32 * 1024 * 1024),
        )(L_in, R_in, wpack, bpack)

        # Unpack the lane-dense slab (cheap XLA slices/transposes).
        yLT = packed[:, 0:Cs, 0:M]                    # (B, 2nb, M)  = updated L^T
        yRT = packed[:, 0:Cs, M:M + T]                # (B, 2nb, T)  = updated R^T
        btr = packed[:, Cs:Cs + T, 0:M]               # (B, T, M)    = real(blocks)^T
        bti = packed[:, Cs:Cs + T, M:2 * M]           # (B, T, M)    = imag(blocks)^T

        L_new = jnp.transpose(lax.complex(yLT[:, :nb, :], yLT[:, nb:, :]), (0, 2, 1))
        R_new = jnp.transpose(lax.complex(yRT[:, :nb, :], yRT[:, nb:, :]), (0, 2, 1))
        blocks = jnp.transpose(lax.complex(btr, bti), (0, 2, 1))
        return L_new, R_new, blocks


# =============================================================================
# Pure-JAX (XLA) reference of the same forward, mirroring the PyTorch ordering.
# =============================================================================
def _conv2d_ref(x, w, b, relu):
    B, H, W, Cin = x.shape
    KH, KW, _, Cout = w.shape
    ph, pw = KH // 2, KW // 2
    xp = jnp.pad(x, ((0, 0), (ph, ph), (pw, pw), (0, 0)))
    y = jnp.zeros((B, H, W, Cout), jnp.float32)
    for kh in range(KH):
        for kw in range(KW):
            y = y + jnp.einsum("bhwc,co->bhwo", xp[:, kh:kh + H, kw:kw + W, :],
                               w[kh, kw], precision=jax.lax.Precision.HIGHEST)
    y = y + b.reshape(1, 1, 1, -1)
    return jnp.maximum(y, 0.0) if relu else y


def _conv1d_ref(x, w, b, relu, circular):
    B, T, Cin = x.shape
    K, _, Cout = w.shape
    p = K // 2
    if circular:
        xp = jnp.concatenate([x[:, T - p:, :], x, x[:, :p, :]], axis=1)
    else:
        xp = jnp.pad(x, ((0, 0), (p, p), (0, 0)))
    y = jnp.zeros((B, T, Cout), jnp.float32)
    for k in range(K):
        y = y + jnp.einsum("btc,co->bto", xp[:, k:k + T, :], w[k],
                           precision=jax.lax.Precision.HIGHEST)
    y = y + b.reshape(1, 1, -1)
    return jnp.maximum(y, 0.0) if relu else y


def _reference_forward(net, L0, R0):
    def resnet2d(x, prm):
        h = _conv2d_ref(x, prm["w_in"], prm["b_in"], True)
        for blk in prm["blocks"]:
            r = _conv2d_ref(h, blk["w1"], blk["b1"], True)
            r = _conv2d_ref(r, blk["w2"], blk["b2"], False)
            h = h + r
        return x + _conv2d_ref(h, prm["w_out"], prm["b_out"], False)

    def resnet1d(x, prm):
        h = _conv1d_ref(x, prm["w_in"], prm["b_in"], True, net.circular_pad)
        for blk in prm["blocks"]:
            r = _conv1d_ref(h, blk["w1"], blk["b1"], True, net.circular_pad)
            r = _conv1d_ref(r, blk["w2"], blk["b2"], False, net.circular_pad)
            h = h + r
        return x + _conv1d_ref(h, prm["w_out"], prm["b_out"], False, net.circular_pad)

    B, M, nb = L0.shape
    bs, ne = net.block_size, net.num_emaps
    L, R = L0, R0
    for it in range(net.num_unrolls):
        # spatial update (PyTorch NCHW ordering -> NHWC for the conv helper)
        x = jnp.transpose(L, (0, 2, 1)).reshape(B, nb * ne, bs, bs)
        xr = jnp.concatenate([jnp.real(x), jnp.imag(x)], axis=1)
        xr = jnp.transpose(xr, (0, 2, 3, 1)).astype(jnp.float32)
        yr = resnet2d(xr, net.spatial_params[it])
        yr = jnp.transpose(yr, (0, 3, 1, 2))
        yre, yim = jnp.split(yr, 2, axis=1)
        y = lax.complex(yre, yim).reshape(B, nb, ne * bs * bs)
        L = jnp.transpose(y, (0, 2, 1))
        # temporal update
        x = jnp.transpose(R, (0, 2, 1))
        xr = jnp.concatenate([jnp.real(x), jnp.imag(x)], axis=1)
        xr = jnp.transpose(xr, (0, 2, 1)).astype(jnp.float32)
        yr = resnet1d(xr, net.temporal_params[it])
        yr = jnp.transpose(yr, (0, 2, 1))
        yre, yim = jnp.split(yr, 2, axis=1)
        R = jnp.transpose(lax.complex(yre, yim), (0, 2, 1))
    blocks = jnp.einsum("bmk,btk->bmt", L, jnp.conj(R),
                        precision=jax.lax.Precision.HIGHEST)
    return L, R, blocks


# =============================================================================
if __name__ == "__main__":
    key = jax.random.PRNGKey(0)
    k_model, k_L, k_R = jax.random.split(key, 3)

    num_blocks = 2     # batch of image blocks
    num_emaps = 1
    block_size = 8
    num_basis = 4
    num_frames = 12

    net = UnrolledLRNetPallas(
        k_model,
        num_unrolls=2,
        num_resblocks=1,
        num_features=16,
        kernel_size=3,
        num_emaps=num_emaps,
        block_size=block_size,
        num_basis=num_basis,
        circular_pad=True,
        share_weights=False,
    )

    M = num_emaps * block_size ** 2
    kL1, kL2 = jax.random.split(k_L)
    kR1, kR2 = jax.random.split(k_R)
    L0 = lax.complex(
        jax.random.normal(kL1, (num_blocks, M, num_basis), jnp.float32),
        jax.random.normal(kL2, (num_blocks, M, num_basis), jnp.float32),
    )
    R0 = lax.complex(
        jax.random.normal(kR1, (num_blocks, num_frames, num_basis), jnp.float32),
        jax.random.normal(kR2, (num_blocks, num_frames, num_basis), jnp.float32),
    )

    fused = jax.jit(net.demo_forward)
    L, R, blocks = fused(L0, R0)
    jax.block_until_ready((L, R, blocks))

    assert L.shape == (num_blocks, M, num_basis) and L.dtype == jnp.complex64
    assert R.shape == (num_blocks, num_frames, num_basis) and R.dtype == jnp.complex64
    assert blocks.shape == (num_blocks, M, num_frames) and blocks.dtype == jnp.complex64

    # Correctness check against a pure-JAX (XLA) reference of the same network.
    ref_fn = jax.jit(lambda a, b: _reference_forward(net, a, b))
    L_r, R_r, blocks_r = ref_fn(L0, R0)
    jax.block_until_ready((L_r, R_r, blocks_r))
    np.testing.assert_allclose(np.asarray(L), np.asarray(L_r), rtol=5e-3, atol=5e-3)
    np.testing.assert_allclose(np.asarray(R), np.asarray(R_r), rtol=5e-3, atol=5e-3)
    np.testing.assert_allclose(np.asarray(blocks), np.asarray(blocks_r),
                               rtol=5e-3, atol=5e-3)

    print("KERNEL_OK")
</pallas_src>

<mosaic_0001>
module attributes {stable_mosaic.version = 11 : i64} {
  func.func @_fused_unrolled_lr_kernel(%arg0: i32, %arg1: memref<1x64x16xf32, #tpu.memory_space<vmem>>, %arg2: memref<1x12x16xf32, #tpu.memory_space<vmem>>, %arg3: memref<1536x16xf32, #tpu.memory_space<vmem>>, %arg4: memref<16x16xf32, #tpu.memory_space<vmem>>, %arg5: memref<1x20x128xf32, #tpu.memory_space<vmem>>, %arg6: memref<10x10x16xf32, #tpu.memory_space<vmem>>, %arg7: memref<14x16xf32, #tpu.memory_space<vmem>>) attributes {dimension_semantics = [#tpu.dimension_semantics<parallel>], iteration_bounds = array<i64: 2>, scalar_prefetch = 0 : i64, scratch_operands = 2 : i64, tpu.core_type = #tpu.core_type<tc>, window_params = [{transform_indices = @transform_0, window_bounds = array<i64: 1, 64, 16>}, {transform_indices = @transform_1, window_bounds = array<i64: 1, 12, 16>}, {pipeline_mode = #tpu.pipeline_mode<synchronous>, transform_indices = @transform_2, window_bounds = array<i64: 1536, 16>}, {pipeline_mode = #tpu.pipeline_mode<synchronous>, transform_indices = @transform_3, window_bounds = array<i64: 16, 16>}, {transform_indices = @transform_4, window_bounds = array<i64: 1, 20, 128>}]} {
    %cst = arith.constant 0.000000e+00 : f32
    %0 = vector.broadcast %cst : f32 to vector<10x10x16xf32>
    %c0 = arith.constant 0 : index
    %c0_0 = arith.constant 0 : index
    %c0_1 = arith.constant 0 : index
    %1 = vector.load %arg6[%c0, %c0_0, %c0_1] : memref<10x10x16xf32, #tpu.memory_space<vmem>>, vector<10x10x16xf32>
    tpu.vector_store %arg6[%c0, %c0_0, %c0_1], %0 {strides = array<i32>} : memref<10x10x16xf32, #tpu.memory_space<vmem>>, vector<10x10x16xf32>,
    %cst_2 = arith.constant 0.000000e+00 : f32
    %2 = vector.broadcast %cst_2 : f32 to vector<14x16xf32>
    %c0_3 = arith.constant 0 : index
    %c0_4 = arith.constant 0 : index
    %3 = vector.load %arg7[%c0_3, %c0_4] : memref<14x16xf32, #tpu.memory_space<vmem>>, vector<14x16xf32>
    tpu.vector_store %arg7[%c0_3, %c0_4], %2 {strides = array<i32>} : memref<14x16xf32, #tpu.memory_space<vmem>>, vector<14x16xf32>,
    %cst_5 = arith.constant 0.000000e+00 : f32
    %4 = vector.broadcast %cst_5 : f32 to vector<20x128xf32>
    %c0_6 = arith.constant 0 : index
    %c0_7 = arith.constant 0 : index
    %c0_8 = arith.constant 0 : index
    %5 = vector.load %arg5[%c0_6, %c0_7, %c0_8] : memref<1x20x128xf32, #tpu.memory_space<vmem>>, vector<1x20x128xf32>
    %6 = vector.shape_cast %5 : vector<1x20x128xf32> to vector<20x128xf32>
    %7 = vector.shape_cast %4 : vector<20x128xf32> to vector<1x20x128xf32>
    tpu.vector_store %arg5[%c0_6, %c0_7, %c0_8], %7 {strides = array<i32>} : memref<1x20x128xf32, #tpu.memory_space<vmem>>, vector<1x20x128xf32>,
    %c0_9 = arith.constant 0 : index
    %c0_10 = arith.constant 0 : index
    %c0_11 = arith.constant 0 : index
    %8 = vector.load %arg1[%c0_9, %c0_10, %c0_11] : memref<1x64x16xf32, #tpu.memory_space<vmem>>, vector<1x64x16xf32>
    %9 = vector.shape_cast %8 : vector<1x64x16xf32> to vector<64x16xf32>
    %c0_12 = arith.constant 0 : index
    %c0_13 = arith.constant 0 : index
    %c0_14 = arith.constant 0 : index
    %10 = vector.load %arg2[%c0_12, %c0_13, %c0_14] : memref<1x12x16xf32, #tpu.memory_space<vmem>>, vector<1x12x16xf32>
    %11 = vector.shape_cast %10 : vector<1x12x16xf32> to vector<12x16xf32>
    %12 = vector.shape_cast %9 : vector<64x16xf32> to vector<8x8x16xf32>
    %c1 = arith.constant 1 : index
    %c1_15 = arith.constant 1 : index
    %c0_16 = arith.constant 0 : index
    %13 = vector.load %arg6[%c1, %c1_15, %c0_16] : memref<10x10x16xf32, #tpu.memory_space<vmem>>, vector<8x8x16xf32>
    tpu.vector_store %arg6[%c1, %c1_15, %c0_16], %12 {strides = array<i32>} : memref<10x10x16xf32, #tpu.memory_space<vmem>>, vector<8x8x16xf32>,
    %c0_17 = arith.constant 0 : index
    %c0_18 = arith.constant 0 : index
    %c0_19 = arith.constant 0 : index
    %14 = vector.load %arg6[%c0_17, %c0_18, %c0_19] : memref<10x10x16xf32, #tpu.memory_space<vmem>>, vector<8x8x16xf32>
    %15 = vector.shape_cast %14 : vector<8x8x16xf32> to vector<64x16xf32>
    %c0_20 = arith.constant 0 : index
    %c0_21 = arith.constant 0 : index
    %16 = vector.load %arg3[%c0_20, %c0_21] : memref<1536x16xf32, #tpu.memory_space<vmem>>, vector<16x16xf32>
    %cst_22 = arith.constant dense<0.000000e+00> : vector<64x16xf32>
    %17 = tpu.matmul %15, %16, %cst_22 {dimension_numbers = #tpu.dot_dimension_numbers<[1], [0], [0], [1], [0, 0, 1, 1], [], []>} : vector<64x16xf32>, vector<16x16xf32>, vector<64x16xf32> -> vector<64x16xf32>
    %c0_23 = arith.constant 0 : index
    %c1_24 = arith.constant 1 : index
    %c0_25 = arith.constant 0 : index
    %18 = vector.load %arg6[%c0_23, %c1_24, %c0_25] : memref<10x10x16xf32, #tpu.memory_space<vmem>>, vector<8x8x16xf32>
    %19 = vector.shape_cast %18 : vector<8x8x16xf32> to vector<64x16xf32>
    %c16 = arith.constant 16 : index
    %c0_26 = arith.constant 0 : index
    %20 = vector.load %arg3[%c16, %c0_26] : memref<1536x16xf32, #tpu.memory_space<vmem>>, vector<16x16xf32>
    %cst_27 = arith.constant dense<0.000000e+00> : vector<64x16xf32>
    %21 = tpu.matmul %19, %20, %cst_27 {dimension_numbers = #tpu.dot_dimension_numbers<[1], [0], [0], [1], [0, 0, 1, 1], [], []>} : vector<64x16xf32>, vector<16x16xf32>, vector<64x16xf32> -> vector<64x16xf32>
    %22 = arith.addf %17, %21 : vector<64x16xf32>
    %c0_28 = arith.constant 0 : index
    %c2 = arith.constant 2 : index
    %c0_29 = arith.constant 0 : index
    %23 = vector.load %arg6[%c0_28, %c2, %c0_29] : memref<10x10x16xf32, #tpu.memory_space<vmem>>, vector<8x8x16xf32>
    %24 = vector.shape_cast %23 : vector<8x8x16xf32> to vector<64x16xf32>
    %c32 = arith.constant 32 : index
    %c0_30 = arith.constant 0 : index
    %25 = vector.load %arg3[%c32, %c0_30] : memref<1536x16xf32, #tpu.memory_space<vmem>>, vector<16x16xf32>
    %cst_31 = arith.constant dense<0.000000e+00> : vector<64x16xf32>
    %26 = tpu.matmul %24, %25, %cst_31 {dimension_numbers = #tpu.dot_dimension_numbers<[1], [0], [0], [1], [0, 0, 1, 1], [], []>} : vector<64x16xf32>, vector<16x16xf32>, vector<64x16xf32> -> vector<64x16xf32>
    %27 = arith.addf %22, %26 : vector<64x16xf32>
    %c1_32 = arith.constant 1 : index
    %c0_33 = arith.constant 0 : index
    %c0_34 = arith.constant 0 : index
    %28 = vector.load %arg6[%c1_32, %c0_33, %c0_34] : memref<10x10x16xf32, #tpu.memory_space<vmem>>, vector<8x8x16xf32>
    %29 = vector.shape_cast %28 : vector<8x8x16xf32> to vector<64x16xf32>
    %c48 = arith.constant 48 : index
    %c0_35 = arith.constant 0 : index
    %30 = vector.load %arg3[%c48, %c0_35] : memref<1536x16xf32, #tpu.memory_space<vmem>>, vector<16x16xf32>
    %cst_36 = arith.constant dense<0.000000e+00> : vector<64x16xf32>
    %31 = tpu.matmul %29, %30, %cst_36 {dimension_numbers = #tpu.dot_dimension_numbers<[1], [0], [0], [1], [0, 0, 1, 1], [], []>} : vector<64x16xf32>, vector<16x16xf32>, vector<64x16xf32> -> vector<64x16xf32>
    %32 = arith.addf %27, %31 : vector<64x16xf32>
    %c1_37 = arith.constant 1 : index
    %c1_38 = arith.constant 1 : index
    %c0_39 = arith.constant 0 : index
    %33 = vector.load %arg6[%c1_37, %c1_38, %c0_39] : memref<10x10x16xf32, #tpu.memory_space<vmem>>, vector<8x8x16xf32>
    %34 = vector.shape_cast %33 : vector<8x8x16xf32> to vector<64x16xf32>
    %c64 = arith.constant 64 : index
    %c0_40 = arith.constant 0 : index
    %35 = vector.load %arg3[%c64, %c0_40] : memref<1536x16xf32, #tpu.memory_space<vmem>>, vector<16x16xf32>
    %cst_41 = arith.constant dense<0.000000e+00> : vector<64x16xf32>
    %36 = tpu.matmul %34, %35, %cst_41 {dimension_numbers = #tpu.dot_dimension_numbers<[1], [0], [0], [1], [0, 0, 1, 1], [], []>} : vector<64x16xf32>, vector<16x16xf32>, vector<64x16xf32> -> vector<64x16xf32>
    %37 = arith.addf %32, %36 : vector<64x16xf32>
    %c1_42 = arith.constant 1 : index
    %c2_43 = arith.constant 2 : index
    %c0_44 = arith.constant 0 : index
    %38 = vector.load %arg6[%c1_42, %c2_43, %c0_44] : memref<10x10x16xf32, #tpu.memory_space<vmem>>, vector<8x8x16xf32>
    %39 = vector.shape_cast %38 : vector<8x8x16xf32> to vector<64x16xf32>
    %c80 = arith.constant 80 : index
    %c0_45 = arith.constant 0 : index
    %40 = vector.load %arg3[%c80, %c0_45] : memref<1536x16xf32, #tpu.memory_space<vmem>>, vector<16x16xf32>
    %cst_46 = arith.constant dense<0.000000e+00> : vector<64x16xf32>
    %41 = tpu.matmul %39, %40, %cst_46 {dimension_numbers = #tpu.dot_dimension_numbers<[1], [0], [0], [1], [0, 0, 1, 1], [], []>} : vector<64x16xf32>, vector<16x16xf32>, vector<64x16xf32> -> vector<64x16xf32>
    %42 = arith.addf %37, %41 : vector<64x16xf32>
    %c2_47 = arith.constant 2 : index
    %c0_48 = arith.constant 0 : index
    %c0_49 = arith.constant 0 : index
    %43 = vector.load %arg6[%c2_47, %c0_48, %c0_49] : memref<10x10x16xf32, #tpu.memory_space<vmem>>, vector<8x8x16xf32>
    %44 = vector.shape_cast %43 : vector<8x8x16xf32> to vector<64x16xf32>
    %c96 = arith.constant 96 : index
    %c0_50 = arith.constant 0 : index
    %45 = vector.load %arg3[%c96, %c0_50] : memref<1536x16xf32, #tpu.memory_space<vmem>>, vector<16x16xf32>
    %cst_51 = arith.constant dense<0.000000e+00> : vector<64x16xf32>
    %46 = tpu.matmul %44, %45, %cst_51 {dimension_numbers = #tpu.dot_dimension_numbers<[1], [0], [0], [1], [0, 0, 1, 1], [], []>} : vector<64x16xf32>, vector<16x16xf32>, vector<64x16xf32> -> vector<64x16xf32>
    %47 = arith.addf %42, %46 : vector<64x16xf32>
    %c2_52 = arith.constant 2 : index
    %c1_53 = arith.constant 1 : index
    %c0_54 = arith.constant 0 : index
    %48 = vector.load %arg6[%c2_52, %c1_53, %c0_54] : memref<10x10x16xf32, #tpu.memory_space<vmem>>, vector<8x8x16xf32>
    %49 = vector.shape_cast %48 : vector<8x8x16xf32> to vector<64x16xf32>
    %c112 = arith.constant 112 : index
    %c0_55 = arith.constant 0 : index
    %50 = vector.load %arg3[%c112, %c0_55] : memref<1536x16xf32, #tpu.memory_space<vmem>>, vector<16x16xf32>
    %cst_56 = arith.constant dense<0.000000e+00> : vector<64x16xf32>
    %51 = tpu.matmul %49, %50, %cst_56 {dimension_numbers = #tpu.dot_dimension_numbers<[1], [0], [0], [1], [0, 0, 1, 1], [], []>} : vector<64x16xf32>, vector<16x16xf32>, vector<64x16xf32> -> vector<64x16xf32>
    %52 = arith.addf %47, %51 : vector<64x16xf32>
    %c2_57 = arith.constant 2 : index
    %c2_58 = arith.constant 2 : index
    %c0_59 = arith.constant 0 : index
    %53 = vector.load %arg6[%c2_57, %c2_58, %c0_59] : memref<10x10x16xf32, #tpu.memory_space<vmem>>, vector<8x8x16xf32>
    %54 = vector.shape_cast %53 : vector<8x8x16xf32> to vector<64x16xf32>
    %c128 = arith.constant 128 : index
    %c0_60 = arith.constant 0 : index
    %55 = vector.load %arg3[%c128, %c0_60] : memref<1536x16xf32, #tpu.memory_space<vmem>>, vector<16x16xf32>
    %cst_61 = arith.constant dense<0.000000e+00> : vector<64x16xf32>
    %56 = tpu.matmul %54, %55, %cst_61 {dimension_numbers = #tpu.dot_dimension_numbers<[1], [0], [0], [1], [0, 0, 1, 1], [], []>} : vector<64x16xf32>, vector<16x16xf32>, vector<64x16xf32> -> vector<64x16xf32>
    %57 = arith.addf %52, %56 : vector<64x16xf32>
    %c0_62 = arith.constant 0 : index
    %c0_63 = arith.constant 0 : index
    %58 = vector.load %arg4[%c0_62, %c0_63] : memref<16x16xf32, #tpu.memory_space<vmem>>, vector<1x16xf32>
    %59 = vector.broadcast %58 : vector<1x16xf32> to vector<64x16xf32>
    %60 = arith.addf %57, %59 : vector<64x16xf32>
    %cst_64 = arith.constant 0.000000e+00 : f32
    %61 = vector.broadcast %cst_64 : f32 to vector<64x16xf32>
    %62 = arith.maximumf %60, %61 : vector<64x16xf32>
    %63 = vector.shape_cast %62 : vector<64x16xf32> to vector<8x8x16xf32>
    %c1_65 = arith.constant 1 : index
    %c1_66 = arith.constant 1 : index
    %c0_67 = arith.constant 0 : index
    %64 = vector.load %arg6[%c1_65, %c1_66, %c0_67] : memref<10x10x16xf32, #tpu.memory_space<vmem>>, vector<8x8x16xf32>
    tpu.vector_store %arg6[%c1_65, %c1_66, %c0_67], %63 {strides = array<i32>} : memref<10x10x16xf32, #tpu.memory_space<vmem>>, vector<8x8x16xf32>,
    %c0_68 = arith.constant 0 : index
    %c0_69 = arith.constant 0 : index
    %c0_70 = arith.constant 0 : index
    %65 = vector.load %arg6[%c0_68, %c0_69, %c0_70] : memref<10x10x16xf32, #tpu.memory_space<vmem>>, vector<8x8x16xf32>
    %66 = vector.shape_cast %65 : vector<8x8x16xf32> to vector<64x16xf32>
    %c144 = arith.constant 144 : index
    %c0_71 = arith.constant 0 : index
    %67 = vector.load %arg3[%c144, %c0_71] : memref<1536x16xf32, #tpu.memory_space<vmem>>, vector<16x16xf32>
    %cst_72 = arith.constant dense<0.000000e+00> : vector<64x16xf32>
    %68 = tpu.matmul %66, %67, %cst_72 {dimension_numbers = #tpu.dot_dimension_numbers<[1], [0], [0], [1], [0, 0, 1, 1], [], []>} : vector<64x16xf32>, vector<16x16xf32>, vector<64x16xf32> -> vector<64x16xf32>
    %c0_73 = arith.constant 0 : index
    %c1_74 = arith.constant 1 : index
    %c0_75 = arith.constant 0 : index
    %69 = vector.load %arg6[%c0_73, %c1_74, %c0_75] : memref<10x10x16xf32, #tpu.memory_space<vmem>>, vector<8x8x16xf32>
    %70 = vector.shape_cast %69 : vector<8x8x16xf32> to vector<64x16xf32>
    %c160 = arith.constant 160 : index
    %c0_76 = arith.constant 0 : index
    %71 = vector.load %arg3[%c160, %c0_76] : memref<1536x16xf32, #tpu.memory_space<vmem>>, vector<16x16xf32>
    %cst_77 = arith.constant dense<0.000000e+00> : vector<64x16xf32>
    %72 = tpu.matmul %70, %71, %cst_77 {dimension_numbers = #tpu.dot_dimension_numbers<[1], [0], [0], [1], [0, 0, 1, 1], [], []>} : vector<64x16xf32>, vector<16x16xf32>, vector<64x16xf32> -> vector<64x16xf32>
    %73 = arith.addf %68, %72 : vector<64x16xf32>
    %c0_78 = arith.constant 0 : index
    %c2_79 = arith.constant 2 : index
    %c0_80 = arith.constant 0 : index
    %74 = vector.load %arg6[%c0_78, %c2_79, %c0_80] : memref<10x10x16xf32, #tpu.memory_space<vmem>>, vector<8x8x16xf32>
    %75 = vector.shape_cast %74 : vector<8x8x16xf32> to vector<64x16xf32>
    %c176 = arith.constant 176 : index
    %c0_81 = arith.constant 0 : index
    %76 = vector.load %arg3[%c176, %c0_81] : memref<1536x16xf32, #tpu.memory_space<vmem>>, vector<16x16xf32>
    %cst_82 = arith.constant dense<0.000000e+00> : vector<64x16xf32>
    %77 = tpu.matmul %75, %76, %cst_82 {dimension_numbers = #tpu.dot_dimension_numbers<[1], [0], [0], [1], [0, 0, 1, 1], [], []>} : vector<64x16xf32>, vector<16x16xf32>, vector<64x16xf32> -> vector<64x16xf32>
    %78 = arith.addf %73, %77 : vector<64x16xf32>
    %c1_83 = arith.constant 1 : index
    %c0_84 = arith.constant 0 : index
    %c0_85 = arith.constant 0 : index
    %79 = vector.load %arg6[%c1_83, %c0_84, %c0_85] : memref<10x10x16xf32, #tpu.memory_space<vmem>>, vector<8x8x16xf32>
    %80 = vector.shape_cast %79 : vector<8x8x16xf32> to vector<64x16xf32>
    %c192 = arith.constant 192 : index
    %c0_86 = arith.constant 0 : index
    %81 = vector.load %arg3[%c192, %c0_86] : memref<1536x16xf32, #tpu.memory_space<vmem>>, vector<16x16xf32>
    %cst_87 = arith.constant dense<0.000000e+00> : vector<64x16xf32>
    %82 = tpu.matmul %80, %81, %cst_87 {dimension_numbers = #tpu.dot_dimension_numbers<[1], [0], [0], [1], [0, 0, 1, 1], [], []>} : vector<64x16xf32>, vector<16x16xf32>, vector<64x16xf32> -> vector<64x16xf32>
    %83 = arith.addf %78, %82 : vector<64x16xf32>
    %c1_88 = arith.constant 1 : index
    %c1_89 = arith.constant 1 : index
    %c0_90 = arith.constant 0 : index
    %84 = vector.load %arg6[%c1_88, %c1_89, %c0_90] : memref<10x10x16xf32, #tpu.memory_space<vmem>>, vector<8x8x16xf32>
    %85 = vector.shape_cast %84 : vector<8x8x16xf32> to vector<64x16xf32>
    %c208 = arith.constant 208 : index
    %c0_91 = arith.constant 0 : index
    %86 = vector.load %arg3[%c208, %c0_91] : memref<1536x16xf32, #tpu.memory_space<vmem>>, vector<16x16xf32>
    %cst_92 = arith.constant dense<0.000000e+00> : vector<64x16xf32>
    %87 = tpu.matmul %85, %86, %cst_92 {dimension_numbers = #tpu.dot_dimension_numbers<[1], [0], [0], [1], [0, 0, 1, 1], [], []>} : vector<64x16xf32>, vector<16x16xf32>, vector<64x16xf32> -> vector<64x16xf32>
    %88 = arith.addf %83, %87 : vector<64x16xf32>
    %c1_93 = arith.constant 1 : index
    %c2_94 = arith.constant 2 : index
    %c0_95 = arith.constant 0 : index
    %89 = vector.load %arg6[%c1_93, %c2_94, %c0_95] : memref<10x10x16xf32, #tpu.memory_space<vmem>>, vector<8x8x16xf32>
    %90 = vector.shape_cast %89 : vector<8x8x16xf32> to vector<64x16xf32>
    %c224 = arith.constant 224 : index
    %c0_96 = arith.constant 0 : index
    %91 = vector.load %arg3[%c224, %c0_96] : memref<1536x16xf32, #tpu.memory_space<vmem>>, vector<16x16xf32>
    %cst_97 = arith.constant dense<0.000000e+00> : vector<64x16xf32>
    %92 = tpu.matmul %90, %91, %cst_97 {dimension_numbers = #tpu.dot_dimension_numbers<[1], [0], [0], [1], [0, 0, 1, 1], [], []>} : vector<64x16xf32>, vector<16x16xf32>, vector<64x16xf32> -> vector<64x16xf32>
    %93 = arith.addf %88, %92 : vector<64x16xf32>
    %c2_98 = arith.constant 2 : index
    %c0_99 = arith.constant 0 : index
    %c0_100 = arith.constant 0 : index
    %94 = vector.load %arg6[%c2_98, %c0_99, %c0_100] : memref<10x10x16xf32, #tpu.memory_space<vmem>>, vector<8x8x16xf32>
    %95 = vector.shape_cast %94 : vector<8x8x16xf32> to vector<64x16xf32>
    %c240 = arith.constant 240 : index
    %c0_101 = arith.constant 0 : index
    %96 = vector.load %arg3[%c240, %c0_101] : memref<1536x16xf32, #tpu.memory_space<vmem>>, vector<16x16xf32>
    %cst_102 = arith.constant dense<0.000000e+00> : vector<64x16xf32>
    %97 = tpu.matmul %95, %96, %cst_102 {dimension_numbers = #tpu.dot_dimension_numbers<[1], [0], [0], [1], [0, 0, 1, 1], [], []>} : vector<64x16xf32>, vector<16x16xf32>, vector<64x16xf32> -> vector<64x16xf32>
    %98 = arith.addf %93, %97 : vector<64x16xf32>
    %c2_103 = arith.constant 2 : index
    %c1_104 = arith.constant 1 : index
    %c0_105 = arith.constant 0 : index
    %99 = vector.load %arg6[%c2_103, %c1_104, %c0_105] : memref<10x10x16xf32, #tpu.memory_space<vmem>>, vector<8x8x16xf32>
    %100 = vector.shape_cast %99 : vector<8x8x16xf32> to vector<64x16xf32>
    %c256 = arith.constant 256 : index
    %c0_106 = arith.constant 0 : index
    %101 = vector.load %arg3[%c256, %c0_106] : memref<1536x16xf32, #tpu.memory_space<vmem>>, vector<16x16xf32>
    %cst_107 = arith.constant dense<0.000000e+00> : vector<64x16xf32>
    %102 = tpu.matmul %100, %101, %cst_107 {dimension_numbers = #tpu.dot_dimension_numbers<[1], [0], [0], [1], [0, 0, 1, 1], [], []>} : vector<64x16xf32>, vector<16x16xf32>, vector<64x16xf32> -> vector<64x16xf32>
    %103 = arith.addf %98, %102 : vector<64x16xf32>
    %c2_108 = arith.constant 2 : index
    %c2_109 = arith.constant 2 : index
    %c0_110 = arith.constant 0 : index
    %104 = vector.load %arg6[%c2_108, %c2_109, %c0_110] : memref<10x10x16xf32, #tpu.memory_space<vmem>>, vector<8x8x16xf32>
    %105 = vector.shape_cast %104 : vector<8x8x16xf32> to vector<64x16xf32>
    %c272 = arith.constant 272 : index
    %c0_111 = arith.constant 0 : index
    %106 = vector.load %arg3[%c272, %c0_111] : memref<1536x16xf32, #tpu.memory_space<vmem>>, vector<16x16xf32>
    %cst_112 = arith.constant dense<0.000000e+00> : vector<64x16xf32>
    %107 = tpu.matmul %105, %106, %cst_112 {dimension_numbers = #tpu.dot_dimension_numbers<[1], [0], [0], [1], [0, 0, 1, 1], [], []>} : vector<64x16xf32>, vector<16x16xf32>, vector<64x16xf32> -> vector<64x16xf32>
    %108 = arith.addf %103, %107 : vector<64x16xf32>
    %c1_113 = arith.constant 1 : index
    %c0_114 = arith.constant 0 : index
    %109 = vector.load %arg4[%c1_113, %c0_114] : memref<16x16xf32, #tpu.memory_space<vmem>>, vector<1x16xf32>
    %110 = vector.broadcast %109 : vector<1x16xf32> to vector<64x16xf32>
    %111 = arith.addf %108, %110 : vector<64x16xf32>
    %cst_115 = arith.constant 0.000000e+00 : f32
    %112 = vector.broadcast %cst_115 : f32 to vector<64x16xf32>
    %113 = arith.maximumf %111, %112 : vector<64x16xf32>
    %114 = vector.shape_cast %113 : vector<64x16xf32> to vector<8x8x16xf32>
    %c1_116 = arith.constant 1 : index
    %c1_117 = arith.constant 1 : index
    %c0_118 = arith.constant 0 : index
    %115 = vector.load %arg6[%c1_116, %c1_117, %c0_118] : memref<10x10x16xf32, #tpu.memory_space<vmem>>, vector<8x8x16xf32>
    tpu.vector_store %arg6[%c1_116, %c1_117, %c0_118], %114 {strides = array<i32>} : memref<10x10x16xf32, #tpu.memory_space<vmem>>, vector<8x8x16xf32>,
    %c0_119 = arith.constant 0 : index
    %c0_120 = arith.constant 0 : index
    %c0_121 = arith.constant 0 : index
    %116 = vector.load %arg6[%c0_119, %c0_120, %c0_121] : memref<10x10x16xf32, #tpu.memory_space<vmem>>, vector<8x8x16xf32>
    %117 = vector.shape_cast %116 : vector<8x8x16xf32> to vector<64x16xf32>
    %c288 = arith.constant 288 : index
    %c0_122 = arith.constant 0 : index
    %118 = vector.load %arg3[%c288, %c0_122] : memref<1536x16xf32, #tpu.memory_space<vmem>>, vector<16x16xf32>
    %cst_123 = arith.constant dense<0.000000e+00> : vector<64x16xf32>
    %119 = tpu.matmul %117, %118, %cst_123 {dimension_numbers = #tpu.dot_dimension_numbers<[1], [0], [0], [1], [0, 0, 1, 1], [], []>} : vector<64x16xf32>, vector<16x16xf32>, vector<64x16xf32> -> vector<64x16xf32>
    %c0_124 = arith.constant 0 : index
    %c1_125 = arith.constant 1 : index
    %c0_126 = arith.constant 0 : index
    %120 = vector.load %arg6[%c0_124, %c1_125, %c0_126] : memref<10x10x16xf32, #tpu.memory_space<vmem>>, vector<8x8x16xf32>
    %121 = vector.shape_cast %120 : vector<8x8x16xf32> to vector<64x16xf32>
    %c304 = arith.constant 304 : index
    %c0_127 = arith.constant 0 : index
    %122 = vector.load %arg3[%c304, %c0_127] : memref<1536x16xf32, #tpu.memory_space<vmem>>, vector<16x16xf32>
    %cst_128 = arith.constant dense<0.000000e+00> : vector<64x16xf32>
    %123 = tpu.matmul %121, %122, %cst_128 {dimension_numbers = #tpu.dot_dimension_numbers<[1], [0], [0], [1], [0, 0, 1, 1], [], []>} : vector<64x16xf32>, vector<16x16xf32>, vector<64x16xf32> -> vector<64x16xf32>
    %124 = arith.addf %119, %123 : vector<64x16xf32>
    %c0_129 = arith.constant 0 : index
    %c2_130 = arith.constant 2 : index
    %c0_131 = arith.constant 0 : index
    %125 = vector.load %arg6[%c0_129, %c2_130, %c0_131] : memref<10x10x16xf32, #tpu.memory_space<vmem>>, vector<8x8x16xf32>
    %126 = vector.shape_cast %125 : vector<8x8x16xf32> to vector<64x16xf32>
    %c320 = arith.constant 320 : index
    %c0_132 = arith.constant 0 : index
    %127 = vector.load %arg3[%c320, %c0_132] : memref<1536x16xf32, #tpu.memory_space<vmem>>, vector<16x16xf32>
    %cst_133 = arith.constant dense<0.000000e+00> : vector<64x16xf32>
    %128 = tpu.matmul %126, %127, %cst_133 {dimension_numbers = #tpu.dot_dimension_numbers<[1], [0], [0], [1], [0, 0, 1, 1], [], []>} : vector<64x16xf32>, vector<16x16xf32>, vector<64x16xf32> -> vector<64x16xf32>
    %129 = arith.addf %124, %128 : vector<64x16xf32>
    %c1_134 = arith.constant 1 : index
    %c0_135 = arith.constant 0 : index
    %c0_136 = arith.constant 0 : index
    %130 = vector.load %arg6[%c1_134, %c0_135, %c0_136] : memref<10x10x16xf32, #tpu.memory_space<vmem>>, vector<8x8x16xf32>
    %131 = vector.shape_cast %130 : vector<8x8x16xf32> to vector<64x16xf32>
    %c336 = arith.constant 336 : index
    %c0_137 = arith.constant 0 : index
    %132 = vector.load %arg3[%c336, %c0_137] : memref<1536x16xf32, #tpu.memory_space<vmem>>, vector<16x16xf32>
    %cst_138 = arith.constant dense<0.000000e+00> : vector<64x16xf32>
    %133 = tpu.matmul %131, %132, %cst_138 {dimension_numbers = #tpu.dot_dimension_numbers<[1], [0], [0], [1], [0, 0, 1, 1], [], []>} : vector<64x16xf32>, vector<16x16xf32>, vector<64x16xf32> -> vector<64x16xf32>
    %134 = arith.addf %129, %133 : vector<64x16xf32>
    %c1_139 = arith.constant 1 : index
    %c1_140 = arith.constant 1 : index
    %c0_141 = arith.constant 0 : index
    %135 = vector.load %arg6[%c1_139, %c1_140, %c0_141] : memref<10x10x16xf32, #tpu.memory_space<vmem>>, vector<8x8x16xf32>
    %136 = vector.shape_cast %135 : vector<8x8x16xf32> to vector<64x16xf32>
    %c352 = arith.constant 352 : index
    %c0_142 = arith.constant 0 : index
    %137 = vector.load %arg3[%c352, %c0_142] : memref<1536x16xf32, #tpu.memory_space<vmem>>, vector<16x16xf32>
    %cst_143 = arith.constant dense<0.000000e+00> : vector<64x16xf32>
    %138 = tpu.matmul %136, %137, %cst_143 {dimension_numbers = #tpu.dot_dimension_numbers<[1], [0], [0], [1], [0, 0, 1, 1], [], []>} : vector<64x16xf32>, vector<16x16xf32>, vector<64x16xf32> -> vector<64x16xf32>
    %139 = arith.addf %134, %138 : vector<64x16xf32>
    %c1_144 = arith.constant 1 : index
    %c2_145 = arith.constant 2 : index
    %c0_146 = arith.constant 0 : index
    %140 = vector.load %arg6[%c1_144, %c2_145, %c0_146] : memref<10x10x16xf32, #tpu.memory_space<vmem>>, vector<8x8x16xf32>
    %141 = vector.shape_cast %140 : vector<8x8x16xf32> to vector<64x16xf32>
    %c368 = arith.constant 368 : index
    %c0_147 = arith.constant 0 : index
    %142 = vector.load %arg3[%c368, %c0_147] : memref<1536x16xf32, #tpu.memory_space<vmem>>, vector<16x16xf32>
    %cst_148 = arith.constant dense<0.000000e+00> : vector<64x16xf32>
    %143 = tpu.matmul %141, %142, %cst_148 {dimension_numbers = #tpu.dot_dimension_numbers<[1], [0], [0], [1], [0, 0, 1, 1], [], []>} : vector<64x16xf32>, vector<16x16xf32>, vector<64x16xf32> -> vector<64x16xf32>
    %144 = arith.addf %139, %143 : vector<64x16xf32>
    %c2_149 = arith.constant 2 : index
    %c0_150 = arith.constant 0 : index
    %c0_151 = arith.constant 0 : index
    %145 = vector.load %arg6[%c2_149, %c0_150, %c0_151] : memref<10x10x16xf32, #tpu.memory_space<vmem>>, vector<8x8x16xf32>
    %146 = vector.shape_cast %145 : vector<8x8x16xf32> to vector<64x16xf32>
    %c384 = arith.constant 384 : index
    %c0_152 = arith.constant 0 : index
    %147 = vector.load %arg3[%c384, %c0_152] : memref<1536x16xf32, #tpu.memory_space<vmem>>, vector<16x16xf32>
    %cst_153 = arith.constant dense<0.000000e+00> : vector<64x16xf32>
    %148 = tpu.matmul %146, %147, %cst_153 {dimension_numbers = #tpu.dot_dimension_numbers<[1], [0], [0], [1], [0, 0, 1, 1], [], []>} : vector<64x16xf32>, vector<16x16xf32>, vector<64x16xf32> -> vector<64x16xf32>
    %149 = arith.addf %144, %148 : vector<64x16xf32>
    %c2_154 = arith.constant 2 : index
    %c1_155 = arith.constant 1 : index
    %c0_156 = arith.constant 0 : index
    %150 = vector.load %arg6[%c2_154, %c1_155, %c0_156] : memref<10x10x16xf32, #tpu.memory_space<vmem>>, vector<8x8x16xf32>
    %151 = vector.shape_cast %150 : vector<8x8x16xf32> to vector<64x16xf32>
    %c400 = arith.constant 400 : index
    %c0_157 = arith.constant 0 : index
    %152 = vector.load %arg3[%c400, %c0_157] : memref<1536x16xf32, #tpu.memory_space<vmem>>, vector<16x16xf32>
    %cst_158 = arith.constant dense<0.000000e+00> : vector<64x16xf32>
    %153 = tpu.matmul %151, %152, %cst_158 {dimension_numbers = #tpu.dot_dimension_numbers<[1], [0], [0], [1], [0, 0, 1, 1], [], []>} : vector<64x16xf32>, vector<16x16xf32>, vector<64x16xf32> -> vector<64x16xf32>
    %154 = arith.addf %149, %153 : vector<64x16xf32>
    %c2_159 = arith.constant 2 : index
    %c2_160 = arith.constant 2 : index
    %c0_161 = arith.constant 0 : index
    %155 = vector.load %arg6[%c2_159, %c2_160, %c0_161] : memref<10x10x16xf32, #tpu.memory_space<vmem>>, vector<8x8x16xf32>
    %156 = vector.shape_cast %155 : vector<8x8x16xf32> to vector<64x16xf32>
    %c416 = arith.constant 416 : index
    %c0_162 = arith.constant 0 : index
    %157 = vector.load %arg3[%c416, %c0_162] : memref<1536x16xf32, #tpu.memory_space<vmem>>, vector<16x16xf32>
    %cst_163 = arith.constant dense<0.000000e+00> : vector<64x16xf32>
    %158 = tpu.matmul %156, %157, %cst_163 {dimension_numbers = #tpu.dot_dimension_numbers<[1], [0], [0], [1], [0, 0, 1, 1], [], []>} : vector<64x16xf32>, vector<16x16xf32>, vector<64x16xf32> -> vector<64x16xf32>
    %159 = arith.addf %154, %158 : vector<64x16xf32>
    %c2_164 = arith.constant 2 : index
    %c0_165 = arith.constant 0 : index
    %160 = vector.load %arg4[%c2_164, %c0_165] : memref<16x16xf32, #tpu.memory_space<vmem>>, vector<1x16xf32>
    %161 = vector.broadcast %160 : vector<1x16xf32> to vector<64x16xf32>
    %162 = arith.addf %159, %161 : vector<64x16xf32>
    %163 = arith.addf %62, %162 : vector<64x16xf32>
    %164 = vector.shape_cast %163 : vector<64x16xf32> to vector<8x8x16xf32>
    %c1_166 = arith.constant 1 : index
    %c1_167 = arith.constant 1 : index
    %c0_168 = arith.constant 0 : index
    %165 = vector.load %arg6[%c1_166, %c1_167, %c0_168] : memref<10x10x16xf32, #tpu.memory_space<vmem>>, vector<8x8x16xf32>
    tpu.vector_store %arg6[%c1_166, %c1_167, %c0_168], %164 {strides = array<i32>} : memref<10x10x16xf32, #tpu.memory_space<vmem>>, vector<8x8x16xf32>,
    %c0_169 = arith.constant 0 : index
    %c0_170 = arith.constant 0 : index
    %c0_171 = arith.constant 0 : index
    %166 = vector.load %arg6[%c0_169, %c0_170, %c0_171] : memref<10x10x16xf32, #tpu.memory_space<vmem>>, vector<8x8x16xf32>
    %167 = vector.shape_cast %166 : vector<8x8x16xf32> to vector<64x16xf32>
    %c432 = arith.constant 432 : index
    %c0_172 = arith.constant 0 : index
    %168 = vector.load %arg3[%c432, %c0_172] : memref<1536x16xf32, #tpu.memory_space<vmem>>, vector<16x16xf32>
    %cst_173 = arith.constant dense<0.000000e+00> : vector<64x16xf32>
    %169 = tpu.matmul %167, %168, %cst_173 {dimension_numbers = #tpu.dot_dimension_numbers<[1], [0], [0], [1], [0, 0, 1, 1], [], []>} : vector<64x16xf32>, vector<16x16xf32>, vector<64x16xf32> -> vector<64x16xf32>
    %c0_174 = arith.constant 0 : index
    %c1_175 = arith.constant 1 : index
    %c0_176 = arith.constant 0 : index
    %170 = vector.load %arg6[%c0_174, %c1_175, %c0_176] : memref<10x10x16xf32, #tpu.memory_space<vmem>>, vector<8x8x16xf32>
    %171 = vector.shape_cast %170 : vector<8x8x16xf32> to vector<64x16xf32>
    %c448 = arith.constant 448 : index
    %c0_177 = arith.constant 0 : index
    %172 = vector.load %arg3[%c448, %c0_177] : memref<1536x16xf32, #tpu.memory_space<vmem>>, vector<16x16xf32>
    %cst_178 = arith.constant dense<0.000000e+00> : vector<64x16xf32>
    %173 = tpu.matmul %171, %172, %cst_178 {dimension_numbers = #tpu.dot_dimension_numbers<[1], [0], [0], [1], [0, 0, 1, 1], [], []>} : vector<64x16xf32>, vector<16x16xf32>, vector<64x16xf32> -> vector<64x16xf32>
    %174 = arith.addf %169, %173 : vector<64x16xf32>
    %c0_179 = arith.constant 0 : index
    %c2_180 = arith.constant 2 : index
    %c0_181 = arith.constant 0 : index
    %175 = vector.load %arg6[%c0_179, %c2_180, %c0_181] : memref<10x10x16xf32, #tpu.memory_space<vmem>>, vector<8x8x16xf32>
    %176 = vector.shape_cast %175 : vector<8x8x16xf32> to vector<64x16xf32>
    %c464 = arith.constant 464 : index
    %c0_182 = arith.constant 0 : index
    %177 = vector.load %arg3[%c464, %c0_182] : memref<1536x16xf32, #tpu.memory_space<vmem>>, vector<16x16xf32>
    %cst_183 = arith.constant dense<0.000000e+00> : vector<64x16xf32>
    %178 = tpu.matmul %176, %177, %cst_183 {dimension_numbers = #tpu.dot_dimension_numbers<[1], [0], [0], [1], [0, 0, 1, 1], [], []>} : vector<64x16xf32>, vector<16x16xf32>, vector<64x16xf32> -> vector<64x16xf32>
    %179 = arith.addf %174, %178 : vector<64x16xf32>
    %c1_184 = arith.constant 1 : index
    %c0_185 = arith.constant 0 : index
    %c0_186 = arith.constant 0 : index
    %180 = vector.load %arg6[%c1_184, %c0_185, %c0_186] : memref<10x10x16xf32, #tpu.memory_space<vmem>>, vector<8x8x16xf32>
    %181 = vector.shape_cast %180 : vector<8x8x16xf32> to vector<64x16xf32>
    %c480 = arith.constant 480 : index
    %c0_187 = arith.constant 0 : index
    %182 = vector.load %arg3[%c480, %c0_187] : memref<1536x16xf32, #tpu.memory_space<vmem>>, vector<16x16xf32>
    %cst_188 = arith.constant dense<0.000000e+00> : vector<64x16xf32>
    %183 = tpu.matmul %181, %182, %cst_188 {dimension_numbers = #tpu.dot_dimension_numbers<[1], [0], [0], [1], [0, 0, 1, 1], [], []>} : vector<64x16xf32>, vector<16x16xf32>, vector<64x16xf32> -> vector<64x16xf32>
    %184 = arith.addf %179, %183 : vector<64x16xf32>
    %c1_189 = arith.constant 1 : index
    %c1_190 = arith.constant 1 : index
    %c0_191 = arith.constant 0 : index
    %185 = vector.load %arg6[%c1_189, %c1_190, %c0_191] : memref<10x10x16xf32, #tpu.memory_space<vmem>>, vector<8x8x16xf32>
    %186 = vector.shape_cast %185 : vector<8x8x16xf32> to vector<64x16xf32>
    %c496 = arith.constant 496 : index
    %c0_192 = arith.constant 0 : index
    %187 = vector.load %arg3[%c496, %c0_192] : memref<1536x16xf32, #tpu.memory_space<vmem>>, vector<16x16xf32>
    %cst_193 = arith.constant dense<0.000000e+00> : vector<64x16xf32>
    %188 = tpu.matmul %186, %187, %cst_193 {dimension_numbers = #tpu.dot_dimension_numbers<[1], [0], [0], [1], [0, 0, 1, 1], [], []>} : vector<64x16xf32>, vector<16x16xf32>, vector<64x16xf32> -> vector<64x16xf32>
    %189 = arith.addf %184, %188 : vector<64x16xf32>
    %c1_194 = arith.constant 1 : index
    %c2_195 = arith.constant 2 : index
    %c0_196 = arith.constant 0 : index
    %190 = vector.load %arg6[%c1_194, %c2_195, %c0_196] : memref<10x10x16xf32, #tpu.memory_space<vmem>>, vector<8x8x16xf32>
    %191 = vector.shape_cast %190 : vector<8x8x16xf32> to vector<64x16xf32>
    %c512 = arith.constant 512 : index
    %c0_197 = arith.constant 0 : index
    %192 = vector.load %arg3[%c512, %c0_197] : memref<1536x16xf32, #tpu.memory_space<vmem>>, vector<16x16xf32>
    %cst_198 = arith.constant dense<0.000000e+00> : vector<64x16xf32>
    %193 = tpu.matmul %191, %192, %cst_198 {dimension_numbers = #tpu.dot_dimension_numbers<[1], [0], [0], [1], [0, 0, 1, 1], [], []>} : vector<64x16xf32>, vector<16x16xf32>, vector<64x16xf32> -> vector<64x16xf32>
    %194 = arith.addf %189, %193 : vector<64x16xf32>
    %c2_199 = arith.constant 2 : index
    %c0_200 = arith.constant 0 : index
    %c0_201 = arith.constant 0 : index
    %195 = vector.load %arg6[%c2_199, %c0_200, %c0_201] : memref<10x10x16xf32, #tpu.memory_space<vmem>>, vector<8x8x16xf32>
    %196 = vector.shape_cast %195 : vector<8x8x16xf32> to vector<64x16xf32>
    %c528 = arith.constant 528 : index
    %c0_202 = arith.constant 0 : index
    %197 = vector.load %arg3[%c528, %c0_202] : memref<1536x16xf32, #tpu.memory_space<vmem>>, vector<16x16xf32>
    %cst_203 = arith.constant dense<0.000000e+00> : vector<64x16xf32>
    %198 = tpu.matmul %196, %197, %cst_203 {dimension_numbers = #tpu.dot_dimension_numbers<[1], [0], [0], [1], [0, 0, 1, 1], [], []>} : vector<64x16xf32>, vector<16x16xf32>, vector<64x16xf32> -> vector<64x16xf32>
    %199 = arith.addf %194, %198 : vector<64x16xf32>
    %c2_204 = arith.constant 2 : index
    %c1_205 = arith.constant 1 : index
    %c0_206 = arith.constant 0 : index
    %200 = vector.load %arg6[%c2_204, %c1_205, %c0_206] : memref<10x10x16xf32, #tpu.memory_space<vmem>>, vector<8x8x16xf32>
    %201 = vector.shape_cast %200 : vector<8x8x16xf32> to vector<64x16xf32>
    %c544 = arith.constant 544 : index
    %c0_207 = arith.constant 0 : index
    %202 = vector.load %arg3[%c544, %c0_207] : memref<1536x16xf32, #tpu.memory_space<vmem>>, vector<16x16xf32>
    %cst_208 = arith.constant dense<0.000000e+00> : vector<64x16xf32>
    %203 = tpu.matmul %201, %202, %cst_208 {dimension_numbers = #tpu.dot_dimension_numbers<[1], [0], [0], [1], [0, 0, 1, 1], [], []>} : vector<64x16xf32>, vector<16x16xf32>, vector<64x16xf32> -> vector<64x16xf32>
    %204 = arith.addf %199, %203 : vector<64x16xf32>
    %c2_209 = arith.constant 2 : index
    %c2_210 = arith.constant 2 : index
    %c0_211 = arith.constant 0 : index
    %205 = vector.load %arg6[%c2_209, %c2_210, %c0_211] : memref<10x10x16xf32, #tpu.memory_space<vmem>>, vector<8x8x16xf32>
    %206 = vector.shape_cast %205 : vector<8x8x16xf32> to vector<64x16xf32>
    %c560 = arith.constant 560 : index
    %c0_212 = arith.constant 0 : index
    %207 = vector.load %arg3[%c560, %c0_212] : memref<1536x16xf32, #tpu.memory_space<vmem>>, vector<16x16xf32>
    %cst_213 = arith.constant dense<0.000000e+00> : vector<64x16xf32>
    %208 = tpu.matmul %206, %207, %cst_213 {dimension_numbers = #tpu.dot_dimension_numbers<[1], [0], [0], [1], [0, 0, 1, 1], [], []>} : vector<64x16xf32>, vector<16x16xf32>, vector<64x16xf32> -> vector<64x16xf32>
    %209 = arith.addf %204, %208 : vector<64x16xf32>
    %c3 = arith.constant 3 : index
    %c0_214 = arith.constant 0 : index
    %210 = vector.load %arg4[%c3, %c0_214] : memref<16x16xf32, #tpu.memory_space<vmem>>, vector<1x16xf32>
    %211 = vector.broadcast %210 : vector<1x16xf32> to vector<64x16xf32>
    %212 = arith.addf %209, %211 : vector<64x16xf32>
    %213 = arith.addf %9, %212 : vector<64x16xf32>
    %c1_215 = arith.constant 1 : index
    %c0_216 = arith.constant 0 : index
    %214 = vector.load %arg7[%c1_215, %c0_216] : memref<14x16xf32, #tpu.memory_space<vmem>>, vector<12x16xf32>
    tpu.vector_store %arg7[%c1_215, %c0_216], %11 {strides = array<i32>} : memref<14x16xf32, #tpu.memory_space<vmem>>, vector<12x16xf32>,
    %215 = vector.extract_strided_slice %11 {offsets = [11, 0], sizes = [1, 16], strides = [1, 1]} : vector<12x16xf32> to vector<1x16xf32>
    %c0_217 = arith.constant 0 : index
    %c0_218 = arith.constant 0 : index
    %216 = vector.load %arg7[%c0_217, %c0_218] : memref<14x16xf32, #tpu.memory_space<vmem>>, vector<1x16xf32>
    tpu.vector_store %arg7[%c0_217, %c0_218], %215 {strides = array<i32>} : memref<14x16xf32, #tpu.memory_space<vmem>>, vector<1x16xf32>,
    %217 = vector.extract_strided_slice %11 {offsets = [0, 0], sizes = [1, 16], strides = [1, 1]} : vector<12x16xf32> to vector<1x16xf32>
    %c13 = arith.constant 13 : index
    %c0_219 = arith.constant 0 : index
    %218 = vector.load %arg7[%c13, %c0_219] : memref<14x16xf32, #tpu.memory_space<vmem>>, vector<1x16xf32>
    tpu.vector_store %arg7[%c13, %c0_219], %217 {strides = array<i32>} : memref<14x16xf32, #tpu.memory_space<vmem>>, vector<1x16xf32>,
    %c0_220 = arith.constant 0 : index
    %c0_221 = arith.constant 0 : index
    %219 = vector.load %arg7[%c0_220, %c0_221] : memref<14x16xf32, #tpu.memory_space<vmem>>, vector<12x16xf32>
    %c576 = arith.constant 576 : index
    %c0_222 = arith.constant 0 : index
    %220 = vector.load %arg3[%c576, %c0_222] : memref<1536x16xf32, #tpu.memory_space<vmem>>, vector<16x16xf32>
    %cst_223 = arith.constant dense<0.000000e+00> : vector<12x16xf32>
    %221 = tpu.matmul %219, %220, %cst_223 {dimension_numbers = #tpu.dot_dimension_numbers<[1], [0], [0], [1], [0, 0, 1, 1], [], []>} : vector<12x16xf32>, vector<16x16xf32>, vector<12x16xf32> -> vector<12x16xf32>
    %c1_224 = arith.constant 1 : index
    %c0_225 = arith.constant 0 : index
    %222 = vector.load %arg7[%c1_224, %c0_225] : memref<14x16xf32, #tpu.memory_space<vmem>>, vector<12x16xf32>
    %c592 = arith.constant 592 : index
    %c0_226 = arith.constant 0 : index
    %223 = vector.load %arg3[%c592, %c0_226] : memref<1536x16xf32, #tpu.memory_space<vmem>>, vector<16x16xf32>
    %cst_227 = arith.constant dense<0.000000e+00> : vector<12x16xf32>
    %224 = tpu.matmul %222, %223, %cst_227 {dimension_numbers = #tpu.dot_dimension_numbers<[1], [0], [0], [1], [0, 0, 1, 1], [], []>} : vector<12x16xf32>, vector<16x16xf32>, vector<12x16xf32> -> vector<12x16xf32>
    %225 = arith.addf %221, %224 : vector<12x16xf32>
    %c2_228 = arith.constant 2 : index
    %c0_229 = arith.constant 0 : index
    %226 = vector.load %arg7[%c2_228, %c0_229] : memref<14x16xf32, #tpu.memory_space<vmem>>, vector<12x16xf32>
    %c608 = arith.constant 608 : index
    %c0_230 = arith.constant 0 : index
    %227 = vector.load %arg3[%c608, %c0_230] : memref<1536x16xf32, #tpu.memory_space<vmem>>, vector<16x16xf32>
    %cst_231 = arith.constant dense<0.000000e+00> : vector<12x16xf32>
    %228 = tpu.matmul %226, %227, %cst_231 {dimension_numbers = #tpu.dot_dimension_numbers<[1], [0], [0], [1], [0, 0, 1, 1], [], []>} : vector<12x16xf32>, vector<16x16xf32>, vector<12x16xf32> -> vector<12x16xf32>
    %229 = arith.addf %225, %228 : vector<12x16xf32>
    %c4 = arith.constant 4 : index
    %c0_232 = arith.constant 0 : index
    %230 = vector.load %arg4[%c4, %c0_232] : memref<16x16xf32, #tpu.memory_space<vmem>>, vector<1x16xf32>
    %231 = vector.broadcast %230 : vector<1x16xf32> to vector<12x16xf32>
    %232 = arith.addf %229, %231 : vector<12x16xf32>
    %cst_233 = arith.constant 0.000000e+00 : f32
    %233 = vector.broadcast %cst_233 : f32 to vector<12x16xf32>
    %234 = arith.maximumf %232, %233 : vector<12x16xf32>
    %c1_234 = arith.constant 1 : index
    %c0_235 = arith.constant 0 : index
    %235 = vector.load %arg7[%c1_234, %c0_235] : memref<14x16xf32, #tpu.memory_space<vmem>>, vector<12x16xf32>
    tpu.vector_store %arg7[%c1_234, %c0_235], %234 {strides = array<i32>} : memref<14x16xf32, #tpu.memory_space<vmem>>, vector<12x16xf32>,
    %236 = vector.extract_strided_slice %234 {offsets = [11, 0], sizes = [1, 16], strides = [1, 1]} : vector<12x16xf32> to vector<1x16xf32>
    %c0_236 = arith.constant 0 : index
    %c0_237 = arith.constant 0 : index
    %237 = vector.load %arg7[%c0_236, %c0_237] : memref<14x16xf32, #tpu.memory_space<vmem>>, vector<1x16xf32>
    tpu.vector_store %arg7[%c0_236, %c0_237], %236 {strides = array<i32>} : memref<14x16xf32, #tpu.memory_space<vmem>>, vector<1x16xf32>,
    %238 = vector.extract_strided_slice %234 {offsets = [0, 0], sizes = [1, 16], strides = [1, 1]} : vector<12x16xf32> to vector<1x16xf32>
    %c13_238 = arith.constant 13 : index
    %c0_239 = arith.constant 0 : index
    %239 = vector.load %arg7[%c13_238, %c0_239] : memref<14x16xf32, #tpu.memory_space<vmem>>, vector<1x16xf32>
    tpu.vector_store %arg7[%c13_238, %c0_239], %238 {strides = array<i32>} : memref<14x16xf32, #tpu.memory_space<vmem>>, vector<1x16xf32>,
    %c0_240 = arith.constant 0 : index
    %c0_241 = arith.constant 0 : index
    %240 = vector.load %arg7[%c0_240, %c0_241] : memref<14x16xf32, #tpu.memory_space<vmem>>, vector<12x16xf32>
    %c624 = arith.constant 624 : index
    %c0_242 = arith.constant 0 : index
    %241 = vector.load %arg3[%c624, %c0_242] : memref<1536x16xf32, #tpu.memory_space<vmem>>, vector<16x16xf32>
    %cst_243 = arith.constant dense<0.000000e+00> : vector<12x16xf32>
    %242 = tpu.matmul %240, %241, %cst_243 {dimension_numbers = #tpu.dot_dimension_numbers<[1], [0], [0], [1], [0, 0, 1, 1], [], []>} : vector<12x16xf32>, vector<16x16xf32>, vector<12x16xf32> -> vector<12x16xf32>
    %c1_244 = arith.constant 1 : index
    %c0_245 = arith.constant 0 : index
    %243 = vector.load %arg7[%c1_244, %c0_245] : memref<14x16xf32, #tpu.memory_space<vmem>>, vector<12x16xf32>
    %c640 = arith.constant 640 : index
    %c0_246 = arith.constant 0 : index
    %244 = vector.load %arg3[%c640, %c0_246] : memref<1536x16xf32, #tpu.memory_space<vmem>>, vector<16x16xf32>
    %cst_247 = arith.constant dense<0.000000e+00> : vector<12x16xf32>
    %245 = tpu.matmul %243, %244, %cst_247 {dimension_numbers = #tpu.dot_dimension_numbers<[1], [0], [0], [1], [0, 0, 1, 1], [], []>} : vector<12x16xf32>, vector<16x16xf32>, vector<12x16xf32> -> vector<12x16xf32>
    %246 = arith.addf %242, %245 : vector<12x16xf32>
    %c2_248 = arith.constant 2 : index
    %c0_249 = arith.constant 0 : index
    %247 = vector.load %arg7[%c2_248, %c0_249] : memref<14x16xf32, #tpu.memory_space<vmem>>, vector<12x16xf32>
    %c656 = arith.constant 656 : index
    %c0_250 = arith.constant 0 : index
    %248 = vector.load %arg3[%c656, %c0_250] : memref<1536x16xf32, #tpu.memory_space<vmem>>, vector<16x16xf32>
    %cst_251 = arith.constant dense<0.000000e+00> : vector<12x16xf32>
    %249 = tpu.matmul %247, %248, %cst_251 {dimension_numbers = #tpu.dot_dimension_numbers<[1], [0], [0], [1], [0, 0, 1, 1], [], []>} : vector<12x16xf32>, vector<16x16xf32>, vector<12x16xf32> -> vector<12x16xf32>
    %250 = arith.addf %246, %249 : vector<12x16xf32>
    %c5 = arith.constant 5 : index
    %c0_252 = arith.constant 0 : index
    %251 = vector.load %arg4[%c5, %c0_252] : memref<16x16xf32, #tpu.memory_space<vmem>>, vector<1x16xf32>
    %252 = vector.broadcast %251 : vector<1x16xf32> to vector<12x16xf32>
    %253 = arith.addf %250, %252 : vector<12x16xf32>
    %cst_253 = arith.constant 0.000000e+00 : f32
    %254 = vector.broadcast %cst_253 : f32 to vector<12x16xf32>
    %255 = arith.maximumf %253, %254 : vector<12x16xf32>
    %c1_254 = arith.constant 1 : index
    %c0_255 = arith.constant 0 : index
    %256 = vector.load %arg7[%c1_254, %c0_255] : memref<14x16xf32, #tpu.memory_space<vmem>>, vector<12x16xf32>
    tpu.vector_store %arg7[%c1_254, %c0_255], %255 {strides = array<i32>} : memref<14x16xf32, #tpu.memory_space<vmem>>, vector<12x16xf32>,
    %257 = vector.extract_strided_slice %255 {offsets = [11, 0], sizes = [1, 16], strides = [1, 1]} : vector<12x16xf32> to vector<1x16xf32>
    %c0_256 = arith.constant 0 : index
    %c0_257 = arith.constant 0 : index
    %258 = vector.load %arg7[%c0_256, %c0_257] : memref<14x16xf32, #tpu.memory_space<vmem>>, vector<1x16xf32>
    tpu.vector_store %arg7[%c0_256, %c0_257], %257 {strides = array<i32>} : memref<14x16xf32, #tpu.memory_space<vmem>>, vector<1x16xf32>,
    %259 = vector.extract_strided_slice %255 {offsets = [0, 0], sizes = [1, 16], strides = [1, 1]} : vector<12x16xf32> to vector<1x16xf32>
    %c13_258 = arith.constant 13 : index
    %c0_259 = arith.constant 0 : index
    %260 = vector.load %arg7[%c13_258, %c0_259] : memref<14x16xf32, #tpu.memory_space<vmem>>, vector<1x16xf32>
    tpu.vector_store %arg7[%c13_258, %c0_259], %259 {strides = array<i32>} : memref<14x16xf32, #tpu.memory_space<vmem>>, vector<1x16xf32>,
    %c0_260 = arith.constant 0 : index
    %c0_261 = arith.constant 0 : index
    %261 = vector.load %arg7[%c0_260, %c0_261] : memref<14x16xf32, #tpu.memory_space<vmem>>, vector<12x16xf32>
    %c672 = arith.constant 672 : index
    %c0_262 = arith.constant 0 : index
    %262 = vector.load %arg3[%c672, %c0_262] : memref<1536x16xf32, #tpu.memory_space<vmem>>, vector<16x16xf32>
    %cst_263 = arith.constant dense<0.000000e+00> : vector<12x16xf32>
    %263 = tpu.matmul %261, %262, %cst_263 {dimension_numbers = #tpu.dot_dimension_numbers<[1], [0], [0], [1], [0, 0, 1, 1], [], []>} : vector<12x16xf32>, vector<16x16xf32>, vector<12x16xf32> -> vector<12x16xf32>
    %c1_264 = arith.constant 1 : index
    %c0_265 = arith.constant 0 : index
    %264 = vector.load %arg7[%c1_264, %c0_265] : memref<14x16xf32, #tpu.memory_space<vmem>>, vector<12x16xf32>
    %c688 = arith.constant 688 : index
    %c0_266 = arith.constant 0 : index
    %265 = vector.load %arg3[%c688, %c0_266] : memref<1536x16xf32, #tpu.memory_space<vmem>>, vector<16x16xf32>
    %cst_267 = arith.constant dense<0.000000e+00> : vector<12x16xf32>
    %266 = tpu.matmul %264, %265, %cst_267 {dimension_numbers = #tpu.dot_dimension_numbers<[1], [0], [0], [1], [0, 0, 1, 1], [], []>} : vector<12x16xf32>, vector<16x16xf32>, vector<12x16xf32> -> vector<12x16xf32>
    %267 = arith.addf %263, %266 : vector<12x16xf32>
    %c2_268 = arith.constant 2 : index
    %c0_269 = arith.constant 0 : index
    %268 = vector.load %arg7[%c2_268, %c0_269] : memref<14x16xf32, #tpu.memory_space<vmem>>, vector<12x16xf32>
    %c704 = arith.constant 704 : index
    %c0_270 = arith.constant 0 : index
    %269 = vector.load %arg3[%c704, %c0_270] : memref<1536x16xf32, #tpu.memory_space<vmem>>, vector<16x16xf32>
    %cst_271 = arith.constant dense<0.000000e+00> : vector<12x16xf32>
    %270 = tpu.matmul %268, %269, %cst_271 {dimension_numbers = #tpu.dot_dimension_numbers<[1], [0], [0], [1], [0, 0, 1, 1], [], []>} : vector<12x16xf32>, vector<16x16xf32>, vector<12x16xf32> -> vector<12x16xf32>
    %271 = arith.addf %267, %270 : vector<12x16xf32>
    %c6 = arith.constant 6 : index
    %c0_272 = arith.constant 0 : index
    %272 = vector.load %arg4[%c6, %c0_272] : memref<16x16xf32, #tpu.memory_space<vmem>>, vector<1x16xf32>
    %273 = vector.broadcast %272 : vector<1x16xf32> to vector<12x16xf32>
    %274 = arith.addf %271, %273 : vector<12x16xf32>
    %275 = arith.addf %234, %274 : vector<12x16xf32>
    %c1_273 = arith.constant 1 : index
    %c0_274 = arith.constant 0 : index
    %276 = vector.load %arg7[%c1_273, %c0_274] : memref<14x16xf32, #tpu.memory_space<vmem>>, vector<12x16xf32>
    tpu.vector_store %arg7[%c1_273, %c0_274], %275 {strides = array<i32>} : memref<14x16xf32, #tpu.memory_space<vmem>>, vector<12x16xf32>,
    %277 = vector.extract_strided_slice %275 {offsets = [11, 0], sizes = [1, 16], strides = [1, 1]} : vector<12x16xf32> to vector<1x16xf32>
    %c0_275 = arith.constant 0 : index
    %c0_276 = arith.constant 0 : index
    %278 = vector.load %arg7[%c0_275, %c0_276] : memref<14x16xf32, #tpu.memory_space<vmem>>, vector<1x16xf32>
    tpu.vector_store %arg7[%c0_275, %c0_276], %277 {strides = array<i32>} : memref<14x16xf32, #tpu.memory_space<vmem>>, vector<1x16xf32>,
    %279 = vector.extract_strided_slice %275 {offsets = [0, 0], sizes = [1, 16], strides = [1, 1]} : vector<12x16xf32> to vector<1x16xf32>
    %c13_277 = arith.constant 13 : index
    %c0_278 = arith.constant 0 : index
    %280 = vector.load %arg7[%c13_277, %c0_278] : memref<14x16xf32, #tpu.memory_space<vmem>>, vector<1x16xf32>
    tpu.vector_store %arg7[%c13_277, %c0_278], %279 {strides = array<i32>} : memref<14x16xf32, #tpu.memory_space<vmem>>, vector<1x16xf32>,
    %c0_279 = arith.constant 0 : index
    %c0_280 = arith.constant 0 : index
    %281 = vector.load %arg7[%c0_279, %c0_280] : memref<14x16xf32, #tpu.memory_space<vmem>>, vector<12x16xf32>
    %c720 = arith.constant 720 : index
    %c0_281 = arith.constant 0 : index
    %282 = vector.load %arg3[%c720, %c0_281] : memref<1536x16xf32, #tpu.memory_space<vmem>>, vector<16x16xf32>
    %cst_282 = arith.constant dense<0.000000e+00> : vector<12x16xf32>
    %283 = tpu.matmul %281, %282, %cst_282 {dimension_numbers = #tpu.dot_dimension_numbers<[1], [0], [0], [1], [0, 0, 1, 1], [], []>} : vector<12x16xf32>, vector<16x16xf32>, vector<12x16xf32> -> vector<12x16xf32>
    %c1_283 = arith.constant 1 : index
    %c0_284 = arith.constant 0 : index
    %284 = vector.load %arg7[%c1_283, %c0_284] : memref<14x16xf32, #tpu.memory_space<vmem>>, vector<12x16xf32>
    %c736 = arith.constant 736 : index
    %c0_285 = arith.constant 0 : index
    %285 = vector.load %arg3[%c736, %c0_285] : memref<1536x16xf32, #tpu.memory_space<vmem>>, vector<16x16xf32>
    %cst_286 = arith.constant dense<0.000000e+00> : vector<12x16xf32>
    %286 = tpu.matmul %284, %285, %cst_286 {dimension_numbers = #tpu.dot_dimension_numbers<[1], [0], [0], [1], [0, 0, 1, 1], [], []>} : vector<12x16xf32>, vector<16x16xf32>, vector<12x16xf32> -> vector<12x16xf32>
    %287 = arith.addf %283, %286 : vector<12x16xf32>
    %c2_287 = arith.constant 2 : index
    %c0_288 = arith.constant 0 : index
    %288 = vector.load %arg7[%c2_287, %c0_288] : memref<14x16xf32, #tpu.memory_space<vmem>>, vector<12x16xf32>
    %c752 = arith.constant 752 : index
    %c0_289 = arith.constant 0 : index
    %289 = vector.load %arg3[%c752, %c0_289] : memref<1536x16xf32, #tpu.memory_space<vmem>>, vector<16x16xf32>
    %cst_290 = arith.constant dense<0.000000e+00> : vector<12x16xf32>
    %290 = tpu.matmul %288, %289, %cst_290 {dimension_numbers = #tpu.dot_dimension_numbers<[1], [0], [0], [1], [0, 0, 1, 1], [], []>} : vector<12x16xf32>, vector<16x16xf32>, vector<12x16xf32> -> vector<12x16xf32>
    %291 = arith.addf %287, %290 : vector<12x16xf32>
    %c7 = arith.constant 7 : index
    %c0_291 = arith.constant 0 : index
    %292 = vector.load %arg4[%c7, %c0_291] : memref<16x16xf32, #tpu.memory_space<vmem>>, vector<1x16xf32>
    %293 = vector.broadcast %292 : vector<1x16xf32> to vector<12x16xf32>
    %294 = arith.addf %291, %293 : vector<12x16xf32>
    %295 = arith.addf %11, %294 : vector<12x16xf32>
    %296 = vector.shape_cast %213 : vector<64x16xf32> to vector<8x8x16xf32>
    %c1_292 = arith.constant 1 : index
    %c1_293 = arith.constant 1 : index
    %c0_294 = arith.constant 0 : index
    %297 = vector.load %arg6[%c1_292, %c1_293, %c0_294] : memref<10x10x16xf32, #tpu.memory_space<vmem>>, vector<8x8x16xf32>
    tpu.vector_store %arg6[%c1_292, %c1_293, %c0_294], %296 {strides = array<i32>} : memref<10x10x16xf32, #tpu.memory_space<vmem>>, vector<8x8x16xf32>,
    %c0_295 = arith.constant 0 : index
    %c0_296 = arith.constant 0 : index
    %c0_297 = arith.constant 0 : index
    %298 = vector.load %arg6[%c0_295, %c0_296, %c0_297] : memref<10x10x16xf32, #tpu.memory_space<vmem>>, vector<8x8x16xf32>
    %299 = vector.shape_cast %298 : vector<8x8x16xf32> to vector<64x16xf32>
    %c768 = arith.constant 768 : index
    %c0_298 = arith.constant 0 : index
    %300 = vector.load %arg3[%c768, %c0_298] : memref<1536x16xf32, #tpu.memory_space<vmem>>, vector<16x16xf32>
    %cst_299 = arith.constant dense<0.000000e+00> : vector<64x16xf32>
    %301 = tpu.matmul %299, %300, %cst_299 {dimension_numbers = #tpu.dot_dimension_numbers<[1], [0], [0], [1], [0, 0, 1, 1], [], []>} : vector<64x16xf32>, vector<16x16xf32>, vector<64x16xf32> -> vector<64x16xf32>
    %c0_300 = arith.constant 0 : index
    %c1_301 = arith.constant 1 : index
    %c0_302 = arith.constant 0 : index
    %302 = vector.load %arg6[%c0_300, %c1_301, %c0_302] : memref<10x10x16xf32, #tpu.memory_space<vmem>>, vector<8x8x16xf32>
    %303 = vector.shape_cast %302 : vector<8x8x16xf32> to vector<64x16xf32>
    %c784 = arith.constant 784 : index
    %c0_303 = arith.constant 0 : index
    %304 = vector.load %arg3[%c784, %c0_303] : memref<1536x16xf32, #tpu.memory_space<vmem>>, vector<16x16xf32>
    %cst_304 = arith.constant dense<0.000000e+00> : vector<64x16xf32>
    %305 = tpu.matmul %303, %304, %cst_304 {dimension_numbers = #tpu.dot_dimension_numbers<[1], [0], [0], [1], [0, 0, 1, 1], [], []>} : vector<64x16xf32>, vector<16x16xf32>, vector<64x16xf32> -> vector<64x16xf32>
    %306 = arith.addf %301, %305 : vector<64x16xf32>
    %c0_305 = arith.constant 0 : index
    %c2_306 = arith.constant 2 : index
    %c0_307 = arith.constant 0 : index
    %307 = vector.load %arg6[%c0_305, %c2_306, %c0_307] : memref<10x10x16xf32, #tpu.memory_space<vmem>>, vector<8x8x16xf32>
    %308 = vector.shape_cast %307 : vector<8x8x16xf32> to vector<64x16xf32>
    %c800 = arith.constant 800 : index
    %c0_308 = arith.constant 0 : index
    %309 = vector.load %arg3[%c800, %c0_308] : memref<1536x16xf32, #tpu.memory_space<vmem>>, vector<16x16xf32>
    %cst_309 = arith.constant dense<0.000000e+00> : vector<64x16xf32>
    %310 = tpu.matmul %308, %309, %cst_309 {dimension_numbers = #tpu.dot_dimension_numbers<[1], [0], [0], [1], [0, 0, 1, 1], [], []>} : vector<64x16xf32>, vector<16x16xf32>, vector<64x16xf32> -> vector<64x16xf32>
    %311 = arith.addf %306, %310 : vector<64x16xf32>
    %c1_310 = arith.constant 1 : index
    %c0_311 = arith.constant 0 : index
    %c0_312 = arith.constant 0 : index
    %312 = vector.load %arg6[%c1_310, %c0_311, %c0_312] : memref<10x10x16xf32, #tpu.memory_space<vmem>>, vector<8x8x16xf32>
    %313 = vector.shape_cast %312 : vector<8x8x16xf32> to vector<64x16xf32>
    %c816 = arith.constant 816 : index
    %c0_313 = arith.constant 0 : index
    %314 = vector.load %arg3[%c816, %c0_313] : memref<1536x16xf32, #tpu.memory_space<vmem>>, vector<16x16xf32>
    %cst_314 = arith.constant dense<0.000000e+00> : vector<64x16xf32>
    %315 = tpu.matmul %313, %314, %cst_314 {dimension_numbers = #tpu.dot_dimension_numbers<[1], [0], [0], [1], [0, 0, 1, 1], [], []>} : vector<64x16xf32>, vector<16x16xf32>, vector<64x16xf32> -> vector<64x16xf32>
    %316 = arith.addf %311, %315 : vector<64x16xf32>
    %c1_315 = arith.constant 1 : index
    %c1_316 = arith.constant 1 : index
    %c0_317 = arith.constant 0 : index
    %317 = vector.load %arg6[%c1_315, %c1_316, %c0_317] : memref<10x10x16xf32, #tpu.memory_space<vmem>>, vector<8x8x16xf32>
    %318 = vector.shape_cast %317 : vector<8x8x16xf32> to vector<64x16xf32>
    %c832 = arith.constant 832 : index
    %c0_318 = arith.constant 0 : index
    %319 = vector.load %arg3[%c832, %c0_318] : memref<1536x16xf32, #tpu.memory_space<vmem>>, vector<16x16xf32>
    %cst_319 = arith.constant dense<0.000000e+00> : vector<64x16xf32>
    %320 = tpu.matmul %318, %319, %cst_319 {dimension_numbers = #tpu.dot_dimension_numbers<[1], [0], [0], [1], [0, 0, 1, 1], [], []>} : vector<64x16xf32>, vector<16x16xf32>, vector<64x16xf32> -> vector<64x16xf32>
    %321 = arith.addf %316, %320 : vector<64x16xf32>
    %c1_320 = arith.constant 1 : index
    %c2_321 = arith.constant 2 : index
    %c0_322 = arith.constant 0 : index
    %322 = vector.load %arg6[%c1_320, %c2_321, %c0_322] : memref<10x10x16xf32, #tpu.memory_space<vmem>>, vector<8x8x16xf32>
    %323 = vector.shape_cast %322 : vector<8x8x16xf32> to vector<64x16xf32>
    %c848 = arith.constant 848 : index
    %c0_323 = arith.constant 0 : index
    %324 = vector.load %arg3[%c848, %c0_323] : memref<1536x16xf32, #tpu.memory_space<vmem>>, vector<16x16xf32>
    %cst_324 = arith.constant dense<0.000000e+00> : vector<64x16xf32>
    %325 = tpu.matmul %323, %324, %cst_324 {dimension_numbers = #tpu.dot_dimension_numbers<[1], [0], [0], [1], [0, 0, 1, 1], [], []>} : vector<64x16xf32>, vector<16x16xf32>, vector<64x16xf32> -> vector<64x16xf32>
    %326 = arith.addf %321, %325 : vector<64x16xf32>
    %c2_325 = arith.constant 2 : index
    %c0_326 = arith.constant 0 : index
    %c0_327 = arith.constant 0 : index
    %327 = vector.load %arg6[%c2_325, %c0_326, %c0_327] : memref<10x10x16xf32, #tpu.memory_space<vmem>>, vector<8x8x16xf32>
    %328 = vector.shape_cast %327 : vector<8x8x16xf32> to vector<64x16xf32>
    %c864 = arith.constant 864 : index
    %c0_328 = arith.constant 0 : index
    %329 = vector.load %arg3[%c864, %c0_328] : memref<1536x16xf32, #tpu.memory_space<vmem>>, vector<16x16xf32>
    %cst_329 = arith.constant dense<0.000000e+00> : vector<64x16xf32>
    %330 = tpu.matmul %328, %329, %cst_329 {dimension_numbers = #tpu.dot_dimension_numbers<[1], [0], [0], [1], [0, 0, 1, 1], [], []>} : vector<64x16xf32>, vector<16x16xf32>, vector<64x16xf32> -> vector<64x16xf32>
    %331 = arith.addf %326, %330 : vector<64x16xf32>
    %c2_330 = arith.constant 2 : index
    %c1_331 = arith.constant 1 : index
    %c0_332 = arith.constant 0 : index
    %332 = vector.load %arg6[%c2_330, %c1_331, %c0_332] : memref<10x10x16xf32, #tpu.memory_space<vmem>>, vector<8x8x16xf32>
    %333 = vector.shape_cast %332 : vector<8x8x16xf32> to vector<64x16xf32>
    %c880 = arith.constant 880 : index
    %c0_333 = arith.constant 0 : index
    %334 = vector.load %arg3[%c880, %c0_333] : memref<1536x16xf32, #tpu.memory_space<vmem>>, vector<16x16xf32>
    %cst_334 = arith.constant dense<0.000000e+00> : vector<64x16xf32>
    %335 = tpu.matmul %333, %334, %cst_334 {dimension_numbers = #tpu.dot_dimension_numbers<[1], [0], [0], [1], [0, 0, 1, 1], [], []>} : vector<64x16xf32>, vector<16x16xf32>, vector<64x16xf32> -> vector<64x16xf32>
    %336 = arith.addf %331, %335 : vector<64x16xf32>
    %c2_335 = arith.constant 2 : index
    %c2_336 = arith.constant 2 : index
    %c0_337 = arith.constant 0 : index
    %337 = vector.load %arg6[%c2_335, %c2_336, %c0_337] : memref<10x10x16xf32, #tpu.memory_space<vmem>>, vector<8x8x16xf32>
    %338 = vector.shape_cast %337 : vector<8x8x16xf32> to vector<64x16xf32>
    %c896 = arith.constant 896 : index
    %c0_338 = arith.constant 0 : index
    %339 = vector.load %arg3[%c896, %c0_338] : memref<1536x16xf32, #tpu.memory_space<vmem>>, vector<16x16xf32>
    %cst_339 = arith.constant dense<0.000000e+00> : vector<64x16xf32>
    %340 = tpu.matmul %338, %339, %cst_339 {dimension_numbers = #tpu.dot_dimension_numbers<[1], [0], [0], [1], [0, 0, 1, 1], [], []>} : vector<64x16xf32>, vector<16x16xf32>, vector<64x16xf32> -> vector<64x16xf32>
    %341 = arith.addf %336, %340 : vector<64x16xf32>
    %c8 = arith.constant 8 : index
    %c0_340 = arith.constant 0 : index
    %342 = vector.load %arg4[%c8, %c0_340] : memref<16x16xf32, #tpu.memory_space<vmem>>, vector<1x16xf32>
    %343 = vector.broadcast %342 : vector<1x16xf32> to vector<64x16xf32>
    %344 = arith.addf %341, %343 : vector<64x16xf32>
    %cst_341 = arith.constant 0.000000e+00 : f32
    %345 = vector.broadcast %cst_341 : f32 to vector<64x16xf32>
    %346 = arith.maximumf %344, %345 : vector<64x16xf32>
    %347 = vector.shape_cast %346 : vector<64x16xf32> to vector<8x8x16xf32>
    %c1_342 = arith.constant 1 : index
    %c1_343 = arith.constant 1 : index
    %c0_344 = arith.constant 0 : index
    %348 = vector.load %arg6[%c1_342, %c1_343, %c0_344] : memref<10x10x16xf32, #tpu.memory_space<vmem>>, vector<8x8x16xf32>
    tpu.vector_store %arg6[%c1_342, %c1_343, %c0_344], %347 {strides = array<i32>} : memref<10x10x16xf32, #tpu.memory_space<vmem>>, vector<8x8x16xf32>,
    %c0_345 = arith.constant 0 : index
    %c0_346 = arith.constant 0 : index
    %c0_347 = arith.constant 0 : index
    %349 = vector.load %arg6[%c0_345, %c0_346, %c0_347] : memref<10x10x16xf32, #tpu.memory_space<vmem>>, vector<8x8x16xf32>
    %350 = vector.shape_cast %349 : vector<8x8x16xf32> to vector<64x16xf32>
    %c912 = arith.constant 912 : index
    %c0_348 = arith.constant 0 : index
    %351 = vector.load %arg3[%c912, %c0_348] : memref<1536x16xf32, #tpu.memory_space<vmem>>, vector<16x16xf32>
    %cst_349 = arith.constant dense<0.000000e+00> : vector<64x16xf32>
    %352 = tpu.matmul %350, %351, %cst_349 {dimension_numbers = #tpu.dot_dimension_numbers<[1], [0], [0], [1], [0, 0, 1, 1], [], []>} : vector<64x16xf32>, vector<16x16xf32>, vector<64x16xf32> -> vector<64x16xf32>
    %c0_350 = arith.constant 0 : index
    %c1_351 = arith.constant 1 : index
    %c0_352 = arith.constant 0 : index
    %353 = vector.load %arg6[%c0_350, %c1_351, %c0_352] : memref<10x10x16xf32, #tpu.memory_space<vmem>>, vector<8x8x16xf32>
    %354 = vector.shape_cast %353 : vector<8x8x16xf32> to vector<64x16xf32>
    %c928 = arith.constant 928 : index
    %c0_353 = arith.constant 0 : index
    %355 = vector.load %arg3[%c928, %c0_353] : memref<1536x16xf32, #tpu.memory_space<vmem>>, vector<16x16xf32>
    %cst_354 = arith.constant dense<0.000000e+00> : vector<64x16xf32>
    %356 = tpu.matmul %354, %355, %cst_354 {dimension_numbers = #tpu.dot_dimension_numbers<[1], [0], [0], [1], [0, 0, 1, 1], [], []>} : vector<64x16xf32>, vector<16x16xf32>, vector<64x16xf32> -> vector<64x16xf32>
    %357 = arith.addf %352, %356 : vector<64x16xf32>
    %c0_355 = arith.constant 0 : index
    %c2_356 = arith.constant 2 : index
    %c0_357 = arith.constant 0 : index
    %358 = vector.load %arg6[%c0_355, %c2_356, %c0_357] : memref<10x10x16xf32, #tpu.memory_space<vmem>>, vector<8x8x16xf32>
    %359 = vector.shape_cast %358 : vector<8x8x16xf32> to vector<64x16xf32>
    %c944 = arith.constant 944 : index
    %c0_358 = arith.constant 0 : index
    %360 = vector.load %arg3[%c944, %c0_358] : memref<1536x16xf32, #tpu.memory_space<vmem>>, vector<16x16xf32>
    %cst_359 = arith.constant dense<0.000000e+00> : vector<64x16xf32>
    %361 = tpu.matmul %359, %360, %cst_359 {dimension_numbers = #tpu.dot_dimension_numbers<[1], [0], [0], [1], [0, 0, 1, 1], [], []>} : vector<64x16xf32>, vector<16x16xf32>, vector<64x16xf32> -> vector<64x16xf32>
    %362 = arith.addf %357, %361 : vector<64x16xf32>
    %c1_360 = arith.constant 1 : index
    %c0_361 = arith.constant 0 : index
    %c0_362 = arith.constant 0 : index
    %363 = vector.load %arg6[%c1_360, %c0_361, %c0_362] : memref<10x10x16xf32, #tpu.memory_space<vmem>>, vector<8x8x16xf32>
    %364 = vector.shape_cast %363 : vector<8x8x16xf32> to vector<64x16xf32>
    %c960 = arith.constant 960 : index
    %c0_363 = arith.constant 0 : index
    %365 = vector.load %arg3[%c960, %c0_363] : memref<1536x16xf32, #tpu.memory_space<vmem>>, vector<16x16xf32>
    %cst_364 = arith.constant dense<0.000000e+00> : vector<64x16xf32>
    %366 = tpu.matmul %364, %365, %cst_364 {dimension_numbers = #tpu.dot_dimension_numbers<[1], [0], [0], [1], [0, 0, 1, 1], [], []>} : vector<64x16xf32>, vector<16x16xf32>, vector<64x16xf32> -> vector<64x16xf32>
    %367 = arith.addf %362, %366 : vector<64x16xf32>
    %c1_365 = arith.constant 1 : index
    %c1_366 = arith.constant 1 : index
    %c0_367 = arith.constant 0 : index
    %368 = vector.load %arg6[%c1_365, %c1_366, %c0_367] : memref<10x10x16xf32, #tpu.memory_space<vmem>>, vector<8x8x16xf32>
    %369 = vector.shape_cast %368 : vector<8x8x16xf32> to vector<64x16xf32>
    %c976 = arith.constant 976 : index
    %c0_368 = arith.constant 0 : index
    %370 = vector.load %arg3[%c976, %c0_368] : memref<1536x16xf32, #tpu.memory_space<vmem>>, vector<16x16xf32>
    %cst_369 = arith.constant dense<0.000000e+00> : vector<64x16xf32>
    %371 = tpu.matmul %369, %370, %cst_369 {dimension_numbers = #tpu.dot_dimension_numbers<[1], [0], [0], [1], [0, 0, 1, 1], [], []>} : vector<64x16xf32>, vector<16x16xf32>, vector<64x16xf32> -> vector<64x16xf32>
    %372 = arith.addf %367, %371 : vector<64x16xf32>
    %c1_370 = arith.constant 1 : index
    %c2_371 = arith.constant 2 : index
    %c0_372 = arith.constant 0 : index
    %373 = vector.load %arg6[%c1_370, %c2_371, %c0_372] : memref<10x10x16xf32, #tpu.memory_space<vmem>>, vector<8x8x16xf32>
    %374 = vector.shape_cast %373 : vector<8x8x16xf32> to vector<64x16xf32>
    %c992 = arith.constant 992 : index
    %c0_373 = arith.constant 0 : index
    %375 = vector.load %arg3[%c992, %c0_373] : memref<1536x16xf32, #tpu.memory_space<vmem>>, vector<16x16xf32>
    %cst_374 = arith.constant dense<0.000000e+00> : vector<64x16xf32>
    %376 = tpu.matmul %374, %375, %cst_374 {dimension_numbers = #tpu.dot_dimension_numbers<[1], [0], [0], [1], [0, 0, 1, 1], [], []>} : vector<64x16xf32>, vector<16x16xf32>, vector<64x16xf32> -> vector<64x16xf32>
    %377 = arith.addf %372, %376 : vector<64x16xf32>
    %c2_375 = arith.constant 2 : index
    %c0_376 = arith.constant 0 : index
    %c0_377 = arith.constant 0 : index
    %378 = vector.load %arg6[%c2_375, %c0_376, %c0_377] : memref<10x10x16xf32, #tpu.memory_space<vmem>>, vector<8x8x16xf32>
    %379 = vector.shape_cast %378 : vector<8x8x16xf32> to vector<64x16xf32>
    %c1008 = arith.constant 1008 : index
    %c0_378 = arith.constant 0 : index
    %380 = vector.load %arg3[%c1008, %c0_378] : memref<1536x16xf32, #tpu.memory_space<vmem>>, vector<16x16xf32>
    %cst_379 = arith.constant dense<0.000000e+00> : vector<64x16xf32>
    %381 = tpu.matmul %379, %380, %cst_379 {dimension_numbers = #tpu.dot_dimension_numbers<[1], [0], [0], [1], [0, 0, 1, 1], [], []>} : vector<64x16xf32>, vector<16x16xf32>, vector<64x16xf32> -> vector<64x16xf32>
    %382 = arith.addf %377, %381 : vector<64x16xf32>
    %c2_380 = arith.constant 2 : index
    %c1_381 = arith.constant 1 : index
    %c0_382 = arith.constant 0 : index
    %383 = vector.load %arg6[%c2_380, %c1_381, %c0_382] : memref<10x10x16xf32, #tpu.memory_space<vmem>>, vector<8x8x16xf32>
    %384 = vector.shape_cast %383 : vector<8x8x16xf32> to vector<64x16xf32>
    %c1024 = arith.constant 1024 : index
    %c0_383 = arith.constant 0 : index
    %385 = vector.load %arg3[%c1024, %c0_383] : memref<1536x16xf32, #tpu.memory_space<vmem>>, vector<16x16xf32>
    %cst_384 = arith.constant dense<0.000000e+00> : vector<64x16xf32>
    %386 = tpu.matmul %384, %385, %cst_384 {dimension_numbers = #tpu.dot_dimension_numbers<[1], [0], [0], [1], [0, 0, 1, 1], [], []>} : vector<64x16xf32>, vector<16x16xf32>, vector<64x16xf32> -> vector<64x16xf32>
    %387 = arith.addf %382, %386 : vector<64x16xf32>
    %c2_385 = arith.constant 2 : index
    %c2_386 = arith.constant 2 : index
    %c0_387 = arith.constant 0 : index
    %388 = vector.load %arg6[%c2_385, %c2_386, %c0_387] : memref<10x10x16xf32, #tpu.memory_space<vmem>>, vector<8x8x16xf32>
    %389 = vector.shape_cast %388 : vector<8x8x16xf32> to vector<64x16xf32>
    %c1040 = arith.constant 1040 : index
    %c0_388 = arith.constant 0 : index
    %390 = vector.load %arg3[%c1040, %c0_388] : memref<1536x16xf32, #tpu.memory_space<vmem>>, vector<16x16xf32>
    %cst_389 = arith.constant dense<0.000000e+00> : vector<64x16xf32>
    %391 = tpu.matmul %389, %390, %cst_389 {dimension_numbers = #tpu.dot_dimension_numbers<[1], [0], [0], [1], [0, 0, 1, 1], [], []>} : vector<64x16xf32>, vector<16x16xf32>, vector<64x16xf32> -> vector<64x16xf32>
    %392 = arith.addf %387, %391 : vector<64x16xf32>
    %c9 = arith.constant 9 : index
    %c0_390 = arith.constant 0 : index
    %393 = vector.load %arg4[%c9, %c0_390] : memref<16x16xf32, #tpu.memory_space<vmem>>, vector<1x16xf32>
    %394 = vector.broadcast %393 : vector<1x16xf32> to vector<64x16xf32>
    %395 = arith.addf %392, %394 : vector<64x16xf32>
    %cst_391 = arith.constant 0.000000e+00 : f32
    %396 = vector.broadcast %cst_391 : f32 to vector<64x16xf32>
    %397 = arith.maximumf %395, %396 : vector<64x16xf32>
    %398 = vector.shape_cast %397 : vector<64x16xf32> to vector<8x8x16xf32>
    %c1_392 = arith.constant 1 : index
    %c1_393 = arith.constant 1 : index
    %c0_394 = arith.constant 0 : index
    %399 = vector.load %arg6[%c1_392, %c1_393, %c0_394] : memref<10x10x16xf32, #tpu.memory_space<vmem>>, vector<8x8x16xf32>
    tpu.vector_store %arg6[%c1_392, %c1_393, %c0_394], %398 {strides = array<i32>} : memref<10x10x16xf32, #tpu.memory_space<vmem>>, vector<8x8x16xf32>,
    %c0_395 = arith.constant 0 : index
    %c0_396 = arith.constant 0 : index
    %c0_397 = arith.constant 0 : index
    %400 = vector.load %arg6[%c0_395, %c0_396, %c0_397] : memref<10x10x16xf32, #tpu.memory_space<vmem>>, vector<8x8x16xf32>
    %401 = vector.shape_cast %400 : vector<8x8x16xf32> to vector<64x16xf32>
    %c1056 = arith.constant 1056 : index
    %c0_398 = arith.constant 0 : index
    %402 = vector.load %arg3[%c1056, %c0_398] : memref<1536x16xf32, #tpu.memory_space<vmem>>, vector<16x16xf32>
    %cst_399 = arith.constant dense<0.000000e+00> : vector<64x16xf32>
    %403 = tpu.matmul %401, %402, %cst_399 {dimension_numbers = #tpu.dot_dimension_numbers<[1], [0], [0], [1], [0, 0, 1, 1], [], []>} : vector<64x16xf32>, vector<16x16xf32>, vector<64x16xf32> -> vector<64x16xf32>
    %c0_400 = arith.constant 0 : index
    %c1_401 = arith.constant 1 : index
    %c0_402 = arith.constant 0 : index
    %404 = vector.load %arg6[%c0_400, %c1_401, %c0_402] : memref<10x10x16xf32, #tpu.memory_space<vmem>>, vector<8x8x16xf32>
    %405 = vector.shape_cast %404 : vector<8x8x16xf32> to vector<64x16xf32>
    %c1072 = arith.constant 1072 : index
    %c0_403 = arith.constant 0 : index
    %406 = vector.load %arg3[%c1072, %c0_403] : memref<1536x16xf32, #tpu.memory_space<vmem>>, vector<16x16xf32>
    %cst_404 = arith.constant dense<0.000000e+00> : vector<64x16xf32>
    %407 = tpu.matmul %405, %406, %cst_404 {dimension_numbers = #tpu.dot_dimension_numbers<[1], [0], [0], [1], [0, 0, 1, 1], [], []>} : vector<64x16xf32>, vector<16x16xf32>, vector<64x16xf32> -> vector<64x16xf32>
    %408 = arith.addf %403, %407 : vector<64x16xf32>
    %c0_405 = arith.constant 0 : index
    %c2_406 = arith.constant 2 : index
    %c0_407 = arith.constant 0 : index
    %409 = vector.load %arg6[%c0_405, %c2_406, %c0_407] : memref<10x10x16xf32, #tpu.memory_space<vmem>>, vector<8x8x16xf32>
    %410 = vector.shape_cast %409 : vector<8x8x16xf32> to vector<64x16xf32>
    %c1088 = arith.constant 1088 : index
    %c0_408 = arith.constant 0 : index
    %411 = vector.load %arg3[%c1088, %c0_408] : memref<1536x16xf32, #tpu.memory_space<vmem>>, vector<16x16xf32>
    %cst_409 = arith.constant dense<0.000000e+00> : vector<64x16xf32>
    %412 = tpu.matmul %410, %411, %cst_409 {dimension_numbers = #tpu.dot_dimension_numbers<[1], [0], [0], [1], [0, 0, 1, 1], [], []>} : vector<64x16xf32>, vector<16x16xf32>, vector<64x16xf32> -> vector<64x16xf32>
    %413 = arith.addf %408, %412 : vector<64x16xf32>
    %c1_410 = arith.constant 1 : index
    %c0_411 = arith.constant 0 : index
    %c0_412 = arith.constant 0 : index
    %414 = vector.load %arg6[%c1_410, %c0_411, %c0_412] : memref<10x10x16xf32, #tpu.memory_space<vmem>>, vector<8x8x16xf32>
    %415 = vector.shape_cast %414 : vector<8x8x16xf32> to vector<64x16xf32>
    %c1104 = arith.constant 1104 : index
    %c0_413 = arith.constant 0 : index
    %416 = vector.load %arg3[%c1104, %c0_413] : memref<1536x16xf32, #tpu.memory_space<vmem>>, vector<16x16xf32>
    %cst_414 = arith.constant dense<0.000000e+00> : vector<64x16xf32>
    %417 = tpu.matmul %415, %416, %cst_414 {dimension_numbers = #tpu.dot_dimension_numbers<[1], [0], [0], [1], [0, 0, 1, 1], [], []>} : vector<64x16xf32>, vector<16x16xf32>, vector<64x16xf32> -> vector<64x16xf32>
    %418 = arith.addf %413, %417 : vector<64x16xf32>
    %c1_415 = arith.constant 1 : index
    %c1_416 = arith.constant 1 : index
    %c0_417 = arith.constant 0 : index
    %419 = vector.load %arg6[%c1_415, %c1_416, %c0_417] : memref<10x10x16xf32, #tpu.memory_space<vmem>>, vector<8x8x16xf32>
    %420 = vector.shape_cast %419 : vector<8x8x16xf32> to vector<64x16xf32>
    %c1120 = arith.constant 1120 : index
    %c0_418 = arith.constant 0 : index
    %421 = vector.load %arg3[%c1120, %c0_418] : memref<1536x16xf32, #tpu.memory_space<vmem>>, vector<16x16xf32>
    %cst_419 = arith.constant dense<0.000000e+00> : vector<64x16xf32>
    %422 = tpu.matmul %420, %421, %cst_419 {dimension_numbers = #tpu.dot_dimension_numbers<[1], [0], [0], [1], [0, 0, 1, 1], [], []>} : vector<64x16xf32>, vector<16x16xf32>, vector<64x16xf32> -> vector<64x16xf32>
    %423 = arith.addf %418, %422 : vector<64x16xf32>
    %c1_420 = arith.constant 1 : index
    %c2_421 = arith.constant 2 : index
    %c0_422 = arith.constant 0 : index
    %424 = vector.load %arg6[%c1_420, %c2_421, %c0_422] : memref<10x10x16xf32, #tpu.memory_space<vmem>>, vector<8x8x16xf32>
    %425 = vector.shape_cast %424 : vector<8x8x16xf32> to vector<64x16xf32>
    %c1136 = arith.constant 1136 : index
    %c0_423 = arith.constant 0 : index
    %426 = vector.load %arg3[%c1136, %c0_423] : memref<1536x16xf32, #tpu.memory_space<vmem>>, vector<16x16xf32>
    %cst_424 = arith.constant dense<0.000000e+00> : vector<64x16xf32>
    %427 = tpu.matmul %425, %426, %cst_424 {dimension_numbers = #tpu.dot_dimension_numbers<[1], [0], [0], [1], [0, 0, 1, 1], [], []>} : vector<64x16xf32>, vector<16x16xf32>, vector<64x16xf32> -> vector<64x16xf32>
    %428 = arith.addf %423, %427 : vector<64x16xf32>
    %c2_425 = arith.constant 2 : index
    %c0_426 = arith.constant 0 : index
    %c0_427 = arith.constant 0 : index
    %429 = vector.load %arg6[%c2_425, %c0_426, %c0_427] : memref<10x10x16xf32, #tpu.memory_space<vmem>>, vector<8x8x16xf32>
    %430 = vector.shape_cast %429 : vector<8x8x16xf32> to vector<64x16xf32>
    %c1152 = arith.constant 1152 : index
    %c0_428 = arith.constant 0 : index
    %431 = vector.load %arg3[%c1152, %c0_428] : memref<1536x16xf32, #tpu.memory_space<vmem>>, vector<16x16xf32>
    %cst_429 = arith.constant dense<0.000000e+00> : vector<64x16xf32>
    %432 = tpu.matmul %430, %431, %cst_429 {dimension_numbers = #tpu.dot_dimension_numbers<[1], [0], [0], [1], [0, 0, 1, 1], [], []>} : vector<64x16xf32>, vector<16x16xf32>, vector<64x16xf32> -> vector<64x16xf32>
    %433 = arith.addf %428, %432 : vector<64x16xf32>
    %c2_430 = arith.constant 2 : index
    %c1_431 = arith.constant 1 : index
    %c0_432 = arith.constant 0 : index
    %434 = vector.load %arg6[%c2_430, %c1_431, %c0_432] : memref<10x10x16xf32, #tpu.memory_space<vmem>>, vector<8x8x16xf32>
    %435 = vector.shape_cast %434 : vector<8x8x16xf32> to vector<64x16xf32>
    %c1168 = arith.constant 1168 : index
    %c0_433 = arith.constant 0 : index
    %436 = vector.load %arg3[%c1168, %c0_433] : memref<1536x16xf32, #tpu.memory_space<vmem>>, vector<16x16xf32>
    %cst_434 = arith.constant dense<0.000000e+00> : vector<64x16xf32>
    %437 = tpu.matmul %435, %436, %cst_434 {dimension_numbers = #tpu.dot_dimension_numbers<[1], [0], [0], [1], [0, 0, 1, 1], [], []>} : vector<64x16xf32>, vector<16x16xf32>, vector<64x16xf32> -> vector<64x16xf32>
    %438 = arith.addf %433, %437 : vector<64x16xf32>
    %c2_435 = arith.constant 2 : index
    %c2_436 = arith.constant 2 : index
    %c0_437 = arith.constant 0 : index
    %439 = vector.load %arg6[%c2_435, %c2_436, %c0_437] : memref<10x10x16xf32, #tpu.memory_space<vmem>>, vector<8x8x16xf32>
    %440 = vector.shape_cast %439 : vector<8x8x16xf32> to vector<64x16xf32>
    %c1184 = arith.constant 1184 : index
    %c0_438 = arith.constant 0 : index
    %441 = vector.load %arg3[%c1184, %c0_438] : memref<1536x16xf32, #tpu.memory_space<vmem>>, vector<16x16xf32>
    %cst_439 = arith.constant dense<0.000000e+00> : vector<64x16xf32>
    %442 = tpu.matmul %440, %441, %cst_439 {dimension_numbers = #tpu.dot_dimension_numbers<[1], [0], [0], [1], [0, 0, 1, 1], [], []>} : vector<64x16xf32>, vector<16x16xf32>, vector<64x16xf32> -> vector<64x16xf32>
    %443 = arith.addf %438, %442 : vector<64x16xf32>
    %c10 = arith.constant 10 : index
    %c0_440 = arith.constant 0 : index
    %444 = vector.load %arg4[%c10, %c0_440] : memref<16x16xf32, #tpu.memory_space<vmem>>, vector<1x16xf32>
    %445 = vector.broadcast %444 : vector<1x16xf32> to vector<64x16xf32>
    %446 = arith.addf %443, %445 : vector<64x16xf32>
    %447 = arith.addf %346, %446 : vector<64x16xf32>
    %448 = vector.shape_cast %447 : vector<64x16xf32> to vector<8x8x16xf32>
    %c1_441 = arith.constant 1 : index
    %c1_442 = arith.constant 1 : index
    %c0_443 = arith.constant 0 : index
    %449 = vector.load %arg6[%c1_441, %c1_442, %c0_443] : memref<10x10x16xf32, #tpu.memory_space<vmem>>, vector<8x8x16xf32>
    tpu.vector_store %arg6[%c1_441, %c1_442, %c0_443], %448 {strides = array<i32>} : memref<10x10x16xf32, #tpu.memory_space<vmem>>, vector<8x8x16xf32>,
    %c0_444 = arith.constant 0 : index
    %c0_445 = arith.constant 0 : index
    %c0_446 = arith.constant 0 : index
    %450 = vector.load %arg6[%c0_444, %c0_445, %c0_446] : memref<10x10x16xf32, #tpu.memory_space<vmem>>, vector<8x8x16xf32>
    %451 = vector.shape_cast %450 : vector<8x8x16xf32> to vector<64x16xf32>
    %c1200 = arith.constant 1200 : index
    %c0_447 = arith.constant 0 : index
    %452 = vector.load %arg3[%c1200, %c0_447] : memref<1536x16xf32, #tpu.memory_space<vmem>>, vector<16x16xf32>
    %cst_448 = arith.constant dense<0.000000e+00> : vector<64x16xf32>
    %453 = tpu.matmul %451, %452, %cst_448 {dimension_numbers = #tpu.dot_dimension_numbers<[1], [0], [0], [1], [0, 0, 1, 1], [], []>} : vector<64x16xf32>, vector<16x16xf32>, vector<64x16xf32> -> vector<64x16xf32>
    %c0_449 = arith.constant 0 : index
    %c1_450 = arith.constant 1 : index
    %c0_451 = arith.constant 0 : index
    %454 = vector.load %arg6[%c0_449, %c1_450, %c0_451] : memref<10x10x16xf32, #tpu.memory_space<vmem>>, vector<8x8x16xf32>
    %455 = vector.shape_cast %454 : vector<8x8x16xf32> to vector<64x16xf32>
    %c1216 = arith.constant 1216 : index
    %c0_452 = arith.constant 0 : index
    %456 = vector.load %arg3[%c1216, %c0_452] : memref<1536x16xf32, #tpu.memory_space<vmem>>, vector<16x16xf32>
    %cst_453 = arith.constant dense<0.000000e+00> : vector<64x16xf32>
    %457 = tpu.matmul %455, %456, %cst_453 {dimension_numbers = #tpu.dot_dimension_numbers<[1], [0], [0], [1], [0, 0, 1, 1], [], []>} : vector<64x16xf32>, vector<16x16xf32>, vector<64x16xf32> -> vector<64x16xf32>
    %458 = arith.addf %453, %457 : vector<64x16xf32>
    %c0_454 = arith.constant 0 : index
    %c2_455 = arith.constant 2 : index
    %c0_456 = arith.constant 0 : index
    %459 = vector.load %arg6[%c0_454, %c2_455, %c0_456] : memref<10x10x16xf32, #tpu.memory_space<vmem>>, vector<8x8x16xf32>
    %460 = vector.shape_cast %459 : vector<8x8x16xf32> to vector<64x16xf32>
    %c1232 = arith.constant 1232 : index
    %c0_457 = arith.constant 0 : index
    %461 = vector.load %arg3[%c1232, %c0_457] : memref<1536x16xf32, #tpu.memory_space<vmem>>, vector<16x16xf32>
    %cst_458 = arith.constant dense<0.000000e+00> : vector<64x16xf32>
    %462 = tpu.matmul %460, %461, %cst_458 {dimension_numbers = #tpu.dot_dimension_numbers<[1], [0], [0], [1], [0, 0, 1, 1], [], []>} : vector<64x16xf32>, vector<16x16xf32>, vector<64x16xf32> -> vector<64x16xf32>
    %463 = arith.addf %458, %462 : vector<64x16xf32>
    %c1_459 = arith.constant 1 : index
    %c0_460 = arith.constant 0 : index
    %c0_461 = arith.constant 0 : index
    %464 = vector.load %arg6[%c1_459, %c0_460, %c0_461] : memref<10x10x16xf32, #tpu.memory_space<vmem>>, vector<8x8x16xf32>
    %465 = vector.shape_cast %464 : vector<8x8x16xf32> to vector<64x16xf32>
    %c1248 = arith.constant 1248 : index
    %c0_462 = arith.constant 0 : index
    %466 = vector.load %arg3[%c1248, %c0_462] : memref<1536x16xf32, #tpu.memory_space<vmem>>, vector<16x16xf32>
    %cst_463 = arith.constant dense<0.000000e+00> : vector<64x16xf32>
    %467 = tpu.matmul %465, %466, %cst_463 {dimension_numbers = #tpu.dot_dimension_numbers<[1], [0], [0], [1], [0, 0, 1, 1], [], []>} : vector<64x16xf32>, vector<16x16xf32>, vector<64x16xf32> -> vector<64x16xf32>
    %468 = arith.addf %463, %467 : vector<64x16xf32>
    %c1_464 = arith.constant 1 : index
    %c1_465 = arith.constant 1 : index
    %c0_466 = arith.constant 0 : index
    %469 = vector.load %arg6[%c1_464, %c1_465, %c0_466] : memref<10x10x16xf32, #tpu.memory_space<vmem>>, vector<8x8x16xf32>
    %470 = vector.shape_cast %469 : vector<8x8x16xf32> to vector<64x16xf32>
    %c1264 = arith.constant 1264 : index
    %c0_467 = arith.constant 0 : index
    %471 = vector.load %arg3[%c1264, %c0_467] : memref<1536x16xf32, #tpu.memory_space<vmem>>, vector<16x16xf32>
    %cst_468 = arith.constant dense<0.000000e+00> : vector<64x16xf32>
    %472 = tpu.matmul %470, %471, %cst_468 {dimension_numbers = #tpu.dot_dimension_numbers<[1], [0], [0], [1], [0, 0, 1, 1], [], []>} : vector<64x16xf32>, vector<16x16xf32>, vector<64x16xf32> -> vector<64x16xf32>
    %473 = arith.addf %468, %472 : vector<64x16xf32>
    %c1_469 = arith.constant 1 : index
    %c2_470 = arith.constant 2 : index
    %c0_471 = arith.constant 0 : index
    %474 = vector.load %arg6[%c1_469, %c2_470, %c0_471] : memref<10x10x16xf32, #tpu.memory_space<vmem>>, vector<8x8x16xf32>
    %475 = vector.shape_cast %474 : vector<8x8x16xf32> to vector<64x16xf32>
    %c1280 = arith.constant 1280 : index
    %c0_472 = arith.constant 0 : index
    %476 = vector.load %arg3[%c1280, %c0_472] : memref<1536x16xf32, #tpu.memory_space<vmem>>, vector<16x16xf32>
    %cst_473 = arith.constant dense<0.000000e+00> : vector<64x16xf32>
    %477 = tpu.matmul %475, %476, %cst_473 {dimension_numbers = #tpu.dot_dimension_numbers<[1], [0], [0], [1], [0, 0, 1, 1], [], []>} : vector<64x16xf32>, vector<16x16xf32>, vector<64x16xf32> -> vector<64x16xf32>
    %478 = arith.addf %473, %477 : vector<64x16xf32>
    %c2_474 = arith.constant 2 : index
    %c0_475 = arith.constant 0 : index
    %c0_476 = arith.constant 0 : index
    %479 = vector.load %arg6[%c2_474, %c0_475, %c0_476] : memref<10x10x16xf32, #tpu.memory_space<vmem>>, vector<8x8x16xf32>
    %480 = vector.shape_cast %479 : vector<8x8x16xf32> to vector<64x16xf32>
    %c1296 = arith.constant 1296 : index
    %c0_477 = arith.constant 0 : index
    %481 = vector.load %arg3[%c1296, %c0_477] : memref<1536x16xf32, #tpu.memory_space<vmem>>, vector<16x16xf32>
    %cst_478 = arith.constant dense<0.000000e+00> : vector<64x16xf32>
    %482 = tpu.matmul %480, %481, %cst_478 {dimension_numbers = #tpu.dot_dimension_numbers<[1], [0], [0], [1], [0, 0, 1, 1], [], []>} : vector<64x16xf32>, vector<16x16xf32>, vector<64x16xf32> -> vector<64x16xf32>
    %483 = arith.addf %478, %482 : vector<64x16xf32>
    %c2_479 = arith.constant 2 : index
    %c1_480 = arith.constant 1 : index
    %c0_481 = arith.constant 0 : index
    %484 = vector.load %arg6[%c2_479, %c1_480, %c0_481] : memref<10x10x16xf32, #tpu.memory_space<vmem>>, vector<8x8x16xf32>
    %485 = vector.shape_cast %484 : vector<8x8x16xf32> to vector<64x16xf32>
    %c1312 = arith.constant 1312 : index
    %c0_482 = arith.constant 0 : index
    %486 = vector.load %arg3[%c1312, %c0_482] : memref<1536x16xf32, #tpu.memory_space<vmem>>, vector<16x16xf32>
    %cst_483 = arith.constant dense<0.000000e+00> : vector<64x16xf32>
    %487 = tpu.matmul %485, %486, %cst_483 {dimension_numbers = #tpu.dot_dimension_numbers<[1], [0], [0], [1], [0, 0, 1, 1], [], []>} : vector<64x16xf32>, vector<16x16xf32>, vector<64x16xf32> -> vector<64x16xf32>
    %488 = arith.addf %483, %487 : vector<64x16xf32>
    %c2_484 = arith.constant 2 : index
    %c2_485 = arith.constant 2 : index
    %c0_486 = arith.constant 0 : index
    %489 = vector.load %arg6[%c2_484, %c2_485, %c0_486] : memref<10x10x16xf32, #tpu.memory_space<vmem>>, vector<8x8x16xf32>
    %490 = vector.shape_cast %489 : vector<8x8x16xf32> to vector<64x16xf32>
    %c1328 = arith.constant 1328 : index
    %c0_487 = arith.constant 0 : index
    %491 = vector.load %arg3[%c1328, %c0_487] : memref<1536x16xf32, #tpu.memory_space<vmem>>, vector<16x16xf32>
    %cst_488 = arith.constant dense<0.000000e+00> : vector<64x16xf32>
    %492 = tpu.matmul %490, %491, %cst_488 {dimension_numbers = #tpu.dot_dimension_numbers<[1], [0], [0], [1], [0, 0, 1, 1], [], []>} : vector<64x16xf32>, vector<16x16xf32>, vector<64x16xf32> -> vector<64x16xf32>
    %493 = arith.addf %488, %492 : vector<64x16xf32>
    %c11 = arith.constant 11 : index
    %c0_489 = arith.constant 0 : index
    %494 = vector.load %arg4[%c11, %c0_489] : memref<16x16xf32, #tpu.memory_space<vmem>>, vector<1x16xf32>
    %495 = vector.broadcast %494 : vector<1x16xf32> to vector<64x16xf32>
    %496 = arith.addf %493, %495 : vector<64x16xf32>
    %497 = arith.addf %213, %496 : vector<64x16xf32>
    %c1_490 = arith.constant 1 : index
    %c0_491 = arith.constant 0 : index
    %498 = vector.load %arg7[%c1_490, %c0_491] : memref<14x16xf32, #tpu.memory_space<vmem>>, vector<12x16xf32>
    tpu.vector_store %arg7[%c1_490, %c0_491], %295 {strides = array<i32>} : memref<14x16xf32, #tpu.memory_space<vmem>>, vector<12x16xf32>,
    %499 = vector.extract_strided_slice %295 {offsets = [11, 0], sizes = [1, 16], strides = [1, 1]} : vector<12x16xf32> to vector<1x16xf32>
    %c0_492 = arith.constant 0 : index
    %c0_493 = arith.constant 0 : index
    %500 = vector.load %arg7[%c0_492, %c0_493] : memref<14x16xf32, #tpu.memory_space<vmem>>, vector<1x16xf32>
    tpu.vector_store %arg7[%c0_492, %c0_493], %499 {strides = array<i32>} : memref<14x16xf32, #tpu.memory_space<vmem>>, vector<1x16xf32>,
    %501 = vector.extract_strided_slice %295 {offsets = [0, 0], sizes = [1, 16], strides = [1, 1]} : vector<12x16xf32> to vector<1x16xf32>
    %c13_494 = arith.constant 13 : index
    %c0_495 = arith.constant 0 : index
    %502 = vector.load %arg7[%c13_494, %c0_495] : memref<14x16xf32, #tpu.memory_space<vmem>>, vector<1x16xf32>
    tpu.vector_store %arg7[%c13_494, %c0_495], %501 {strides = array<i32>} : memref<14x16xf32, #tpu.memory_space<vmem>>, vector<1x16xf32>,
    %c0_496 = arith.constant 0 : index
    %c0_497 = arith.constant 0 : index
    %503 = vector.load %arg7[%c0_496, %c0_497] : memref<14x16xf32, #tpu.memory_space<vmem>>, vector<12x16xf32>
    %c1344 = arith.constant 1344 : index
    %c0_498 = arith.constant 0 : index
    %504 = vector.load %arg3[%c1344, %c0_498] : memref<1536x16xf32, #tpu.memory_space<vmem>>, vector<16x16xf32>
    %cst_499 = arith.constant dense<0.000000e+00> : vector<12x16xf32>
    %505 = tpu.matmul %503, %504, %cst_499 {dimension_numbers = #tpu.dot_dimension_numbers<[1], [0], [0], [1], [0, 0, 1, 1], [], []>} : vector<12x16xf32>, vector<16x16xf32>, vector<12x16xf32> -> vector<12x16xf32>
    %c1_500 = arith.constant 1 : index
    %c0_501 = arith.constant 0 : index
    %506 = vector.load %arg7[%c1_500, %c0_501] : memref<14x16xf32, #tpu.memory_space<vmem>>, vector<12x16xf32>
    %c1360 = arith.constant 1360 : index
    %c0_502 = arith.constant 0 : index
    %507 = vector.load %arg3[%c1360, %c0_502] : memref<1536x16xf32, #tpu.memory_space<vmem>>, vector<16x16xf32>
    %cst_503 = arith.constant dense<0.000000e+00> : vector<12x16xf32>
    %508 = tpu.matmul %506, %507, %cst_503 {dimension_numbers = #tpu.dot_dimension_numbers<[1], [0], [0], [1], [0, 0, 1, 1], [], []>} : vector<12x16xf32>, vector<16x16xf32>, vector<12x16xf32> -> vector<12x16xf32>
    %509 = arith.addf %505, %508 : vector<12x16xf32>
    %c2_504 = arith.constant 2 : index
    %c0_505 = arith.constant 0 : index
    %510 = vector.load %arg7[%c2_504, %c0_505] : memref<14x16xf32, #tpu.memory_space<vmem>>, vector<12x16xf32>
    %c1376 = arith.constant 1376 : index
    %c0_506 = arith.constant 0 : index
    %511 = vector.load %arg3[%c1376, %c0_506] : memref<1536x16xf32, #tpu.memory_space<vmem>>, vector<16x16xf32>
    %cst_507 = arith.constant dense<0.000000e+00> : vector<12x16xf32>
    %512 = tpu.matmul %510, %511, %cst_507 {dimension_numbers = #tpu.dot_dimension_numbers<[1], [0], [0], [1], [0, 0, 1, 1], [], []>} : vector<12x16xf32>, vector<16x16xf32>, vector<12x16xf32> -> vector<12x16xf32>
    %513 = arith.addf %509, %512 : vector<12x16xf32>
    %c12 = arith.constant 12 : index
    %c0_508 = arith.constant 0 : index
    %514 = vector.load %arg4[%c12, %c0_508] : memref<16x16xf32, #tpu.memory_space<vmem>>, vector<1x16xf32>
    %515 = vector.broadcast %514 : vector<1x16xf32> to vector<12x16xf32>
    %516 = arith.addf %513, %515 : vector<12x16xf32>
    %cst_509 = arith.constant 0.000000e+00 : f32
    %517 = vector.broadcast %cst_509 : f32 to vector<12x16xf32>
    %518 = arith.maximumf %516, %517 : vector<12x16xf32>
    %c1_510 = arith.constant 1 : index
    %c0_511 = arith.constant 0 : index
    %519 = vector.load %arg7[%c1_510, %c0_511] : memref<14x16xf32, #tpu.memory_space<vmem>>, vector<12x16xf32>
    tpu.vector_store %arg7[%c1_510, %c0_511], %518 {strides = array<i32>} : memref<14x16xf32, #tpu.memory_space<vmem>>, vector<12x16xf32>,
    %520 = vector.extract_strided_slice %518 {offsets = [11, 0], sizes = [1, 16], strides = [1, 1]} : vector<12x16xf32> to vector<1x16xf32>
    %c0_512 = arith.constant 0 : index
    %c0_513 = arith.constant 0 : index
    %521 = vector.load %arg7[%c0_512, %c0_513] : memref<14x16xf32, #tpu.memory_space<vmem>>, vector<1x16xf32>
    tpu.vector_store %arg7[%c0_512, %c0_513], %520 {strides = array<i32>} : memref<14x16xf32, #tpu.memory_space<vmem>>, vector<1x16xf32>,
    %522 = vector.extract_strided_slice %518 {offsets = [0, 0], sizes = [1, 16], strides = [1, 1]} : vector<12x16xf32> to vector<1x16xf32>
    %c13_514 = arith.constant 13 : index
    %c0_515 = arith.constant 0 : index
    %523 = vector.load %arg7[%c13_514, %c0_515] : memref<14x16xf32, #tpu.memory_space<vmem>>, vector<1x16xf32>
    tpu.vector_store %arg7[%c13_514, %c0_515], %522 {strides = array<i32>} : memref<14x16xf32, #tpu.memory_space<vmem>>, vector<1x16xf32>,
    %c0_516 = arith.constant 0 : index
    %c0_517 = arith.constant 0 : index
    %524 = vector.load %arg7[%c0_516, %c0_517] : memref<14x16xf32, #tpu.memory_space<vmem>>, vector<12x16xf32>
    %c1392 = arith.constant 1392 : index
    %c0_518 = arith.constant 0 : index
    %525 = vector.load %arg3[%c1392, %c0_518] : memref<1536x16xf32, #tpu.memory_space<vmem>>, vector<16x16xf32>
    %cst_519 = arith.constant dense<0.000000e+00> : vector<12x16xf32>
    %526 = tpu.matmul %524, %525, %cst_519 {dimension_numbers = #tpu.dot_dimension_numbers<[1], [0], [0], [1], [0, 0, 1, 1], [], []>} : vector<12x16xf32>, vector<16x16xf32>, vector<12x16xf32> -> vector<12x16xf32>
    %c1_520 = arith.constant 1 : index
    %c0_521 = arith.constant 0 : index
    %527 = vector.load %arg7[%c1_520, %c0_521] : memref<14x16xf32, #tpu.memory_space<vmem>>, vector<12x16xf32>
    %c1408 = arith.constant 1408 : index
    %c0_522 = arith.constant 0 : index
    %528 = vector.load %arg3[%c1408, %c0_522] : memref<1536x16xf32, #tpu.memory_space<vmem>>, vector<16x16xf32>
    %cst_523 = arith.constant dense<0.000000e+00> : vector<12x16xf32>
    %529 = tpu.matmul %527, %528, %cst_523 {dimension_numbers = #tpu.dot_dimension_numbers<[1], [0], [0], [1], [0, 0, 1, 1], [], []>} : vector<12x16xf32>, vector<16x16xf32>, vector<12x16xf32> -> vector<12x16xf32>
    %530 = arith.addf %526, %529 : vector<12x16xf32>
    %c2_524 = arith.constant 2 : index
    %c0_525 = arith.constant 0 : index
    %531 = vector.load %arg7[%c2_524, %c0_525] : memref<14x16xf32, #tpu.memory_space<vmem>>, vector<12x16xf32>
    %c1424 = arith.constant 1424 : index
    %c0_526 = arith.constant 0 : index
    %532 = vector.load %arg3[%c1424, %c0_526] : memref<1536x16xf32, #tpu.memory_space<vmem>>, vector<16x16xf32>
    %cst_527 = arith.constant dense<0.000000e+00> : vector<12x16xf32>
    %533 = tpu.matmul %531, %532, %cst_527 {dimension_numbers = #tpu.dot_dimension_numbers<[1], [0], [0], [1], [0, 0, 1, 1], [], []>} : vector<12x16xf32>, vector<16x16xf32>, vector<12x16xf32> -> vector<12x16xf32>
    %534 = arith.addf %530, %533 : vector<12x16xf32>
    %c13_528 = arith.constant 13 : index
    %c0_529 = arith.constant 0 : index
    %535 = vector.load %arg4[%c13_528, %c0_529] : memref<16x16xf32, #tpu.memory_space<vmem>>, vector<1x16xf32>
    %536 = vector.broadcast %535 : vector<1x16xf32> to vector<12x16xf32>
    %537 = arith.addf %534, %536 : vector<12x16xf32>
    %cst_530 = arith.constant 0.000000e+00 : f32
    %538 = vector.broadcast %cst_530 : f32 to vector<12x16xf32>
    %539 = arith.maximumf %537, %538 : vector<12x16xf32>
    %c1_531 = arith.constant 1 : index
    %c0_532 = arith.constant 0 : index
    %540 = vector.load %arg7[%c1_531, %c0_532] : memref<14x16xf32, #tpu.memory_space<vmem>>, vector<12x16xf32>
    tpu.vector_store %arg7[%c1_531, %c0_532], %539 {strides = array<i32>} : memref<14x16xf32, #tpu.memory_space<vmem>>, vector<12x16xf32>,
    %541 = vector.extract_strided_slice %539 {offsets = [11, 0], sizes = [1, 16], strides = [1, 1]} : vector<12x16xf32> to vector<1x16xf32>
    %c0_533 = arith.constant 0 : index
    %c0_534 = arith.constant 0 : index
    %542 = vector.load %arg7[%c0_533, %c0_534] : memref<14x16xf32, #tpu.memory_space<vmem>>, vector<1x16xf32>
    tpu.vector_store %arg7[%c0_533, %c0_534], %541 {strides = array<i32>} : memref<14x16xf32, #tpu.memory_space<vmem>>, vector<1x16xf32>,
    %543 = vector.extract_strided_slice %539 {offsets = [0, 0], sizes = [1, 16], strides = [1, 1]} : vector<12x16xf32> to vector<1x16xf32>
    %c13_535 = arith.constant 13 : index
    %c0_536 = arith.constant 0 : index
    %544 = vector.load %arg7[%c13_535, %c0_536] : memref<14x16xf32, #tpu.memory_space<vmem>>, vector<1x16xf32>
    tpu.vector_store %arg7[%c13_535, %c0_536], %543 {strides = array<i32>} : memref<14x16xf32, #tpu.memory_space<vmem>>, vector<1x16xf32>,
    %c0_537 = arith.constant 0 : index
    %c0_538 = arith.constant 0 : index
    %545 = vector.load %arg7[%c0_537, %c0_538] : memref<14x16xf32, #tpu.memory_space<vmem>>, vector<12x16xf32>
    %c1440 = arith.constant 1440 : index
    %c0_539 = arith.constant 0 : index
    %546 = vector.load %arg3[%c1440, %c0_539] : memref<1536x16xf32, #tpu.memory_space<vmem>>, vector<16x16xf32>
    %cst_540 = arith.constant dense<0.000000e+00> : vector<12x16xf32>
    %547 = tpu.matmul %545, %546, %cst_540 {dimension_numbers = #tpu.dot_dimension_numbers<[1], [0], [0], [1], [0, 0, 1, 1], [], []>} : vector<12x16xf32>, vector<16x16xf32>, vector<12x16xf32> -> vector<12x16xf32>
    %c1_541 = arith.constant 1 : index
    %c0_542 = arith.constant 0 : index
    %548 = vector.load %arg7[%c1_541, %c0_542] : memref<14x16xf32, #tpu.memory_space<vmem>>, vector<12x16xf32>
    %c1456 = arith.constant 1456 : index
    %c0_543 = arith.constant 0 : index
    %549 = vector.load %arg3[%c1456, %c0_543] : memref<1536x16xf32, #tpu.memory_space<vmem>>, vector<16x16xf32>
    %cst_544 = arith.constant dense<0.000000e+00> : vector<12x16xf32>
    %550 = tpu.matmul %548, %549, %cst_544 {dimension_numbers = #tpu.dot_dimension_numbers<[1], [0], [0], [1], [0, 0, 1, 1], [], []>} : vector<12x16xf32>, vector<16x16xf32>, vector<12x16xf32> -> vector<12x16xf32>
    %551 = arith.addf %547, %550 : vector<12x16xf32>
    %c2_545 = arith.constant 2 : index
    %c0_546 = arith.constant 0 : index
    %552 = vector.load %arg7[%c2_545, %c0_546] : memref<14x16xf32, #tpu.memory_space<vmem>>, vector<12x16xf32>
    %c1472 = arith.constant 1472 : index
    %c0_547 = arith.constant 0 : index
    %553 = vector.load %arg3[%c1472, %c0_547] : memref<1536x16xf32, #tpu.memory_space<vmem>>, vector<16x16xf32>
    %cst_548 = arith.constant dense<0.000000e+00> : vector<12x16xf32>
    %554 = tpu.matmul %552, %553, %cst_548 {dimension_numbers = #tpu.dot_dimension_numbers<[1], [0], [0], [1], [0, 0, 1, 1], [], []>} : vector<12x16xf32>, vector<16x16xf32>, vector<12x16xf32> -> vector<12x16xf32>
    %555 = arith.addf %551, %554 : vector<12x16xf32>
    %c14 = arith.constant 14 : index
    %c0_549 = arith.constant 0 : index
    %556 = vector.load %arg4[%c14, %c0_549] : memref<16x16xf32, #tpu.memory_space<vmem>>, vector<1x16xf32>
    %557 = vector.broadcast %556 : vector<1x16xf32> to vector<12x16xf32>
    %558 = arith.addf %555, %557 : vector<12x16xf32>
    %559 = arith.addf %518, %558 : vector<12x16xf32>
    %c1_550 = arith.constant 1 : index
    %c0_551 = arith.constant 0 : index
    %560 = vector.load %arg7[%c1_550, %c0_551] : memref<14x16xf32, #tpu.memory_space<vmem>>, vector<12x16xf32>
    tpu.vector_store %arg7[%c1_550, %c0_551], %559 {strides = array<i32>} : memref<14x16xf32, #tpu.memory_space<vmem>>, vector<12x16xf32>,
    %561 = vector.extract_strided_slice %559 {offsets = [11, 0], sizes = [1, 16], strides = [1, 1]} : vector<12x16xf32> to vector<1x16xf32>
    %c0_552 = arith.constant 0 : index
    %c0_553 = arith.constant 0 : index
    %562 = vector.load %arg7[%c0_552, %c0_553] : memref<14x16xf32, #tpu.memory_space<vmem>>, vector<1x16xf32>
    tpu.vector_store %arg7[%c0_552, %c0_553], %561 {strides = array<i32>} : memref<14x16xf32, #tpu.memory_space<vmem>>, vector<1x16xf32>,
    %563 = vector.extract_strided_slice %559 {offsets = [0, 0], sizes = [1, 16], strides = [1, 1]} : vector<12x16xf32> to vector<1x16xf32>
    %c13_554 = arith.constant 13 : index
    %c0_555 = arith.constant 0 : index
    %564 = vector.load %arg7[%c13_554, %c0_555] : memref<14x16xf32, #tpu.memory_space<vmem>>, vector<1x16xf32>
    tpu.vector_store %arg7[%c13_554, %c0_555], %563 {strides = array<i32>} : memref<14x16xf32, #tpu.memory_space<vmem>>, vector<1x16xf32>,
    %c0_556 = arith.constant 0 : index
    %c0_557 = arith.constant 0 : index
    %565 = vector.load %arg7[%c0_556, %c0_557] : memref<14x16xf32, #tpu.memory_space<vmem>>, vector<12x16xf32>
    %c1488 = arith.constant 1488 : index
    %c0_558 = arith.constant 0 : index
    %566 = vector.load %arg3[%c1488, %c0_558] : memref<1536x16xf32, #tpu.memory_space<vmem>>, vector<16x16xf32>
    %cst_559 = arith.constant dense<0.000000e+00> : vector<12x16xf32>
    %567 = tpu.matmul %565, %566, %cst_559 {dimension_numbers = #tpu.dot_dimension_numbers<[1], [0], [0], [1], [0, 0, 1, 1], [], []>} : vector<12x16xf32>, vector<16x16xf32>, vector<12x16xf32> -> vector<12x16xf32>
    %c1_560 = arith.constant 1 : index
    %c0_561 = arith.constant 0 : index
    %568 = vector.load %arg7[%c1_560, %c0_561] : memref<14x16xf32, #tpu.memory_space<vmem>>, vector<12x16xf32>
    %c1504 = arith.constant 1504 : index
    %c0_562 = arith.constant 0 : index
    %569 = vector.load %arg3[%c1504, %c0_562] : memref<1536x16xf32, #tpu.memory_space<vmem>>, vector<16x16xf32>
    %cst_563 = arith.constant dense<0.000000e+00> : vector<12x16xf32>
    %570 = tpu.matmul %568, %569, %cst_563 {dimension_numbers = #tpu.dot_dimension_numbers<[1], [0], [0], [1], [0, 0, 1, 1], [], []>} : vector<12x16xf32>, vector<16x16xf32>, vector<12x16xf32> -> vector<12x16xf32>
    %571 = arith.addf %567, %570 : vector<12x16xf32>
    %c2_564 = arith.constant 2 : index
    %c0_565 = arith.constant 0 : index
    %572 = vector.load %arg7[%c2_564, %c0_565] : memref<14x16xf32, #tpu.memory_space<vmem>>, vector<12x16xf32>
    %c1520 = arith.constant 1520 : index
    %c0_566 = arith.constant 0 : index
    %573 = vector.load %arg3[%c1520, %c0_566] : memref<1536x16xf32, #tpu.memory_space<vmem>>, vector<16x16xf32>
    %cst_567 = arith.constant dense<0.000000e+00> : vector<12x16xf32>
    %574 = tpu.matmul %572, %573, %cst_567 {dimension_numbers = #tpu.dot_dimension_numbers<[1], [0], [0], [1], [0, 0, 1, 1], [], []>} : vector<12x16xf32>, vector<16x16xf32>, vector<12x16xf32> -> vector<12x16xf32>
    %575 = arith.addf %571, %574 : vector<12x16xf32>
    %c15 = arith.constant 15 : index
    %c0_568 = arith.constant 0 : index
    %576 = vector.load %arg4[%c15, %c0_568] : memref<16x16xf32, #tpu.memory_space<vmem>>, vector<1x16xf32>
    %577 = vector.broadcast %576 : vector<1x16xf32> to vector<12x16xf32>
    %578 = arith.addf %575, %577 : vector<12x16xf32>
    %579 = arith.addf %295, %578 : vector<12x16xf32>
    %580 = vector.extract_strided_slice %497 {offsets = [0, 0], sizes = [64, 8], strides = [1, 1]} : vector<64x16xf32> to vector<64x8xf32>
    %581 = vector.extract_strided_slice %579 {offsets = [0, 0], sizes = [12, 8], strides = [1, 1]} : vector<12x16xf32> to vector<12x8xf32>
    %cst_569 = arith.constant dense<0.000000e+00> : vector<12x64xf32>
    %582 = tpu.matmul %581, %580, %cst_569 {dimension_numbers = #tpu.dot_dimension_numbers<[1], [1], [0], [0], [0, 0, 1, 0], [], []>} : vector<12x8xf32>, vector<64x8xf32>, vector<12x64xf32> -> vector<12x64xf32>
    %583 = vector.extract_strided_slice %581 {offsets = [0, 4], sizes = [12, 4], strides = [1, 1]} : vector<12x8xf32> to vector<12x4xf32>
    %cst_570 = arith.constant 0.000000e+00 : f32
    %584 = vector.broadcast %cst_570 : f32 to vector<12x4xf32>
    %585 = arith.subf %584, %583 : vector<12x4xf32>
    %586 = vector.extract_strided_slice %581 {offsets = [0, 0], sizes = [12, 4], strides = [1, 1]} : vector<12x8xf32> to vector<12x4xf32>
    %587 = tpu.concatenate %585, %586 in 1 : vector<12x4xf32>, vector<12x4xf32> -> vector<12x8xf32>
    %cst_571 = arith.constant dense<0.000000e+00> : vector<12x64xf32>
    %588 = tpu.matmul %587, %580, %cst_571 {dimension_numbers = #tpu.dot_dimension_numbers<[1], [1], [0], [0], [0, 0, 1, 0], [], []>} : vector<12x8xf32>, vector<64x8xf32>, vector<12x64xf32> -> vector<12x64xf32>
    %589 = tpu.transpose %580, [1, 0] : vector<64x8xf32> -> vector<8x64xf32>
    %c0_572 = arith.constant 0 : index
    %c0_573 = arith.constant 0 : index
    %c0_574 = arith.constant 0 : index
    %590 = vector.load %arg5[%c0_572, %c0_573, %c0_574] : memref<1x20x128xf32, #tpu.memory_space<vmem>>, vector<1x8x64xf32>
    %591 = vector.shape_cast %590 : vector<1x8x64xf32> to vector<8x64xf32>
    %592 = vector.shape_cast %589 : vector<8x64xf32> to vector<1x8x64xf32>
    tpu.vector_store %arg5[%c0_572, %c0_573, %c0_574], %592 {strides = array<i32>} : memref<1x20x128xf32, #tpu.memory_space<vmem>>, vector<1x8x64xf32>,
    %593 = tpu.transpose %581, [1, 0] : vector<12x8xf32> -> vector<8x12xf32>
    %c0_575 = arith.constant 0 : index
    %c0_576 = arith.constant 0 : index
    %c64_577 = arith.constant 64 : index
    %594 = vector.load %arg5[%c0_575, %c0_576, %c64_577] : memref<1x20x128xf32, #tpu.memory_space<vmem>>, vector<1x8x12xf32>
    %595 = vector.shape_cast %594 : vector<1x8x12xf32> to vector<8x12xf32>
    %596 = vector.shape_cast %593 : vector<8x12xf32> to vector<1x8x12xf32>
    tpu.vector_store %arg5[%c0_575, %c0_576, %c64_577], %596 {strides = array<i32>} : memref<1x20x128xf32, #tpu.memory_space<vmem>>, vector<1x8x12xf32>,
    %c0_578 = arith.constant 0 : index
    %c8_579 = arith.constant 8 : index
    %c0_580 = arith.constant 0 : index
    %597 = vector.load %arg5[%c0_578, %c8_579, %c0_580] : memref<1x20x128xf32, #tpu.memory_space<vmem>>, vector<1x12x64xf32>
    %598 = vector.shape_cast %597 : vector<1x12x64xf32> to vector<12x64xf32>
    %599 = vector.shape_cast %582 : vector<12x64xf32> to vector<1x12x64xf32>
    tpu.vector_store %arg5[%c0_578, %c8_579, %c0_580], %599 {strides = array<i32>} : memref<1x20x128xf32, #tpu.memory_space<vmem>>, vector<1x12x64xf32>,
    %c0_581 = arith.constant 0 : index
    %c8_582 = arith.constant 8 : index
    %c64_583 = arith.constant 64 : index
    %600 = vector.load %arg5[%c0_581, %c8_582, %c64_583] : memref<1x20x128xf32, #tpu.memory_space<vmem>>, vector<1x12x64xf32>
    %601 = vector.shape_cast %600 : vector<1x12x64xf32> to vector<12x64xf32>
    %602 = vector.shape_cast %588 : vector<12x64xf32> to vector<1x12x64xf32>
    tpu.vector_store %arg5[%c0_581, %c8_582, %c64_583], %602 {strides = array<i32>} : memref<1x20x128xf32, #tpu.memory_space<vmem>>, vector<1x12x64xf32>,
    return
  }
  func.func @transform_0(%arg0: i32) -> (i32, i32, i32) {
    %c0_i32 = arith.constant 0 : i32
    %c0_i32_0 = arith.constant 0 : i32
    %c0_i32_1 = arith.constant 0 : i32
    return %arg0, %c0_i32, %c0_i32_0 : i32, i32, i32
  }
  func.func @transform_1(%arg0: i32) -> (i32, i32, i32) {
    %c0_i32 = arith.constant 0 : i32
    %c0_i32_0 = arith.constant 0 : i32
    %c0_i32_1 = arith.constant 0 : i32
    return %arg0, %c0_i32, %c0_i32_0 : i32, i32, i32
  }
  func.func @transform_2(%arg0: i32) -> (i32, i32) {
    %c0_i32 = arith.constant 0 : i32
    %c0_i32_0 = arith.constant 0 : i32
    %c0_i32_1 = arith.constant 0 : i32
    return %c0_i32, %c0_i32_0 : i32, i32
  }
  func.func @transform_3(%arg0: i32) -> (i32, i32) {
    %c0_i32 = arith.constant 0 : i32
    %c0_i32_0 = arith.constant 0 : i32
    %c0_i32_1 = arith.constant 0 : i32
    return %c0_i32, %c0_i32_0 : i32, i32
  }
  func.func @transform_4(%arg0: i32) -> (i32, i32, i32) {
    %c0_i32 = arith.constant 0 : i32
    %c0_i32_0 = arith.constant 0 : i32
    %c0_i32_1 = arith.constant 0 : i32
    return %arg0, %c0_i32, %c0_i32_0 : i32, i32, i32
  }
}

</mosaic_0001>

<bundles_post_ra>
// kernel: custom-call.1
= control target key start
LH: loop header
LB: loop body
LE: loop exit
PB: predicated region body
PF: predicated region fallthrough
CT: control target
= control target key end

     0   :  { %s59_s0 = inlined_call_operand.hbm [shape: c64[2,64,4], index: 0, kind: input, shape index: {}]   ;;  %s60_s1 = inlined_call_operand.vmem [shape: f32[2,64,4], index: 1, kind: output, shape index: {}]  }
   0x1   :  { %s2_s8 = scalar_lea.hbm %s59_s0, 128 }
   0x2   :  { %3 = vsyncpa [#allocation0], 0  ;;  %s4_s11 = sshll.u32 %s60_s1, 4  ;;  %s34_s14 = scalar_lea.hbm %s59_s0, 256  ;;  %s5_s11 = int_to_ptr.vmem [resolvable:$true] %s4_s11 }
   0x3   :  { %p11_p0 = scmp.ne.s32.totalorder %s2_s8, %s34_s14  ;;  %p13_p1 = scmp.lt.u32.totalorder %s2_s8, %s59_s0 }
   0x4   :  { %p14_p2 = scmp.lt.u32.totalorder %s34_s14, %s34_s14  ;;  %p16_p4 = scmp.lt.u32.totalorder %s34_s14, %s2_s8 }
   0x6   :  { %p15_p3 = por %p14_p2, %p13_p1 }
   0x8   :  { %p17_p5 = por %p16_p4, %p15_p3 }
   0xa   :  { %p18_p6 = pnand %p17_p5, %p11_p0 }
   0xc   :  { %21 = shalt.err (!%p18_p6)  }
   0xd   :  { %s22_s17 = scalar_lea.vmem %s5_s11, 128  ;;  %p27_p8 = scmp.lt.s32.totalorder %s5_s11, %s5_s11 }
   0xe   :  { %p23_p7 = scmp.ne.s32.totalorder %s5_s11, %s22_s17  ;;  %p28_p9 = scmp.lt.s32.totalorder %s22_s17, %s22_s17 }
  0x10   :  { %p29_p10 = por %p28_p9, %p27_p8 }
  0x12   :  { %p30_p11 = pnand %p29_p10, %p23_p7 }
  0x14   :  { %33 = shalt.err (!%p30_p11)  }
  0x15   :  { %7 = dma.hbm_to_vmem [thread:$0]  %s2_s8, 128, %s5_s11, [#allocation0] }
  0x16   :  { %35 = dma.done.wait [#allocation0], 128  }
  0x17   :  { %36 = vsyncadd [#allocation0], 4294967168 }
  0x18   :  { %9 = vsyncpa [#allocation0], 1 }

// kernel: custom-call
= control target key start
LH: loop header
LB: loop body
LE: loop exit
PB: predicated region body
PF: predicated region fallthrough
CT: control target
= control target key end

     0   :  { %2 = vsyncpa [#allocation0], 0  ;;  %s61_s0 = inlined_call_operand.hbm [shape: c64[2,64,4], index: 0, kind: input, shape index: {}]   ;;  %s62_s1 = inlined_call_operand.vmem [shape: f32[2,64,4], index: 1, kind: output, shape index: {}]  }
   0x1   :  { %s3_s8 = sshll.u32 %s62_s1, 4  ;;  %s9_s11 = scalar_lea.hbm %s61_s0, 128  ;;  %s4_s8 = int_to_ptr.vmem [resolvable:$true] %s3_s8 }
   0x2   :  { %p10_p0 = scmp.ne.s32.totalorder %s61_s0, %s9_s11  ;;  %s11_s16 = scalar_lea.hbm %s61_s0, 256 }
   0x3   :  { %p12_p1 = scmp.lt.u32.totalorder %s11_s16, %s9_s11  ;;  %p13_p2 = scmp.lt.u32.totalorder %s9_s11, %s61_s0 }
   0x5   :  { %p14_p3 = por %p13_p2, %p12_p1 }
   0x7   :  { %p15_p4 = pnand %p14_p3, %p10_p0 }
   0x9   :  { %18 = shalt.err (!%p15_p4)  }
   0xa   :  { %s19_s1 = scalar_lea.vmem %s4_s8, 128  ;;  %p24_p6 = scmp.lt.s32.totalorder %s4_s8, %s4_s8 }
   0xb   :  { %p20_p5 = scmp.ne.s32.totalorder %s4_s8, %s19_s1  ;;  %p25_p7 = scmp.lt.s32.totalorder %s19_s1, %s19_s1 }
   0xd   :  { %p26_p8 = por %p25_p7, %p24_p6 }
   0xf   :  { %p27_p9 = pnand %p26_p8, %p20_p5 }
  0x11   :  { %30 = shalt.err (!%p27_p9)  }
  0x12   :  { %6 = dma.hbm_to_vmem [thread:$0]  %s61_s0, 128, %s4_s8, [#allocation0] }
  0x13   :  { %31 = dma.done.wait [#allocation0], 128  }
  0x14   :  { %32 = vsyncadd [#allocation0], 4294967168 }
  0x15   :  { %8 = vsyncpa [#allocation0], 1 }

// kernel: custom-call.3
= control target key start
LH: loop header
LB: loop body
LE: loop exit
PB: predicated region body
PF: predicated region fallthrough
CT: control target
= control target key end

     0   :  { %s61_s0 = inlined_call_operand.vmem [shape: c64[2,12,4], index: 0, kind: input, shape index: {}]   ;;  %s62_s1 = inlined_call_operand.vmem [shape: f32[2,12,4], index: 1, kind: output, shape index: {}]  }
   0x1   :  { %v20_v0 = vld [vmem:[%s61_s0 + $0x20] sm:$0xff]  ;;  %v21_v1 = vld [vmem:[%s61_s0 + $0x28] sm:$0xff]  ;;  %v23_v2 = vld [vmem:[%s61_s0 + $0x30] sm:$0xff] }
   0x2   :  { %4 = vst [vmem:[%s62_s1] sm:$0xff] %v20_v0  ;;  %22 = vst [vmem:[%s62_s1 + $0x8] sm:$0xff] %v21_v1  ;;  %v25_v3 = vld [vmem:[%s61_s0 + $0x38] sm:$0xff] }
   0x3   :  { %24 = vst [vmem:[%s62_s1 + $0x10] sm:$0xff] %v23_v2  ;;  %26 = vst [vmem:[%s62_s1 + $0x18] sm:$0xff] %v25_v3 }

// kernel: custom-call.2
= control target key start
LH: loop header
LB: loop body
LE: loop exit
PB: predicated region body
PF: predicated region fallthrough
CT: control target
= control target key end

     0   :  { %s56_s0 = inlined_call_operand.vmem [shape: c64[2,12,4], index: 0, kind: input, shape index: {}]   ;;  %s57_s1 = inlined_call_operand.vmem [shape: f32[2,12,4], index: 1, kind: output, shape index: {}]  }
   0x1   :  { %v2_v0 = vld [vmem:[%s56_s0] sm:$0xff]  ;;  %v16_v1 = vld [vmem:[%s56_s0 + $0x8] sm:$0xff]  ;;  %v18_v2 = vld [vmem:[%s56_s0 + $0x10] sm:$0xff] }
   0x2   :  { %3 = vst [vmem:[%s57_s1] sm:$0xff] %v2_v0  ;;  %17 = vst [vmem:[%s57_s1 + $0x8] sm:$0xff] %v16_v1  ;;  %v20_v3 = vld [vmem:[%s56_s0 + $0x18] sm:$0xff] }
   0x3   :  { %19 = vst [vmem:[%s57_s1 + $0x10] sm:$0xff] %v18_v2  ;;  %21 = vst [vmem:[%s57_s1 + $0x18] sm:$0xff] %v20_v3 }

// kernel: custom-call.4
= control target key start
LH: loop header
LB: loop body
LE: loop exit
PB: predicated region body
PF: predicated region fallthrough
CT: control target
= control target key end

     0   :  { %s126_s0 = inlined_call_operand.vmem [shape: f32[2,64,4], index: 0, kind: input, shape index: {}]   ;;  %s127_s1 = inlined_call_operand.vmem [shape: f32[2,64,4], index: 1, kind: input, shape index: {}]   ;;  %s128_s2 = inlined_call_operand.hbm [shape: c64[2,64,4], index: 2, kind: output, shape index: {}]  }
   0x1   :  { %s87_s11 = scalar_lea.hbm %s128_s2, 128 }
   0x2   :  { %4 = vsyncpa [#allocation0], 0  ;;  %s5_s14 = sshll.u32 %s126_s0, 4  ;;  %s6_s14 = int_to_ptr.vmem [resolvable:$true] %s5_s14 }
   0x3   :  { %s18_s15 = scalar_lea.vmem %s6_s14, 128  ;;  %p23_p1 = scmp.lt.s32.totalorder %s6_s14, %s6_s14 }
   0x4   :  { %p19_p0 = scmp.ne.s32.totalorder %s6_s14, %s18_s15  ;;  %p24_p2 = scmp.lt.s32.totalorder %s18_s15, %s18_s15 }
   0x6   :  { %p25_p3 = por %p24_p2, %p23_p1 }
   0x8   :  { %p26_p4 = pnand %p25_p3, %p19_p0 }
   0xa   :  { %29 = shalt.err (!%p26_p4)  }
   0xb   :  { %p31_p5 = scmp.ne.s32.totalorder %s128_s2, %s87_s11  ;;  %s32_s0 = scalar_lea.hbm %s128_s2, 256 }
   0xc   :  { %p33_p6 = scmp.lt.u32.totalorder %s32_s0, %s87_s11  ;;  %p34_p7 = scmp.lt.u32.totalorder %s87_s11, %s128_s2 }
   0xe   :  { %p35_p8 = por %p34_p7, %p33_p6 }
  0x10   :  { %p36_p9 = pnand %p35_p8, %p31_p5 }
  0x12   :  { %39 = shalt.err (!%p36_p9)  }
  0x13   :  { %8 = dma.vmem_to_hbm [thread:$0]  %s6_s14, 128, %s128_s2, [#allocation0] }
  0x14   :  { %65 = dma.done.wait [#allocation0], 128  }
  0x15   :  { %66 = vsyncadd [#allocation0], 4294967168 }
  0x16   :  { %10 = vsyncpa [#allocation0], 1 }
  0x17   :  { %11 = vsyncpa [#allocation1], 0  ;;  %s12_s28 = sshll.u32 %s127_s1, 4  ;;  %s13_s28 = int_to_ptr.vmem [resolvable:$true] %s12_s28 }
  0x18   :  { %s40_s29 = scalar_lea.vmem %s13_s28, 128  ;;  %p45_p11 = scmp.lt.s32.totalorder %s13_s28, %s13_s28 }
  0x19   :  { %p41_p10 = scmp.ne.s32.totalorder %s13_s28, %s40_s29  ;;  %p46_p12 = scmp.lt.s32.totalorder %s40_s29, %s40_s29 }
  0x1b   :  { %p47_p13 = por %p46_p12, %p45_p11 }
  0x1d   :  { %p48_p0 = pnand %p47_p13, %p41_p10 }
  0x1f   :  { %51 = shalt.err (!%p48_p0)  }
  0x20   :  { %p53_p1 = scmp.ne.s32.totalorder %s87_s11, %s32_s0  ;;  %p56_p2 = scmp.lt.u32.totalorder %s32_s0, %s32_s0 }
  0x22   :  { %p57_p3 = por %p56_p2, %p34_p7 }
  0x24   :  { %p59_p4 = por %p57_p3, %p33_p6 }
  0x26   :  { %p60_p5 = pnand %p59_p4, %p53_p1 }
  0x28   :  { %63 = shalt.err (!%p60_p5)  }
  0x29   :  { %15 = dma.vmem_to_hbm [thread:$0]  %s13_s28, 128, %s87_s11, [#allocation1] }
  0x2a   :  { %67 = dma.done.wait [#allocation1], 128  }
  0x2b   :  { %68 = vsyncadd [#allocation1], 4294967168 }
  0x2c   :  { %17 = vsyncpa [#allocation1], 1 }

// kernel: custom-call.5
= control target key start
LH: loop header
LB: loop body
LE: loop exit
PB: predicated region body
PF: predicated region fallthrough
CT: control target
= control target key end

     0   :  { %s126_s0 = inlined_call_operand.vmem [shape: f32[2,12,4], index: 0, kind: input, shape index: {}]   ;;  %s127_s1 = inlined_call_operand.vmem [shape: f32[2,12,4], index: 1, kind: input, shape index: {}]   ;;  %s128_s2 = inlined_call_operand.hbm [shape: c64[2,12,4], index: 2, kind: output, shape index: {}]  }
   0x1   :  { %s87_s11 = scalar_lea.hbm %s128_s2, 128 }
   0x2   :  { %4 = vsyncpa [#allocation0], 0  ;;  %s5_s14 = sshll.u32 %s126_s0, 4  ;;  %s6_s14 = int_to_ptr.vmem [resolvable:$true] %s5_s14 }
   0x3   :  { %s18_s15 = scalar_lea.vmem %s6_s14, 128  ;;  %p23_p1 = scmp.lt.s32.totalorder %s6_s14, %s6_s14 }
   0x4   :  { %p19_p0 = scmp.ne.s32.totalorder %s6_s14, %s18_s15  ;;  %p24_p2 = scmp.lt.s32.totalorder %s18_s15, %s18_s15 }
   0x6   :  { %p25_p3 = por %p24_p2, %p23_p1 }
   0x8   :  { %p26_p4 = pnand %p25_p3, %p19_p0 }
   0xa   :  { %29 = shalt.err (!%p26_p4)  }
   0xb   :  { %p31_p5 = scmp.ne.s32.totalorder %s128_s2, %s87_s11  ;;  %s32_s0 = scalar_lea.hbm %s128_s2, 256 }
   0xc   :  { %p33_p6 = scmp.lt.u32.totalorder %s32_s0, %s87_s11  ;;  %p34_p7 = scmp.lt.u32.totalorder %s87_s11, %s128_s2 }
   0xe   :  { %p35_p8 = por %p34_p7, %p33_p6 }
  0x10   :  { %p36_p9 = pnand %p35_p8, %p31_p5 }
  0x12   :  { %39 = shalt.err (!%p36_p9)  }
  0x13   :  { %8 = dma.vmem_to_hbm [thread:$0]  %s6_s14, 128, %s128_s2, [#allocation0] }
  0x14   :  { %65 = dma.done.wait [#allocation0], 128  }
  0x15   :  { %66 = vsyncadd [#allocation0], 4294967168 }
  0x16   :  { %10 = vsyncpa [#allocation0], 1 }
  0x17   :  { %11 = vsyncpa [#allocation1], 0  ;;  %s12_s28 = sshll.u32 %s127_s1, 4  ;;  %s13_s28 = int_to_ptr.vmem [resolvable:$true] %s12_s28 }
  0x18   :  { %s40_s29 = scalar_lea.vmem %s13_s28, 128  ;;  %p45_p11 = scmp.lt.s32.totalorder %s13_s28, %s13_s28 }
  0x19   :  { %p41_p10 = scmp.ne.s32.totalorder %s13_s28, %s40_s29  ;;  %p46_p12 = scmp.lt.s32.totalorder %s40_s29, %s40_s29 }
  0x1b   :  { %p47_p13 = por %p46_p12, %p45_p11 }
  0x1d   :  { %p48_p0 = pnand %p47_p13, %p41_p10 }
  0x1f   :  { %51 = shalt.err (!%p48_p0)  }
  0x20   :  { %p53_p1 = scmp.ne.s32.totalorder %s87_s11, %s32_s0  ;;  %p56_p2 = scmp.lt.u32.totalorder %s32_s0, %s32_s0 }
  0x22   :  { %p57_p3 = por %p56_p2, %p34_p7 }
  0x24   :  { %p59_p4 = por %p57_p3, %p33_p6 }
  0x26   :  { %p60_p5 = pnand %p59_p4, %p53_p1 }
  0x28   :  { %63 = shalt.err (!%p60_p5)  }
  0x29   :  { %15 = dma.vmem_to_hbm [thread:$0]  %s13_s28, 128, %s87_s11, [#allocation1] }
  0x2a   :  { %67 = dma.done.wait [#allocation1], 128  }
  0x2b   :  { %68 = vsyncadd [#allocation1], 4294967168 }
  0x2c   :  { %17 = vsyncpa [#allocation1], 1 }

// kernel: custom-call.6
= control target key start
LH: loop header
LB: loop body
LE: loop exit
PB: predicated region body
PF: predicated region fallthrough
CT: control target
= control target key end

     0   :  { %s112_s0 = inlined_call_operand.vmem [shape: f32[2,64,12], index: 0, kind: input, shape index: {}]   ;;  %s113_s1 = inlined_call_operand.vmem [shape: f32[2,64,12], index: 1, kind: input, shape index: {}]   ;;  %s114_s2 = inlined_call_operand.vmem [shape: c64[2,64,12], index: 2, kind: output, shape index: {}]  }
   0x1   :  { %v5_v0 = vld [vmem:[%s112_s0] sm:$0xff]  ;;  %v36_v1 = vld [vmem:[%s112_s0 + $0x8] sm:$0xff]  ;;  %v38_v2 = vld [vmem:[%s112_s0 + $0x10] sm:$0xff] }
   0x2   :  { %6 = vst [vmem:[%s114_s2] sm:$0xff] %v5_v0  ;;  %37 = vst [vmem:[%s114_s2 + $0x8] sm:$0xff] %v36_v1  ;;  %v40_v3 = vld [vmem:[%s112_s0 + $0x18] sm:$0xff]  ;;  %v19_v4 = vld [vmem:[%s113_s1] sm:$0xff] }
   0x3   :  { %39 = vst [vmem:[%s114_s2 + $0x10] sm:$0xff] %v38_v2  ;;  %v43_v5 = vld [vmem:[%s113_s1 + $0x8] sm:$0xff]  ;;  %41 = vst [vmem:[%s114_s2 + $0x18] sm:$0xff] %v40_v3  ;;  %v45_v6 = vld [vmem:[%s113_s1 + $0x10] sm:$0xff] }
   0x4   :  { %42 = vst [vmem:[%s114_s2 + $0x20] sm:$0xff] %v19_v4  ;;  %44 = vst [vmem:[%s114_s2 + $0x28] sm:$0xff] %v43_v5  ;;  %v47_v7 = vld [vmem:[%s113_s1 + $0x18] sm:$0xff] }
   0x5   :  { %46 = vst [vmem:[%s114_s2 + $0x30] sm:$0xff] %v45_v6  ;;  %48 = vst [vmem:[%s114_s2 + $0x38] sm:$0xff] %v47_v7 }

// kernel: demo_forward.1
= control target key start
LH: loop header
LB: loop body
LE: loop exit
PB: predicated region body
PF: predicated region fallthrough
CT: control target
= control target key end

     0   :  { %9 = vsyncpa [#allocation5], 0  ;;  %s17440_s15 = smov 0   ;;  %s19465_s0 = inlined_call_operand.vmem [shape: f32[2,64,16], index: 0, kind: input, shape index: {}]   ;;  %s19466_s1 = inlined_call_operand.vmem [shape: f32[2,12,16], index: 1, kind: input, shape index: {}]   ;;  %s19467_s2 = inlined_call_operand.hbm [shape: f32[1536,16], index: 2, kind: input, shape index: {}]   ;;  %s19468_s3 = inlined_call_operand.vmem [shape: f32[16,16], index: 3, kind: input, shape index: {}]   ;;  %s19469_s4 = inlined_call_operand.vmem [shape: f32[2,20,128], index: 4, kind: output, shape index: {}]  }
   0x1 LB: > { %s17446_s16 = sadd.s32 4294967295, %s17406_s15   ;;  %p13498_p0 = scmp.ge.s32.totalorder %s17406_s15, 1  ;;  %s17406_s15 = sphi %s17440_s15, %s15_s15  }
   0x2   : > { %p140_p1 = scmp.lt.s32.totalorder %s17406_s15, 3  ;;  %s17408_s17 = smov [#allocation4]  }
   0x3   : > { %s152_s18 = sshll.u32 %s17408_s17, 4  ;;  %p19470_p3 = scmp.eq.s32.totalorder %s17446_s16, 0  ;;  %s153_s18 = int_to_ptr.vmem [resolvable:$true] %s152_s18 }
   0x4   : > { %p17450_p2 = pnand %p13498_p0, %p140_p1  ;;  %s17368_s23 = scalar_lea.hbm %s19467_s2, 24576 }
   0x5   : > { %p17369_p6 = scmp.ne.s32.totalorder %s19467_s2, %s17368_s23  ;;  %p17375_p10 = scmp.lt.u32.totalorder %s17368_s23, %s19467_s2 }
   0x6   : > { %s19472_s19 = scalar_select %p17450_p2, 1, 0 }
   0x7   : > { %p17347_p4 = pneg %p17450_p2 }
   0x9   : > { %p17459_p5 = pnand %p19470_p3, %p17347_p4 }
   0xb   : > { %p17370_p7 = pneg %p17459_p5 }
   0xd   : > { %p17371_p8 = pnand %p17370_p7, %p17369_p6 }
   0xf   : > { %p17372_p9 = pneg %p17371_p8 }
  0x11   : > { %p17377_p11 = pnand %p17375_p10, %p17372_p9 }
  0x13   : > { %17380 = shalt.err (!%p17377_p11)
}
  0x14   : > { %s17381_s28 = scalar_lea.vmem %s153_s18, 24576  ;;  %p17389_p1 = scmp.lt.s32.totalorder %s153_s18, %s153_s18 }
  0x15   : > { %p17382_p12 = scmp.ne.s32.totalorder %s153_s18, %s17381_s28  ;;  %p17390_p4 = scmp.lt.s32.totalorder %s17381_s28, %s17381_s28 }
  0x17   : > { %p17384_p13 = pnand %p17382_p12, %p17370_p7  ;;  %p17391_p3 = por %p17390_p4, %p17389_p1 }
  0x19   : > { %p17385_p0 = pneg %p17384_p13 }
  0x1b   : > { %p17392_p2 = pnand %p17391_p3, %p17385_p0 }
  0x1d   : > { %17395 = shalt.err (!%p17392_p2)
}
  0x1e   : > { %s17409_s29 = smov 128   ;;  %s17410_s30 = smov 8  }
  0x1f   : > { %17350 = dma.hbm_to_vmem [thread:$0]  (!%p17459_p5), %s19467_s2, 24576, %s153_s18, [#allocation5], %s17409_s29, %s17409_s29, %s17410_s30  }
  0x20   : > { %p19474_p6 = scmp.ne.s32.totalorder %s19472_s19, 0 }
  0x21   : > { %p19475_p8 = scmp.eq.s32.totalorder (!%p19474_p6), %s17446_s16, 0 }
  0x22   : > { %187 = sbr.rel (%p19474_p6) target bundleno = 3962 (0xf7a), region = 36 }
  0x29   : > { %17401 = dma.done.wait (%p19475_p8), [#allocation5], 24576   ;;  %p19476_p7 = pmov %p19475_p8 }
  0x2a   : > { %vm233_vm0 = vcmask 130048   ;;  %vm235_vm1 = vcmask 123904   ;;  %p218_p2 = scmp.lt.s32.totalorder %s17446_s16, 1  ;;  %v17411_v0 = vmov 0.0   ;;  %v298_v1 = vld [vmem:[#allocation4 + $0x10] sm:$0xff]  ;;  %v299_v2 = vld [vmem:[#allocation4 + $0x18] sm:$0xff] }
  0x2b   : > { %17403 = vsyncadd (%p19476_p7), [#allocation5], 4294942720  ;;  %234 = vst.msk [vmem:[#allocation2] sm:$0xff] %vm233_vm0, %v17411_v0  ;;  %v288_v3 = vld [vmem:[#allocation4] sm:$0xff]  ;;  %v16366_v4 = vpack.c.bf16 %v299_v2, %v298_v1  ;;  %v289_v6 = vld [vmem:[#allocation4 + $0x8] sm:$0xff]  ;;  %vm256_vm2 = vcmask 128000  }
  0x2c   : > { %236 = vst.msk [vmem:[#allocation2 + $0x8] sm:$0x3] %vm235_vm1, %v17411_v0  ;;  %238 = vst.msk [vmem:[#allocation2 + $0x18] sm:$0x3] %vm235_vm1, %v17411_v0  ;;  %s19480_s16 = smov (!%p218_p2, %s17446_s16), 1  ;;  %v16370_v8 = vpack.c.bf16 %v289_v6, %v288_v3  ;;  %v566_v15 = vld [vmem:[#allocation4 + $0x20] sm:$0xff] }
  0x2d   : > { %240 = vst.msk [vmem:[#allocation2 + $0x28] sm:$0x3] %vm235_vm1, %v17411_v0  ;;  %242 = vst.msk [vmem:[#allocation2 + $0x38] sm:$0x3] %vm235_vm1, %v17411_v0  ;;  %s14170_s7 = sshll.u32 %s19480_s16, 6  ;;  %16367 = vmatprep.subr.bf16.mxu0 %v16366_v4  ;;  %v567_v16 = vld [vmem:[#allocation4 + $0x28] sm:$0xff] }
  0x2e   : > { %244 = vst.msk [vmem:[#allocation2 + $0x48] sm:$0x3] %vm235_vm1, %v17411_v0  ;;  %246 = vst.msk [vmem:[#allocation2 + $0x58] sm:$0x3] %vm235_vm1, %v17411_v0  ;;  %s222_s10 = scalar_lea.vmem %s19465_s0, %s14170_s7  ;;  %16369 = vmatpush3.bf16.msra.mxu0 %v16366_v4  ;;  %v16374_v18 = vpack.c.bf16 %v567_v16, %v566_v15  ;;  %v713_v27 = vld [vmem:[#allocation4 + $0x30] sm:$0xff]  ;;  %v714_v28 = vld [vmem:[#allocation4 + $0x38] sm:$0xff] }
  0x2f   : > { %248 = vst.msk [vmem:[#allocation2 + $0x68] sm:$0x3] %vm235_vm1, %v17411_v0  ;;  %250 = vst.msk [vmem:[#allocation2 + $0x78] sm:$0x3] %vm235_vm1, %v17411_v0  ;;  %v17539_v7 = vld [vmem:[%s222_s10] sm:$0xff]  ;;  %v17545_v9 = vld [vmem:[%s222_s10 + $0x8] sm:$0xff]  ;;  %16371 = vmatprep.subr.bf16.mxu0 %v16370_v8  ;;  %v16378_v31 = vpack.c.bf16 %v714_v28, %v713_v27 }
  0x30   : > { %252 = vst.msk [vmem:[#allocation2 + $0x88] sm:$0x3] %vm235_vm1, %v17411_v0  ;;  %254 = vst.msk [vmem:[#allocation2 + $0x98] sm:$0x3] %vm235_vm1, %v17411_v0  ;;  %v17547_v10 = vld [vmem:[%s222_s10 + $0x10] sm:$0xff]  ;;  %v17549_v11 = vld [vmem:[%s222_s10 + $0x18] sm:$0xff] }
  0x31   : > { %237 = vst.msk [vmem:[#allocation2 + $0x10] sm:$0xff] %vm233_vm0, %v17411_v0  ;;  %239 = vst.msk [vmem:[#allocation2 + $0x20] sm:$0xff] %vm233_vm0, %v17411_v0  ;;  %v17559_v12 = vld [vmem:[%s222_s10 + $0x20] sm:$0xff]  ;;  %v17561_v13 = vld [vmem:[%s222_s10 + $0x28] sm:$0xff]  ;;  %s14171_s17 = sshll.u32 %s19480_s16, 4  ;;  %vm5618_vm3 = vcmask 125952  }
  0x32   : > { %241 = vst.msk [vmem:[#allocation2 + $0x30] sm:$0xff] %vm233_vm0, %v17411_v0  ;;  %243 = vst.msk [vmem:[#allocation2 + $0x40] sm:$0xff] %vm233_vm0, %v17411_v0  ;;  %v17563_v14 = vld [vmem:[%s222_s10 + $0x30] sm:$0xff]  ;;  %v17571_v17 = vld [vmem:[%s222_s10 + $0x38] sm:$0xff]  ;;  %vm5620_vm4 = vcmask 125955   ;;  %s227_s20 = scalar_lea.vmem %s19466_s1, %s14171_s17  ;;  %vm5622_vm5 = vcmask 122880  }
  0x33   : > { %245 = vst.msk [vmem:[#allocation2 + $0x50] sm:$0xff] %vm233_vm0, %v17411_v0  ;;  %247 = vst.msk [vmem:[#allocation2 + $0x60] sm:$0xff] %vm233_vm0, %v17411_v0  ;;  %v17537_v5 = vld [vmem:[#allocation2 + $0x1] sm:$0xff]  ;;  %v860_v38 = vld [vmem:[#allocation4 + $0x40] sm:$0xff]  ;;  %vm13124_vm6 = vcmask 64512   ;;  %s17342_s25 = smul.u32 24, %s19480_s16 }
  0x34   : > { %249 = vst.msk [vmem:[#allocation2 + $0x70] sm:$0xff] %vm233_vm0, %v17411_v0  ;;  %251 = vst.msk [vmem:[#allocation2 + $0x80] sm:$0xff] %vm233_vm0, %v17411_v0  ;;  %15012 = vmatprep.mubr.msk.f32.mxu0 %vm233_vm0, %v17537_v5  ;;  %15156 = vmatprep.mubr.msk.f32.mxu1 %vm233_vm0, %v17537_v5  ;;  %v17601_v26 = vld [vmem:[#allocation2] sm:$0xff]  ;;  %v861_v39 = vld [vmem:[#allocation4 + $0x48] sm:$0xff]  ;;  %s17412_s16 = smov 124   ;;  %s17413_s29 = smov 4  }
  0x35   : > { %253 = vst.msk [vmem:[#allocation2 + $0x90] sm:$0xff] %vm233_vm0, %v17411_v0  ;;  %255 = vst.msk [vmem:[#allocation3] sm:$0xff] %vm233_vm0, %v17411_v0  ;;  %v17630_v37 = vld [vmem:[#allocation2 + $0x2] sm:$0xff]  ;;  %v16382_v42 = vpack.c.bf16 %v861_v39, %v860_v38  ;;  %v1155_v52 = vld [vmem:[#allocation4 + $0x60] sm:$0xff]  ;;  %s19433_s28 = scalar_lea.vmem %s19469_s4, %s17342_s25  ;;  %vm13246_vm8 = vcmask 31744   ;;  %s17414_s30 = smov 64  }
  0x36   : > { %272 = vst.msk [vmem:[#allocation2 + $0x11] sm:$0xff] %vm233_vm0, %v17539_v7  ;;  %273 = vst.msk [vmem:[#allocation2 + $0x21] sm:$0xff] %vm233_vm0, %v17545_v9  ;;  %v1007_v48 = vld [vmem:[#allocation4 + $0x50] sm:$0xff]  ;;  %v1008_v49 = vld [vmem:[#allocation4 + $0x58] sm:$0xff]  ;;  %vm13403_vm9 = vcmask 519168   ;;  %vm13362_vm10 = vcmask 523264  }
  0x37   : > { %274 = vst.msk [vmem:[#allocation2 + $0x31] sm:$0xff] %vm233_vm0, %v17547_v10  ;;  %275 = vst.msk [vmem:[#allocation2 + $0x41] sm:$0xff] %vm233_vm0, %v17549_v11  ;;  %v16386_v50 = vpack.c.bf16 %v1008_v49, %v1007_v48  ;;  %v1156_v53 = vld [vmem:[#allocation4 + $0x68] sm:$0xff]  ;;  %v1302_v56 = vld [vmem:[#allocation4 + $0x70] sm:$0xff]  ;;  %vm13415_vm11 = vcmask 1043968   ;;  %vm13413_vm12 = vcmask 1048064  }
  0x38   : > { %276 = vst.msk [vmem:[#allocation2 + $0x51] sm:$0xff] %vm233_vm0, %v17559_v12  ;;  %277 = vst.msk [vmem:[#allocation2 + $0x61] sm:$0xff] %vm233_vm0, %v17561_v13  ;;  %v16390_v54 = vpack.c.bf16 %v1156_v53, %v1155_v52  ;;  %v1303_v57 = vld [vmem:[#allocation4 + $0x78] sm:$0xff]  ;;  %v1449_v60 = vld [vmem:[#allocation4 + $0x80] sm:$0xff]  ;;  %vm13400_vm13 = vcmask 622080  }
  0x39   : > { %278 = vst.msk [vmem:[#allocation2 + $0x71] sm:$0xff] %vm233_vm0, %v17563_v14  ;;  %279 = vst.msk [vmem:[#allocation2 + $0x81] sm:$0xff] %vm233_vm0, %v17571_v17  ;;  %v16394_v58 = vpack.c.bf16 %v1303_v57, %v1302_v56  ;;  %v1450_v61 = vld [vmem:[#allocation4 + $0x88] sm:$0xff]  ;;  %v1635_v3 = vld [vmem:[#allocation4 + $0xa0] sm:$0xff] }
  0x3a   : > { %v16398_v62 = vpack.c.bf16 %v1450_v61, %v1449_v60  ;;  %v1636_v4 = vld [vmem:[#allocation4 + $0xa8] sm:$0xff]  ;;  %v1626_v15 = vld [vmem:[#allocation4 + $0x98] sm:$0xff]  ;;  %v2971_v56 = vld [vmem:[#allocation4 + $0x130] sm:$0xff]  ;;  %257 = vst.msk [vmem:[#allocation3 + $0x8] sm:$0x3f] %vm256_vm2, %v17411_v0 }
  0x3b   : > { %v16402_v6 = vpack.c.bf16 %v1636_v4, %v1635_v3  ;;  %v2972_v57 = vld [vmem:[#allocation4 + $0x138] sm:$0xff]  ;;  %vm19339_vm7 = vmpackc.low %vm13124_vm6, %vm13124_vm6  ;;  %260 = vst [vmem:[%s19433_s28 + $0x10] sm:$0xf] %v17411_v0 }
  0x3c   : > { %v17717_v63 = vld [vmem:[#allocation2 + $0x90] sm:$0xff]  ;;  %258 = vst [vmem:[%s19433_s28] sm:$0xff] %v17411_v0  ;;  %259 = vst [vmem:[%s19433_s28 + $0x8] sm:$0xff] %v17411_v0 }
  0x3d   : > { %v17575_v19 = vld [vmem:[#allocation2 + $0x11] sm:$0xff]  ;;  %v17579_v20 = vld [vmem:[#allocation2 + $0x21] sm:$0xff]  ;;  %16403 = vmatprep.subr.bf16.mxu1 %v16402_v6 }
  0x3e   : > { %15013 = vmatmul.mubr.msk.f32.vlgmr.msra.gmra.mrb[0].mxu0 %vm233_vm0, %v17575_v19  ;;  %v17583_v21 = vld [vmem:[#allocation2 + $0x31] sm:$0xff]  ;;  %v17585_v22 = vld [vmem:[#allocation2 + $0x41] sm:$0xff]  ;;  %16405 = vmatpush3.bf16.msra.mxu1 %v16402_v6 }
  0x3f   : > { %16373 = vmatpush3.bf16.msra.mxu0 %v16370_v8  ;;  %15015 = vmatprep.mubr.msk.f32.mxu0 %vm233_vm0, %v17579_v20  ;;  %v17591_v23 = vld [vmem:[#allocation2 + $0x51] sm:$0xff]  ;;  %v17593_v24 = vld [vmem:[#allocation2 + $0x61] sm:$0xff] }
  0x40   : > { %16375 = vmatprep.subr.bf16.mxu0 %v16374_v18  ;;  %v17599_v25 = vld [vmem:[#allocation2 + $0x71] sm:$0xff]  ;;  %v17607_v30 = vld [vmem:[#allocation2 + $0x20] sm:$0xff] }
  0x41   : > { %v281_v29 = vld [vmem:[#allocation2 + $0x10] sm:$0xff]  ;;  %v17614_v33 = vld [vmem:[#allocation2 + $0x40] sm:$0xff] }
  0x42   : > { %15016 = vmatmul.mubr.msk.f32.gmra.mrb[2].mxu0 %vm233_vm0, %v17583_v21  ;;  %v17612_v32 = vld [vmem:[#allocation2 + $0x30] sm:$0xff]  ;;  %v17622_v35 = vld [vmem:[#allocation2 + $0x60] sm:$0xff] }
  0x43   : > { %15018 = vmatprep.mubr.msk.f32.mxu0 %vm233_vm0, %v17585_v22  ;;  %v17620_v34 = vld [vmem:[#allocation2 + $0x50] sm:$0xff]  ;;  %v17636_v41 = vld [vmem:[#allocation2 + $0x22] sm:$0xff] }
  0x44   : > { %v17628_v36 = vld [vmem:[#allocation2 + $0x70] sm:$0xff]  ;;  %v17643_v44 = vld [vmem:[#allocation2 + $0x42] sm:$0xff] }
  0x45   : > { %v559_v40 = vld [vmem:[#allocation2 + $0x12] sm:$0xff]  ;;  %v17651_v46 = vld [vmem:[#allocation2 + $0x62] sm:$0xff] }
  0x46   : > { %15019 = vmatmul.mubr.msk.f32.gmra.mrb[4].mxu0 %vm233_vm0, %v17591_v23  ;;  %v17641_v43 = vld [vmem:[#allocation2 + $0x32] sm:$0xff]  ;;  %v712_v51 = vld [vmem:[#allocation2 + $0x80] sm:$0xff] }
  0x47   : > { %15021 = vmatprep.mubr.msk.f32.mxu0 %vm233_vm0, %v17593_v24  ;;  %v17649_v45 = vld [vmem:[#allocation2 + $0x52] sm:$0xff]  ;;  %v859_v55 = vld [vmem:[#allocation2 + $0x81] sm:$0xff] }
  0x48   : > { %v17657_v47 = vld [vmem:[#allocation2 + $0x72] sm:$0xff]  ;;  %v1006_v59 = vld [vmem:[#allocation2 + $0x82] sm:$0xff] }
  0x49   : > { %v17734_v1 = vld [vmem:[#allocation2 + $0x91] sm:$0xff]  ;;  %v1625_v8 = vld [vmem:[#allocation4 + $0x90] sm:$0xff] }
  0x4a   : > { %15022 = vmatmul.mubr.msk.f32.gmra.mrb[6].mxu0 %vm233_vm0, %v17599_v25  ;;  %v17751_v2 = vld [vmem:[#allocation2 + $0x92] sm:$0xff]  ;;  %v16406_v16 = vpack.c.bf16 %v1626_v15, %v1625_v8  ;;  %v2197_v15 = vld [vmem:[#allocation4 + $0xd0] sm:$0xff] }
  0x4b   : > { %15028 = vmatprep.mubr.msk.f32.mxu0 %vm233_vm0, %v17601_v26 }
  0x4c   : > { %16407 = vmatprep.subr.bf16.mxu1 %v16406_v16 }
  0x4e   : > { %15029 = vmatmul.mubr.msk.f32.vlgmr.msra.gmra.mrb[0].mxu0 %vm233_vm0, %v281_v29 }
  0x4f   : > { %16377 = vmatpush3.bf16.msra.mxu0 %v16374_v18  ;;  %15031 = vmatprep.mubr.msk.f32.mxu0 %vm233_vm0, %v17607_v30  ;;  %v13580_v18 = vld [vmem:[%s19468_s3] ss:$0 sm:$0xff] }
  0x50   : > { %16379 = vmatprep.subr.bf16.mxu0 %v16378_v31 }
  0x52   : > { %15032 = vmatmul.mubr.msk.f32.gmra.mrb[2].mxu0 %vm233_vm0, %v17612_v32 }
  0x53   : > { %15034 = vmatprep.mubr.msk.f32.mxu0 %vm233_vm0, %v17614_v33 }
  0x56   : > { %15035 = vmatmul.mubr.msk.f32.gmra.mrb[4].mxu0 %vm233_vm0, %v17620_v34 }
  0x57   : > { %15037 = vmatprep.mubr.msk.f32.mxu0 %vm233_vm0, %v17622_v35 }
  0x5a   : > { %15038 = vmatmul.mubr.msk.f32.gmra.mrb[6].mxu0 %vm233_vm0, %v17628_v36 }
  0x5b   : > { %15044 = vmatprep.mubr.msk.f32.mxu0 %vm233_vm0, %v17630_v37 }
  0x5e   : > { %15045 = vmatmul.mubr.msk.f32.vlgmr.msra.gmra.mrb[0].mxu0 %vm233_vm0, %v559_v40 }
  0x5f   : > { %16381 = vmatpush3.bf16.msra.mxu0 %v16378_v31  ;;  %15047 = vmatprep.mubr.msk.f32.mxu0 %vm233_vm0, %v17636_v41 }
  0x60   : > { %16383 = vmatprep.subr.bf16.mxu0 %v16382_v42 }
  0x62   : > { %15048 = vmatmul.mubr.msk.f32.gmra.mrb[2].mxu0 %vm233_vm0, %v17641_v43 }
  0x63   : > { %15050 = vmatprep.mubr.msk.f32.mxu0 %vm233_vm0, %v17643_v44 }
  0x66   : > { %15051 = vmatmul.mubr.msk.f32.gmra.mrb[4].mxu0 %vm233_vm0, %v17649_v45 }
  0x67   : > { %15053 = vmatprep.mubr.msk.f32.mxu0 %vm233_vm0, %v17651_v46 }
  0x6a   : > { %15054 = vmatmul.mubr.msk.f32.gmra.mrb[6].mxu0 %vm233_vm0, %v17657_v47 }
  0x6b   : > { %15060 = vmatprep.mubr.msk.f32.mxu0 %vm233_vm0, %v281_v29 }
  0x6e   : > { %15061 = vmatmul.mubr.msk.f32.vlgmr.msra.gmra.mrb[0].mxu0 %vm233_vm0, %v17607_v30 }
  0x6f   : > { %16385 = vmatpush3.bf16.msra.mxu0 %v16382_v42  ;;  %15063 = vmatprep.mubr.msk.f32.mxu0 %vm233_vm0, %v17612_v32 }
  0x70   : > { %16387 = vmatprep.subr.bf16.mxu0 %v16386_v50 }
  0x72   : > { %15064 = vmatmul.mubr.msk.f32.gmra.mrb[2].mxu0 %vm233_vm0, %v17614_v33 }
  0x73   : > { %15066 = vmatprep.mubr.msk.f32.mxu0 %vm233_vm0, %v17620_v34 }
  0x76   : > { %15067 = vmatmul.mubr.msk.f32.gmra.mrb[4].mxu0 %vm233_vm0, %v17622_v35 }
  0x77   : > { %15069 = vmatprep.mubr.msk.f32.mxu0 %vm233_vm0, %v17628_v36 }
  0x7a   : > { %15070 = vmatmul.mubr.msk.f32.gmra.mrb[6].mxu0 %vm233_vm0, %v712_v51 }
  0x7b   : > { %15076 = vmatprep.mubr.msk.f32.mxu0 %vm233_vm0, %v17575_v19 }
  0x7e   : > { %15077 = vmatmul.mubr.msk.f32.vlgmr.msra.gmra.mrb[0].mxu0 %vm233_vm0, %v17579_v20 }
  0x7f   : > { %16389 = vmatpush3.bf16.msra.mxu0 %v16386_v50  ;;  %15079 = vmatprep.mubr.msk.f32.mxu0 %vm233_vm0, %v17583_v21 }
  0x80   : > { %16391 = vmatprep.subr.bf16.mxu0 %v16390_v54 }
  0x82   : > { %15080 = vmatmul.mubr.msk.f32.gmra.mrb[2].mxu0 %vm233_vm0, %v17585_v22 }
  0x83   : > { %15082 = vmatprep.mubr.msk.f32.mxu0 %vm233_vm0, %v17591_v23 }
  0x86   : > { %15083 = vmatmul.mubr.msk.f32.gmra.mrb[4].mxu0 %vm233_vm0, %v17593_v24 }
  0x87   : > { %15085 = vmatprep.mubr.msk.f32.mxu0 %vm233_vm0, %v17599_v25 }
  0x8a   : > { %15086 = vmatmul.mubr.msk.f32.gmra.mrb[6].mxu0 %vm233_vm0, %v859_v55 }
  0x8b   : > { %15092 = vmatprep.mubr.msk.f32.mxu0 %vm233_vm0, %v559_v40 }
  0x8e   : > { %15093 = vmatmul.mubr.msk.f32.vlgmr.msra.gmra.mrb[0].mxu0 %vm233_vm0, %v17636_v41 }
  0x8f   : > { %16393 = vmatpush3.bf16.msra.mxu0 %v16390_v54  ;;  %15095 = vmatprep.mubr.msk.f32.mxu0 %vm233_vm0, %v17641_v43  ;;  %v2050_v54 = vld [vmem:[#allocation4 + $0xc0] sm:$0xff] }
  0x90   : > { %16395 = vmatprep.subr.bf16.mxu0 %v16394_v58 }
  0x92   : > { %15096 = vmatmul.mubr.msk.f32.gmra.mrb[2].mxu0 %vm233_vm0, %v17643_v44 }
  0x93   : > { %15098 = vmatprep.mubr.msk.f32.mxu0 %vm233_vm0, %v17649_v45 }
  0x96   : > { %15099 = vmatmul.mubr.msk.f32.gmra.mrb[4].mxu0 %vm233_vm0, %v17651_v46 }
  0x97   : > { %15101 = vmatprep.mubr.msk.f32.mxu0 %vm233_vm0, %v17657_v47 }
  0x9a   : > { %15102 = vmatmul.mubr.msk.f32.gmra.mrb[6].mxu0 %vm233_vm0, %v1006_v59 }
  0x9b   : > { %15108 = vmatprep.mubr.msk.f32.mxu0 %vm233_vm0, %v17607_v30 }
  0x9e   : > { %15109 = vmatmul.mubr.msk.f32.vlgmr.msra.gmra.mrb[0].mxu0 %vm233_vm0, %v17612_v32 }
  0x9f   : > { %16397 = vmatpush3.bf16.msra.mxu0 %v16394_v58  ;;  %15111 = vmatprep.mubr.msk.f32.mxu0 %vm233_vm0, %v17614_v33  ;;  %v16438_v58 = vpack.c.bf16 %v2972_v57, %v2971_v56  ;;  %v2638_v57 = vld [vmem:[#allocation4 + $0x100] sm:$0xff] }
  0xa0   : > { %16399 = vmatprep.subr.bf16.mxu0 %v16398_v62 }
  0xa2   : > { %15112 = vmatmul.mubr.msk.f32.gmra.mrb[2].mxu0 %vm233_vm0, %v17620_v34  ;;  %v1903_v34 = vld [vmem:[#allocation4 + $0xb0] sm:$0xff] }
  0xa3   : > { %15114 = vmatprep.mubr.msk.f32.mxu0 %vm233_vm0, %v17622_v35  ;;  %v1904_v35 = vld [vmem:[#allocation4 + $0xb8] sm:$0xff] }
  0xa6   : > { %15115 = vmatmul.mubr.msk.f32.gmra.mrb[4].mxu0 %vm233_vm0, %v17628_v36 }
  0xa7   : > { %15117 = vmatprep.mubr.msk.f32.mxu0 %vm233_vm0, %v712_v51 }
  0xaa   : > { %15118 = vmatmul.mubr.msk.f32.gmra.mrb[6].mxu0 %vm233_vm0, %v17717_v63 }
  0xab   : > { %15124 = vmatprep.mubr.msk.f32.mxu0 %vm233_vm0, %v17579_v20 }
  0xae   : > { %15125 = vmatmul.mubr.msk.f32.vlgmr.msra.gmra.mrb[0].mxu0 %vm233_vm0, %v17583_v21 }
  0xaf   : > { %16401 = vmatpush3.bf16.msra.mxu0 %v16398_v62  ;;  %15127 = vmatprep.mubr.msk.f32.mxu0 %vm233_vm0, %v17585_v22 }
  0xb0   : > { %16439 = vmatprep.subr.bf16.mxu0 %v16438_v58 }
  0xb2   : > { %15128 = vmatmul.mubr.msk.f32.gmra.mrb[2].mxu0 %vm233_vm0, %v17591_v23 }
  0xb3   : > { %15130 = vmatprep.mubr.msk.f32.mxu0 %vm233_vm0, %v17593_v24 }
  0xb6   : > { %15131 = vmatmul.mubr.msk.f32.gmra.mrb[4].mxu0 %vm233_vm0, %v17599_v25 }
  0xb7   : > { %15133 = vmatprep.mubr.msk.f32.mxu0 %vm233_vm0, %v859_v55  ;;  %v2051_v55 = vld [vmem:[#allocation4 + $0xc8] sm:$0xff] }
  0xba   : > { %15134 = vmatmul.mubr.msk.f32.gmra.mrb[6].mxu0 %vm233_vm0, %v17734_v1 }
  0xbb   : > { %15140 = vmatprep.mubr.msk.f32.mxu0 %vm233_vm0, %v17636_v41  ;;  %v16410_v41 = vpack.c.bf16 %v1904_v35, %v1903_v34  ;;  %v2344_v35 = vld [vmem:[#allocation4 + $0xe0] sm:$0xff] }
  0xbe   : > { %15141 = vmatmul.mubr.msk.f32.vlgmr.msra.gmra.mrb[0].mxu0 %vm233_vm0, %v17641_v43 }
  0xbf   : > { %15143 = vmatprep.mubr.msk.f32.mxu0 %vm233_vm0, %v17643_v44  ;;  %16441 = vmatpush3.bf16.msra.mxu0 %v16438_v58  ;;  %v2639_v58 = vld [vmem:[#allocation4 + $0x108] sm:$0xff] }
  0xc2   : > { %15144 = vmatmul.mubr.msk.f32.gmra.mrb[2].mxu0 %vm233_vm0, %v17649_v45 }
  0xc3   : > { %15146 = vmatprep.mubr.msk.f32.mxu0 %vm233_vm0, %v17651_v46 }
  0xc6   : > { %15147 = vmatmul.mubr.msk.f32.gmra.mrb[4].mxu0 %vm233_vm0, %v17657_v47 }
  0xc7   : > { %15149 = vmatprep.mubr.msk.f32.mxu0 %vm233_vm0, %v1006_v59  ;;  %v16414_v59 = vpack.c.bf16 %v2051_v55, %v2050_v54  ;;  %v2491_v54 = vld [vmem:[#allocation4 + $0xf0] sm:$0xff]  ;;  %v2492_v55 = vld [vmem:[#allocation4 + $0xf8] sm:$0xff] }
  0xc8   : > { %v16426_v56 = vpack.c.bf16 %v2492_v55, %v2491_v54 }
  0xca   : > { %15150 = vmatmul.mubr.msk.f32.gmra.mrb[6].mxu0 %vm233_vm0, %v17751_v2 }
  0xcb   : > { %15300 = vmatprep.mubr.msk.f32.mxu0 %vm233_vm0, %v17537_v5 }
 0x191   : > { %v15142_v19 = vpop.f32.mrb[0].mxu0 }
 0x192   : > { %v17760_v20 = vadd.f32 %v15142_v19, %v13580_v18  ;;  %v1541_v21 = vpop.f32.mrb[1].mxu0 }
 0x193   : > { %v17762_v22 = vadd.f32 %v13580_v18, %v1541_v21 }
 0x194   : > { %v1602_v5 = vmax.f32 %v17760_v20, 0.0 }
 0x195   : > { %v1601_v23 = vmax.f32 %v17762_v22, 0.0  ;;  %v15145_v24 = vpop.f32.mrb[2].mxu0 }
 0x196   : > { %1610 = vst.msk [vmem:[#allocation2 + $0x21] sm:$0xff] %vm233_vm0, %v1602_v5  ;;  %v17769_v25 = vadd.f32 %v15145_v24, %v13580_v18  ;;  %v1551_v27 = vpop.f32.mrb[3].mxu0 }
 0x197   : > { %1609 = vst.msk [vmem:[#allocation2 + $0x11] sm:$0xff] %vm233_vm0, %v1601_v23  ;;  %v17774_v28 = vadd.f32 %v13580_v18, %v1551_v27 }
 0x198   : > { %v1604_v29 = vmax.f32 %v17769_v25, 0.0 }
 0x199   : > { %v1603_v30 = vmax.f32 %v17774_v28, 0.0  ;;  %v15148_v31 = vpop.f32.mrb[4].mxu0 }
 0x19a   : > { %1612 = vst.msk [vmem:[#allocation2 + $0x41] sm:$0xff] %vm233_vm0, %v1604_v29  ;;  %v17781_v32 = vadd.f32 %v15148_v31, %v13580_v18  ;;  %v1561_v33 = vpop.f32.mrb[5].mxu0 }
 0x19b   : > { %1611 = vst.msk [vmem:[#allocation2 + $0x31] sm:$0xff] %vm233_vm0, %v1603_v30  ;;  %v17786_v36 = vadd.f32 %v13580_v18, %v1561_v33 }
 0x19c   : > { %v1606_v38 = vmax.f32 %v17781_v32, 0.0 }
 0x19d   : > { %v1605_v39 = vmax.f32 %v17786_v36, 0.0  ;;  %v15151_v40 = vpop.f32.mrb[6].mxu0  ;;  %v17804_v46 = vld [vmem:[#allocation2 + $0x21] sm:$0xff] }
 0x19e   : > { %1614 = vst.msk [vmem:[#allocation2 + $0x61] sm:$0xff] %vm233_vm0, %v1606_v38  ;;  %v17793_v42 = vadd.f32 %v15151_v40, %v13580_v18  ;;  %v1571_v43 = vpop.f32.mrb[7].mxu0  ;;  %v17795_v44 = vld [vmem:[#allocation2 + $0x11] sm:$0xff]  ;;  %v17839_v61 = vld [vmem:[#allocation2 + $0x20] sm:$0xff] }
 0x19f   : > { %1613 = vst.msk [vmem:[#allocation2 + $0x51] sm:$0xff] %vm233_vm0, %v1605_v39  ;;  %v17800_v45 = vadd.f32 %v13580_v18, %v1571_v43  ;;  %15157 = vmatmul.mubr.msk.f32.vlgmr.msra.gmra.mrb[0].mxu1 %vm233_vm0, %v17795_v44  ;;  %v1618_v60 = vld [vmem:[#allocation2 + $0x10] sm:$0xff]  ;;  %v17866_v21 = vld [vmem:[#allocation2 + $0x22] sm:$0xff]  ;;  %v2345_v40 = vld [vmem:[#allocation4 + $0xe8] sm:$0xff] }
 0x1a0   : > { %v1608_v47 = vmax.f32 %v17793_v42, 0.0  ;;  %16409 = vmatpush3.bf16.msra.mxu1 %v16406_v16  ;;  %15159 = vmatprep.mubr.msk.f32.mxu1 %vm233_vm0, %v17804_v46  ;;  %v2198_v16 = vld [vmem:[#allocation4 + $0xd8] sm:$0xff]  ;;  %v1896_v19 = vld [vmem:[#allocation2 + $0x12] sm:$0xff] }
 0x1a1   : > { %v1607_v48 = vmax.f32 %v17800_v45, 0.0  ;;  %16411 = vmatprep.subr.bf16.mxu1 %v16410_v41  ;;  %v17820_v50 = vld [vmem:[#allocation2 + $0x41] sm:$0xff]  ;;  %v16418_v18 = vpack.c.bf16 %v2198_v16, %v2197_v15 }
 0x1a2   : > { %1616 = vst.msk [vmem:[#allocation2 + $0x81] sm:$0xff] %vm233_vm0, %v1608_v47  ;;  %v17813_v49 = vld [vmem:[#allocation2 + $0x31] sm:$0xff]  ;;  %v17847_v3 = vld [vmem:[#allocation2 + $0x40] sm:$0xff]  ;;  %v2786_v16 = vld [vmem:[#allocation4 + $0x118] sm:$0xff] }
 0x1a3   : > { %1615 = vst.msk [vmem:[#allocation2 + $0x71] sm:$0xff] %vm233_vm0, %v1607_v48  ;;  %15160 = vmatmul.mubr.msk.f32.gmra.mrb[2].mxu1 %vm233_vm0, %v17813_v49  ;;  %v17843_v62 = vld [vmem:[#allocation2 + $0x30] sm:$0xff]  ;;  %v17874_v27 = vld [vmem:[#allocation2 + $0x42] sm:$0xff] }
 0x1a4   : > { %15162 = vmatprep.mubr.msk.f32.mxu1 %vm233_vm0, %v17820_v50  ;;  %v17870_v24 = vld [vmem:[#allocation2 + $0x32] sm:$0xff]  ;;  %v2785_v15 = vld [vmem:[#allocation4 + $0x110] sm:$0xff] }
 0x1a5   : > { %v17828_v52 = vld [vmem:[#allocation2 + $0x61] sm:$0xff] }
 0x1a6   : > { %v17824_v51 = vld [vmem:[#allocation2 + $0x51] sm:$0xff]  ;;  %v17855_v6 = vld [vmem:[#allocation2 + $0x60] sm:$0xff] }
 0x1a7   : > { %15163 = vmatmul.mubr.msk.f32.gmra.mrb[4].mxu1 %vm233_vm0, %v17824_v51  ;;  %v17851_v4 = vld [vmem:[#allocation2 + $0x50] sm:$0xff]  ;;  %v17882_v33 = vld [vmem:[#allocation2 + $0x62] sm:$0xff] }
 0x1a8   : > { %15165 = vmatprep.mubr.msk.f32.mxu1 %vm233_vm0, %v17828_v52  ;;  %v17878_v31 = vld [vmem:[#allocation2 + $0x52] sm:$0xff] }
 0x1a9   : > { %v2049_v43 = vld [vmem:[#allocation2 + $0x80] sm:$0xff] }
 0x1aa   : > { %v17832_v53 = vld [vmem:[#allocation2 + $0x71] sm:$0xff] }
 0x1ab   : > { %15166 = vmatmul.mubr.msk.f32.gmra.mrb[6].mxu1 %vm233_vm0, %v17832_v53  ;;  %v17859_v8 = vld [vmem:[#allocation2 + $0x70] sm:$0xff] }
 0x1ac   : > { %15172 = vmatprep.mubr.msk.f32.mxu1 %vm233_vm0, %v17601_v26  ;;  %v17886_v34 = vld [vmem:[#allocation2 + $0x72] sm:$0xff] }
 0x1af   : > { %15173 = vmatmul.mubr.msk.f32.vlgmr.msra.gmra.mrb[0].mxu1 %vm233_vm0, %v1618_v60 }
 0x1b0   : > { %16413 = vmatpush3.bf16.msra.mxu1 %v16410_v41  ;;  %15175 = vmatprep.mubr.msk.f32.mxu1 %vm233_vm0, %v17839_v61  ;;  %v16422_v41 = vpack.c.bf16 %v2345_v40, %v2344_v35  ;;  %v3239_v35 = vld [vmem:[#allocation4 + $0x140] sm:$0xff]  ;;  %v3240_v40 = vld [vmem:[#allocation4 + $0x148] sm:$0xff] }
 0x1b1   : > { %16415 = vmatprep.subr.bf16.mxu1 %v16414_v59 }
 0x1b3   : > { %15176 = vmatmul.mubr.msk.f32.gmra.mrb[2].mxu1 %vm233_vm0, %v17843_v62 }
 0x1b4   : > { %15178 = vmatprep.mubr.msk.f32.mxu1 %vm233_vm0, %v17847_v3 }
 0x1b7   : > { %15179 = vmatmul.mubr.msk.f32.gmra.mrb[4].mxu1 %vm233_vm0, %v17851_v4 }
 0x1b8   : > { %15181 = vmatprep.mubr.msk.f32.mxu1 %vm233_vm0, %v17855_v6 }
 0x1bb   : > { %15182 = vmatmul.mubr.msk.f32.gmra.mrb[6].mxu1 %vm233_vm0, %v17859_v8 }
 0x1bc   : > { %15188 = vmatprep.mubr.msk.f32.mxu1 %vm233_vm0, %v17630_v37 }
 0x1bf   : > { %15189 = vmatmul.mubr.msk.f32.vlgmr.msra.gmra.mrb[0].mxu1 %vm233_vm0, %v1896_v19 }
 0x1c0   : > { %16417 = vmatpush3.bf16.msra.mxu1 %v16414_v59  ;;  %15191 = vmatprep.mubr.msk.f32.mxu1 %vm233_vm0, %v17866_v21  ;;  %v16430_v59 = vpack.c.bf16 %v2639_v58, %v2638_v57 }
 0x1c1   : > { %16419 = vmatprep.subr.bf16.mxu1 %v16418_v18 }
 0x1c3   : > { %15192 = vmatmul.mubr.msk.f32.gmra.mrb[2].mxu1 %vm233_vm0, %v17870_v24 }
 0x1c4   : > { %15194 = vmatprep.mubr.msk.f32.mxu1 %vm233_vm0, %v17874_v27 }
 0x1c7   : > { %15195 = vmatmul.mubr.msk.f32.gmra.mrb[4].mxu1 %vm233_vm0, %v17878_v31 }
 0x1c8   : > { %15197 = vmatprep.mubr.msk.f32.mxu1 %vm233_vm0, %v17882_v33 }
 0x1cb   : > { %15198 = vmatmul.mubr.msk.f32.gmra.mrb[6].mxu1 %vm233_vm0, %v17886_v34 }
 0x1cc   : > { %15204 = vmatprep.mubr.msk.f32.mxu1 %vm233_vm0, %v1618_v60  ;;  %v2343_v60 = vld [vmem:[#allocation2 + $0x82] sm:$0xff] }
 0x1cf   : > { %15205 = vmatmul.mubr.msk.f32.vlgmr.msra.gmra.mrb[0].mxu1 %vm233_vm0, %v17839_v61 }
 0x1d0   : > { %16421 = vmatpush3.bf16.msra.mxu1 %v16418_v18  ;;  %15207 = vmatprep.mubr.msk.f32.mxu1 %vm233_vm0, %v17843_v62  ;;  %v16434_v18 = vpack.c.bf16 %v2786_v16, %v2785_v15 }
 0x1d1   : > { %16423 = vmatprep.subr.bf16.mxu1 %v16422_v41 }
 0x1d3   : > { %15208 = vmatmul.mubr.msk.f32.gmra.mrb[2].mxu1 %vm233_vm0, %v17847_v3 }
 0x1d4   : > { %15210 = vmatprep.mubr.msk.f32.mxu1 %vm233_vm0, %v17851_v4 }
 0x1d7   : > { %15211 = vmatmul.mubr.msk.f32.gmra.mrb[4].mxu1 %vm233_vm0, %v17855_v6 }
 0x1d8   : > { %15213 = vmatprep.mubr.msk.f32.mxu1 %vm233_vm0, %v17859_v8 }
 0x1db   : > { %15214 = vmatmul.mubr.msk.f32.gmra.mrb[6].mxu1 %vm233_vm0, %v2049_v43 }
 0x1dc   : > { %15220 = vmatprep.mubr.msk.f32.mxu1 %vm233_vm0, %v17795_v44  ;;  %v2196_v44 = vld [vmem:[#allocation2 + $0x81] sm:$0xff] }
 0x1df   : > { %15221 = vmatmul.mubr.msk.f32.vlgmr.msra.gmra.mrb[0].mxu1 %vm233_vm0, %v17804_v46 }
 0x1e0   : > { %16425 = vmatpush3.bf16.msra.mxu1 %v16422_v41  ;;  %15223 = vmatprep.mubr.msk.f32.mxu1 %vm233_vm0, %v17813_v49 }
 0x1e1   : > { %16427 = vmatprep.subr.bf16.mxu1 %v16426_v56 }
 0x1e3   : > { %15224 = vmatmul.mubr.msk.f32.gmra.mrb[2].mxu1 %vm233_vm0, %v17820_v50 }
 0x1e4   : > { %15226 = vmatprep.mubr.msk.f32.mxu1 %vm233_vm0, %v17824_v51 }
 0x1e7   : > { %15227 = vmatmul.mubr.msk.f32.gmra.mrb[4].mxu1 %vm233_vm0, %v17828_v52 }
 0x1e8   : > { %15229 = vmatprep.mubr.msk.f32.mxu1 %vm233_vm0, %v17832_v53 }
 0x1eb   : > { %15230 = vmatmul.mubr.msk.f32.gmra.mrb[6].mxu1 %vm233_vm0, %v2196_v44 }
 0x1ec   : > { %15236 = vmatprep.mubr.msk.f32.mxu1 %vm233_vm0, %v1896_v19 }
 0x1ef   : > { %15237 = vmatmul.mubr.msk.f32.vlgmr.msra.gmra.mrb[0].mxu1 %vm233_vm0, %v17866_v21 }
 0x1f0   : > { %16429 = vmatpush3.bf16.msra.mxu1 %v16426_v56  ;;  %15239 = vmatprep.mubr.msk.f32.mxu1 %vm233_vm0, %v17870_v24  ;;  %v16446_v56 = vpack.c.bf16 %v3240_v40, %v3239_v35  ;;  %v4307_v40 = vld [vmem:[#allocation4 + $0x1c0] sm:$0xff] }
 0x1f1   : > { %16431 = vmatprep.subr.bf16.mxu1 %v16430_v59 }
 0x1f3   : > { %15240 = vmatmul.mubr.msk.f32.gmra.mrb[2].mxu1 %vm233_vm0, %v17874_v27 }
 0x1f4   : > { %15242 = vmatprep.mubr.msk.f32.mxu1 %vm233_vm0, %v17878_v31 }
 0x1f7   : > { %15243 = vmatmul.mubr.msk.f32.gmra.mrb[4].mxu1 %vm233_vm0, %v17882_v33 }
 0x1f8   : > { %15245 = vmatprep.mubr.msk.f32.mxu1 %vm233_vm0, %v17886_v34 }
 0x1fb   : > { %15246 = vmatmul.mubr.msk.f32.gmra.mrb[6].mxu1 %vm233_vm0, %v2343_v60 }
 0x1fc   : > { %15252 = vmatprep.mubr.msk.f32.mxu1 %vm233_vm0, %v17839_v61 }
 0x1ff   : > { %15253 = vmatmul.mubr.msk.f32.vlgmr.msra.gmra.mrb[0].mxu1 %vm233_vm0, %v17843_v62 }
 0x200   : > { %16433 = vmatpush3.bf16.msra.mxu1 %v16430_v59  ;;  %15255 = vmatprep.mubr.msk.f32.mxu1 %vm233_vm0, %v17847_v3 }
 0x201   : > { %16435 = vmatprep.subr.bf16.mxu1 %v16434_v18 }
 0x203   : > { %15256 = vmatmul.mubr.msk.f32.gmra.mrb[2].mxu1 %vm233_vm0, %v17851_v4 }
 0x204   : > { %15258 = vmatprep.mubr.msk.f32.mxu1 %vm233_vm0, %v17855_v6 }
 0x207   : > { %15259 = vmatmul.mubr.msk.f32.gmra.mrb[4].mxu1 %vm233_vm0, %v17859_v8 }
 0x208   : > { %15261 = vmatprep.mubr.msk.f32.mxu1 %vm233_vm0, %v2049_v43 }
 0x20b   : > { %15262 = vmatmul.mubr.msk.f32.gmra.mrb[6].mxu1 %vm233_vm0, %v17717_v63 }
 0x20c   : > { %15268 = vmatprep.mubr.msk.f32.mxu1 %vm233_vm0, %v17804_v46  ;;  %v2961_v46 = vld [vmem:[#allocation4 + $0x120] sm:$0xff] }
 0x20f   : > { %15269 = vmatmul.mubr.msk.f32.vlgmr.msra.gmra.mrb[0].mxu1 %vm233_vm0, %v17813_v49  ;;  %v2962_v49 = vld [vmem:[#allocation4 + $0x128] sm:$0xff] }
 0x210   : > { %16437 = vmatpush3.bf16.msra.mxu1 %v16434_v18  ;;  %15271 = vmatprep.mubr.msk.f32.mxu1 %vm233_vm0, %v17820_v50  ;;  %v16442_v50 = vpack.c.bf16 %v2962_v49, %v2961_v46 }
 0x212   : > { %16443 = vmatprep.subr.bf16.mxu0 %v16442_v50 }
 0x213   : > { %15272 = vmatmul.mubr.msk.f32.gmra.mrb[2].mxu1 %vm233_vm0, %v17824_v51  ;;  %v13653_v51 = vld [vmem:[%s19468_s3 + $0x1] ss:$0 sm:$0xff] }
 0x214   : > { %15274 = vmatprep.mubr.msk.f32.mxu1 %vm233_vm0, %v17828_v52 }
 0x217   : > { %15275 = vmatmul.mubr.msk.f32.gmra.mrb[4].mxu1 %vm233_vm0, %v17832_v53 }
 0x218   : > { %15277 = vmatprep.mubr.msk.f32.mxu1 %vm233_vm0, %v2196_v44 }
 0x21b   : > { %15278 = vmatmul.mubr.msk.f32.gmra.mrb[6].mxu1 %vm233_vm0, %v17734_v1 }
 0x21c   : > { %15284 = vmatprep.mubr.msk.f32.mxu1 %vm233_vm0, %v17866_v21 }
 0x21f   : > { %15285 = vmatmul.mubr.msk.f32.vlgmr.msra.gmra.mrb[0].mxu1 %vm233_vm0, %v17870_v24 }
 0x220   : > { %15287 = vmatprep.mubr.msk.f32.mxu1 %vm233_vm0, %v17874_v27 }
 0x223   : > { %15288 = vmatmul.mubr.msk.f32.gmra.mrb[2].mxu1 %vm233_vm0, %v17878_v31 }
 0x224   : > { %15290 = vmatprep.mubr.msk.f32.mxu1 %vm233_vm0, %v17882_v33 }
 0x227   : > { %15291 = vmatmul.mubr.msk.f32.gmra.mrb[4].mxu1 %vm233_vm0, %v17886_v34 }
 0x228   : > { %15293 = vmatprep.mubr.msk.f32.mxu1 %vm233_vm0, %v2343_v60 }
 0x22b   : > { %15294 = vmatmul.mubr.msk.f32.gmra.mrb[6].mxu1 %vm233_vm0, %v17751_v2 }
 0x2f2   : > { %v15286_v52 = vpop.f32.mrb[0].mxu1 }
 0x2f3   : > { %v2930_v53 = vadd.f32 %v15286_v52, %v13653_v51  ;;  %v2877_v61 = vpop.f32.mrb[1].mxu1  ;;  %v3386_v52 = vld [vmem:[#allocation4 + $0x150] sm:$0xff] }
 0x2f4   : > { %v2929_v62 = vadd.f32 %v13653_v51, %v2877_v61 }
 0x2f5   : > { %v2938_v3 = vmax.f32 %v2930_v53, 0.0  ;;  %v3387_v53 = vld [vmem:[#allocation4 + $0x158] sm:$0xff] }
 0x2f6   : > { %v2937_v4 = vmax.f32 %v2929_v62, 0.0  ;;  %v15289_v6 = vpop.f32.mrb[2].mxu1  ;;  %v16450_v61 = vpack.c.bf16 %v3387_v53, %v3386_v52  ;;  %v18024_v62 = vld [vmem:[%s227_s20] sm:$0xff]  ;;  %v3827_v52 = vld [vmem:[#allocation4 + $0x180] sm:$0xff]  ;;  %v3828_v53 = vld [vmem:[#allocation4 + $0x188] sm:$0xff] }
 0x2f7   : > { %2946 = vst.msk [vmem:[#allocation2 + $0x21] sm:$0xff] %vm233_vm0, %v2938_v3  ;;  %v2932_v8 = vadd.f32 %v15289_v6, %v13653_v51  ;;  %v2887_v19 = vpop.f32.mrb[3].mxu1  ;;  %v18026_v3 = vld [vmem:[%s227_s20 + $0x8] sm:$0xf]  ;;  %5617 = vst.msk [vmem:[#allocation3 + $0x1] sm:$0xff] %vm233_vm0, %v18024_v62 }
 0x2f8   : > { %2945 = vst.msk [vmem:[#allocation2 + $0x11] sm:$0xff] %vm233_vm0, %v2937_v4  ;;  %v2931_v21 = vadd.f32 %v13653_v51, %v2887_v19 }
 0x2f9   : > { %v2940_v24 = vmax.f32 %v2932_v8, 0.0  ;;  %5619 = vst.msk [vmem:[#allocation3 + $0x9] sm:$0xf] %vm5618_vm3, %v18026_v3 }
 0x2fa   : > { %v2939_v27 = vmax.f32 %v2931_v21, 0.0  ;;  %v15292_v31 = vpop.f32.mrb[4].mxu1  ;;  %5621 = vst.msk [vmem:[#allocation3 - $0x3] sm:$0x8] %vm5620_vm4, %v18026_v3 }
 0x2fb   : > { %2948 = vst.msk [vmem:[#allocation2 + $0x41] sm:$0xff] %vm233_vm0, %v2940_v24  ;;  %v2934_v33 = vadd.f32 %v15292_v31, %v13653_v51  ;;  %v2897_v34 = vpop.f32.mrb[5].mxu1  ;;  %v3534_v31 = vld [vmem:[#allocation4 + $0x168] sm:$0xff] }
 0x2fc   : > { %2947 = vst.msk [vmem:[#allocation2 + $0x31] sm:$0xff] %vm233_vm0, %v2939_v27  ;;  %v2933_v41 = vadd.f32 %v13653_v51, %v2897_v34  ;;  %v3533_v27 = vld [vmem:[#allocation4 + $0x160] sm:$0xff] }
 0x2fd   : > { %v2942_v43 = vmax.f32 %v2934_v33, 0.0  ;;  %5623 = vst.msk [vmem:[#allocation3 + $0xd] sm:$0x1] %vm5622_vm5, %v18024_v62  ;;  %v16454_v33 = vpack.c.bf16 %v3534_v31, %v3533_v27  ;;  %v3975_v27 = vld [vmem:[#allocation4 + $0x198] sm:$0xff] }
 0x2fe   : > { %v2941_v54 = vmax.f32 %v2933_v41, 0.0  ;;  %v15295_v55 = vpop.f32.mrb[6].mxu1  ;;  %v17991_v60 = vld [vmem:[#allocation2 + $0x21] sm:$0xff]  ;;  %v4308_v41 = vld [vmem:[#allocation4 + $0x1c8] sm:$0xff] }
 0x2ff   : > { %2950 = vst.msk [vmem:[#allocation2 + $0x61] sm:$0xff] %vm233_vm0, %v2942_v43  ;;  %v2936_v44 = vadd.f32 %v15295_v55, %v13653_v51  ;;  %v2907_v57 = vpop.f32.mrb[7].mxu1  ;;  %v17986_v58 = vld [vmem:[#allocation2 + $0x11] sm:$0xff]  ;;  %v18064_v35 = vld [vmem:[#allocation2 + $0x22] sm:$0xff]  ;;  %v16474_v43 = vpack.c.bf16 %v4308_v41, %v4307_v40 }
 0x300   : > { %2949 = vst.msk [vmem:[#allocation2 + $0x51] sm:$0xff] %vm233_vm0, %v2941_v54  ;;  %v2935_v59 = vadd.f32 %v13653_v51, %v2907_v57  ;;  %15301 = vmatmul.mubr.msk.f32.vlgmr.msra.gmra.mrb[8].mxu0 %vm233_vm0, %v17986_v58  ;;  %v2954_v4 = vld [vmem:[#allocation2 + $0x10] sm:$0xff]  ;;  %v3680_v57 = vld [vmem:[#allocation4 + $0x170] sm:$0xff]  ;;  %v4122_v40 = vld [vmem:[#allocation4 + $0x1a8] sm:$0xff] }
 0x301   : > { %v2944_v15 = vmax.f32 %v2936_v44, 0.0  ;;  %16445 = vmatpush3.bf16.msra.mxu0 %v16442_v50  ;;  %15303 = vmatprep.mubr.msk.f32.mxu0 %vm233_vm0, %v17991_v60  ;;  %v3232_v34 = vld [vmem:[#allocation2 + $0x12] sm:$0xff] }
 0x302   : > { %v2943_v16 = vmax.f32 %v2935_v59, 0.0  ;;  %16447 = vmatprep.subr.bf16.mxu0 %v16446_v56  ;;  %v18001_v46 = vld [vmem:[#allocation2 + $0x41] sm:$0xff]  ;;  %16475 = vmatprep.subr.bf16.mxu1 %v16474_v43 }
 0x303   : > { %2952 = vst.msk [vmem:[#allocation2 + $0x81] sm:$0xff] %vm233_vm0, %v2944_v15  ;;  %v17996_v18 = vld [vmem:[#allocation2 + $0x31] sm:$0xff]  ;;  %v18045_v8 = vld [vmem:[#allocation2 + $0x40] sm:$0xff]  ;;  %16477 = vmatpush3.bf16.msra.mxu1 %v16474_v43  ;;  %v3681_v59 = vld [vmem:[#allocation4 + $0x178] sm:$0xff] }
 0x304   : > { %2951 = vst.msk [vmem:[#allocation2 + $0x71] sm:$0xff] %vm233_vm0, %v2943_v16  ;;  %15304 = vmatmul.mubr.msk.f32.gmra.mrb[10].mxu0 %vm233_vm0, %v17996_v18  ;;  %v18041_v6 = vld [vmem:[#allocation2 + $0x30] sm:$0xff]  ;;  %v16458_v15 = vpack.c.bf16 %v3681_v59, %v3680_v57  ;;  %v5631_v43 = vld [vmem:[#allocation4 + $0x258] sm:$0xff] }
 0x305   : > { %15306 = vmatprep.mubr.msk.f32.mxu0 %vm233_vm0, %v18001_v46  ;;  %v18068_v54 = vld [vmem:[#allocation2 + $0x32] sm:$0xff] }
 0x306   : > { %v18009_v50 = vld [vmem:[#allocation2 + $0x61] sm:$0xff] }
 0x307   : > { %v18005_v49 = vld [vmem:[#allocation2 + $0x51] sm:$0xff]  ;;  %v18053_v21 = vld [vmem:[#allocation2 + $0x60] sm:$0xff] }
 0x308   : > { %15307 = vmatmul.mubr.msk.f32.gmra.mrb[12].mxu0 %vm233_vm0, %v18005_v49  ;;  %v18049_v19 = vld [vmem:[#allocation2 + $0x50] sm:$0xff] }
 0x309   : > { %15309 = vmatprep.mubr.msk.f32.mxu0 %vm233_vm0, %v18009_v50  ;;  %v18076_v55 = vld [vmem:[#allocation2 + $0x52] sm:$0xff] }
 0x30a   : > { %v3385_v16 = vld [vmem:[#allocation2 + $0x80] sm:$0xff] }
 0x30b   : > { %v18013_v51 = vld [vmem:[#allocation2 + $0x71] sm:$0xff] }
 0x30c   : > { %15310 = vmatmul.mubr.msk.f32.gmra.mrb[14].mxu0 %vm233_vm0, %v18013_v51  ;;  %v18057_v24 = vld [vmem:[#allocation2 + $0x70] sm:$0xff] }
 0x30d   : > { %15316 = vmatprep.mubr.msk.f32.mxu0 %vm233_vm0, %v17601_v26  ;;  %v18037_v26 = vld [vmem:[#allocation2 + $0x20] sm:$0xff]  ;;  %v18084_v44 = vld [vmem:[#allocation2 + $0x72] sm:$0xff] }
 0x310   : > { %15317 = vmatmul.mubr.msk.f32.vlgmr.msra.gmra.mrb[8].mxu0 %vm233_vm0, %v2954_v4 }
 0x311   : > { %16449 = vmatpush3.bf16.msra.mxu0 %v16446_v56  ;;  %15319 = vmatprep.mubr.msk.f32.mxu0 %vm233_vm0, %v18037_v26  ;;  %v18080_v56 = vld [vmem:[#allocation2 + $0x62] sm:$0xff] }
 0x312   : > { %16451 = vmatprep.subr.bf16.mxu0 %v16450_v61 }
 0x314   : > { %15320 = vmatmul.mubr.msk.f32.gmra.mrb[10].mxu0 %vm233_vm0, %v18041_v6 }
 0x315   : > { %15322 = vmatprep.mubr.msk.f32.mxu0 %vm233_vm0, %v18045_v8 }
 0x318   : > { %15323 = vmatmul.mubr.msk.f32.gmra.mrb[12].mxu0 %vm233_vm0, %v18049_v19 }
 0x319   : > { %15325 = vmatprep.mubr.msk.f32.mxu0 %vm233_vm0, %v18053_v21 }
 0x31c   : > { %15326 = vmatmul.mubr.msk.f32.gmra.mrb[14].mxu0 %vm233_vm0, %v18057_v24 }
 0x31d   : > { %15332 = vmatprep.mubr.msk.f32.mxu0 %vm233_vm0, %v17630_v37  ;;  %v18072_v37 = vld [vmem:[#allocation2 + $0x42] sm:$0xff] }
 0x320   : > { %15333 = vmatmul.mubr.msk.f32.vlgmr.msra.gmra.mrb[8].mxu0 %vm233_vm0, %v3232_v34 }
 0x321   : > { %16453 = vmatpush3.bf16.msra.mxu0 %v16450_v61  ;;  %15335 = vmatprep.mubr.msk.f32.mxu0 %vm233_vm0, %v18064_v35  ;;  %v16462_v61 = vpack.c.bf16 %v3828_v53, %v3827_v52 }
 0x322   : > { %16455 = vmatprep.subr.bf16.mxu0 %v16454_v33 }
 0x324   : > { %15336 = vmatmul.mubr.msk.f32.gmra.mrb[10].mxu0 %vm233_vm0, %v18068_v54 }
 0x325   : > { %15338 = vmatprep.mubr.msk.f32.mxu0 %vm233_vm0, %v18072_v37 }
 0x328   : > { %15339 = vmatmul.mubr.msk.f32.gmra.mrb[12].mxu0 %vm233_vm0, %v18076_v55 }
 0x329   : > { %15341 = vmatprep.mubr.msk.f32.mxu0 %vm233_vm0, %v18080_v56 }
 0x32c   : > { %15342 = vmatmul.mubr.msk.f32.gmra.mrb[14].mxu0 %vm233_vm0, %v18084_v44 }
 0x32d   : > { %15348 = vmatprep.mubr.msk.f32.mxu0 %vm233_vm0, %v2954_v4  ;;  %v3974_v4 = vld [vmem:[#allocation4 + $0x190] sm:$0xff] }
 0x32e   : > { %v16466_v31 = vpack.c.bf16 %v3975_v27, %v3974_v4 }
 0x330   : > { %15349 = vmatmul.mubr.msk.f32.vlgmr.msra.gmra.mrb[8].mxu0 %vm233_vm0, %v18037_v26 }
 0x331   : > { %16457 = vmatpush3.bf16.msra.mxu0 %v16454_v33  ;;  %15351 = vmatprep.mubr.msk.f32.mxu0 %vm233_vm0, %v18041_v6  ;;  %v3679_v33 = vld [vmem:[#allocation2 + $0x82] sm:$0xff] }
 0x332   : > { %16459 = vmatprep.subr.bf16.mxu0 %v16458_v15 }
 0x334   : > { %15352 = vmatmul.mubr.msk.f32.gmra.mrb[10].mxu0 %vm233_vm0, %v18045_v8 }
 0x335   : > { %15354 = vmatprep.mubr.msk.f32.mxu0 %vm233_vm0, %v18049_v19 }
 0x338   : > { %15355 = vmatmul.mubr.msk.f32.gmra.mrb[12].mxu0 %vm233_vm0, %v18053_v21 }
 0x339   : > { %15357 = vmatprep.mubr.msk.f32.mxu0 %vm233_vm0, %v18057_v24 }
 0x33c   : > { %15358 = vmatmul.mubr.msk.f32.gmra.mrb[14].mxu0 %vm233_vm0, %v3385_v16 }
 0x33d   : > { %15364 = vmatprep.mubr.msk.f32.mxu0 %vm233_vm0, %v17986_v58  ;;  %v3532_v58 = vld [vmem:[#allocation2 + $0x81] sm:$0xff] }
 0x340   : > { %15365 = vmatmul.mubr.msk.f32.vlgmr.msra.gmra.mrb[8].mxu0 %vm233_vm0, %v17991_v60 }
 0x341   : > { %16461 = vmatpush3.bf16.msra.mxu0 %v16458_v15  ;;  %15367 = vmatprep.mubr.msk.f32.mxu0 %vm233_vm0, %v17996_v18 }
 0x342   : > { %16463 = vmatprep.subr.bf16.mxu0 %v16462_v61 }
 0x344   : > { %15368 = vmatmul.mubr.msk.f32.gmra.mrb[10].mxu0 %vm233_vm0, %v18001_v46 }
 0x345   : > { %15370 = vmatprep.mubr.msk.f32.mxu0 %vm233_vm0, %v18005_v49 }
 0x348   : > { %15371 = vmatmul.mubr.msk.f32.gmra.mrb[12].mxu0 %vm233_vm0, %v18009_v50 }
 0x349   : > { %15373 = vmatprep.mubr.msk.f32.mxu0 %vm233_vm0, %v18013_v51 }
 0x34c   : > { %15374 = vmatmul.mubr.msk.f32.gmra.mrb[14].mxu0 %vm233_vm0, %v3532_v58 }
 0x34d   : > { %15380 = vmatprep.mubr.msk.f32.mxu0 %vm233_vm0, %v3232_v34  ;;  %v4121_v34 = vld [vmem:[#allocation4 + $0x1a0] sm:$0xff] }
 0x34e   : > { %v16470_v41 = vpack.c.bf16 %v4122_v40, %v4121_v34 }
 0x350   : > { %15381 = vmatmul.mubr.msk.f32.vlgmr.msra.gmra.mrb[8].mxu0 %vm233_vm0, %v18064_v35 }
 0x351   : > { %16465 = vmatpush3.bf16.msra.mxu0 %v16462_v61  ;;  %15383 = vmatprep.mubr.msk.f32.mxu0 %vm233_vm0, %v18068_v54 }
 0x352   : > { %16467 = vmatprep.subr.bf16.mxu0 %v16466_v31 }
 0x354   : > { %15384 = vmatmul.mubr.msk.f32.gmra.mrb[10].mxu0 %vm233_vm0, %v18072_v37 }
 0x355   : > { %15386 = vmatprep.mubr.msk.f32.mxu0 %vm233_vm0, %v18076_v55 }
 0x358   : > { %15387 = vmatmul.mubr.msk.f32.gmra.mrb[12].mxu0 %vm233_vm0, %v18080_v56 }
 0x359   : > { %15389 = vmatprep.mubr.msk.f32.mxu0 %vm233_vm0, %v18084_v44 }
 0x35c   : > { %15390 = vmatmul.mubr.msk.f32.gmra.mrb[14].mxu0 %vm233_vm0, %v3679_v33 }
 0x35d   : > { %15396 = vmatprep.mubr.msk.f32.mxu0 %vm233_vm0, %v18037_v26  ;;  %v5630_v26 = vld [vmem:[#allocation4 + $0x250] sm:$0xff] }
 0x360   : > { %15397 = vmatmul.mubr.msk.f32.vlgmr.msra.gmra.mrb[8].mxu0 %vm233_vm0, %v18041_v6  ;;  %v16510_v6 = vpack.c.bf16 %v5631_v43, %v5630_v26 }
 0x361   : > { %16469 = vmatpush3.bf16.msra.mxu0 %v16466_v31  ;;  %15399 = vmatprep.mubr.msk.f32.mxu0 %vm233_vm0, %v18045_v8 }
 0x362   : > { %16471 = vmatprep.subr.bf16.mxu0 %v16470_v41 }
 0x364   : > { %15400 = vmatmul.mubr.msk.f32.gmra.mrb[10].mxu0 %vm233_vm0, %v18049_v19  ;;  %v5625_v19 = vld [vmem:[#allocation3 + $0x8] sm:$0xf] }
 0x365   : > { %15402 = vmatprep.mubr.msk.f32.mxu0 %vm233_vm0, %v18053_v21  ;;  %v5794_v21 = vld [vmem:[#allocation3 + $0x2] sm:$0xff] }
 0x368   : > { %15403 = vmatmul.mubr.msk.f32.gmra.mrb[12].mxu0 %vm233_vm0, %v18057_v24  ;;  %v5795_v24 = vld [vmem:[#allocation3 + $0xa] sm:$0xf] }
 0x369   : > { %15405 = vmatprep.mubr.msk.f32.mxu0 %vm233_vm0, %v3385_v16 }
 0x36c   : > { %15406 = vmatmul.mubr.msk.f32.gmra.mrb[14].mxu0 %vm233_vm0, %v17717_v63  ;;  %v5626_v63 = vld [vmem:[#allocation4 + $0x240] sm:$0xff] }
 0x36d   : > { %15412 = vmatprep.mubr.msk.f32.mxu0 %vm233_vm0, %v17991_v60  ;;  %v5627_v60 = vld [vmem:[#allocation4 + $0x248] sm:$0xff] }
 0x370   : > { %15413 = vmatmul.mubr.msk.f32.vlgmr.msra.gmra.mrb[8].mxu0 %vm233_vm0, %v17996_v18  ;;  %v16514_v18 = vpack.c.bf16 %v5627_v60, %v5626_v63  ;;  %v4723_v63 = vld [vmem:[#allocation4 + $0x1e8] sm:$0xff] }
 0x371   : > { %16473 = vmatpush3.bf16.msra.mxu0 %v16470_v41  ;;  %15415 = vmatprep.mubr.msk.f32.mxu0 %vm233_vm0, %v18001_v46  ;;  %v5796_v46 = vld [vmem:[#allocation4 + $0x260] sm:$0xff] }
 0x372   : > { %16511 = vmatprep.subr.bf16.mxu0 %v16510_v6 }
 0x374   : > { %15416 = vmatmul.mubr.msk.f32.gmra.mrb[10].mxu0 %vm233_vm0, %v18005_v49  ;;  %v5797_v49 = vld [vmem:[#allocation4 + $0x268] sm:$0xff] }
 0x375   : > { %15418 = vmatprep.mubr.msk.f32.mxu0 %vm233_vm0, %v18009_v50  ;;  %v5629_v50 = vld [vmem:[#allocation3 + $0x9] sm:$0xf]  ;;  %v16518_v8 = vpack.c.bf16 %v5797_v49, %v5796_v46  ;;  %v13806_v46 = vld [vmem:[%s19468_s3 + $0x4] ss:$0 sm:$0xff] }
 0x378   : > { %15419 = vmatmul.mubr.msk.f32.gmra.mrb[12].mxu0 %vm233_vm0, %v18013_v51  ;;  %v5624_v51 = vld [vmem:[#allocation3] sm:$0xff] }
 0x379   : > { %15421 = vmatprep.mubr.msk.f32.mxu0 %vm233_vm0, %v3532_v58 }
 0x37c   : > { %15422 = vmatmul.mubr.msk.f32.gmra.mrb[14].mxu0 %vm233_vm0, %v17734_v1  ;;  %v5628_v1 = vld [vmem:[#allocation3 + $0x1] sm:$0xff] }
 0x37d   : > { %15428 = vmatprep.mubr.msk.f32.mxu0 %vm233_vm0, %v18064_v35  ;;  %v4297_v35 = vld [vmem:[#allocation4 + $0x1b0] sm:$0xff] }
 0x380   : > { %15429 = vmatmul.mubr.msk.f32.vlgmr.msra.gmra.mrb[8].mxu0 %vm233_vm0, %v18068_v54  ;;  %v4298_v54 = vld [vmem:[#allocation4 + $0x1b8] sm:$0xff] }
 0x381   : > { %15431 = vmatprep.mubr.msk.f32.mxu0 %vm233_vm0, %v18072_v37  ;;  %16513 = vmatpush3.bf16.msra.mxu0 %v16510_v6  ;;  %v16478_v37 = vpack.c.bf16 %v4298_v54, %v4297_v35  ;;  %v4722_v6 = vld [vmem:[#allocation4 + $0x1e0] sm:$0xff] }
 0x382   : > { %16515 = vmatprep.subr.bf16.mxu0 %v16514_v18  ;;  %v16486_v60 = vpack.c.bf16 %v4723_v63, %v4722_v6  ;;  %v5901_v6 = vld [vmem:[#allocation4 + $0x288] sm:$0xff] }
 0x383   : > { %16479 = vmatprep.subr.bf16.mxu1 %v16478_v37 }
 0x384   : > { %15432 = vmatmul.mubr.msk.f32.gmra.mrb[10].mxu0 %vm233_vm0, %v18076_v55  ;;  %v13726_v55 = vld [vmem:[%s19468_s3 + $0x2] ss:$0 sm:$0xff] }
 0x385   : > { %15434 = vmatprep.mubr.msk.f32.mxu0 %vm233_vm0, %v18080_v56 }
 0x388   : > { %15435 = vmatmul.mubr.msk.f32.gmra.mrb[12].mxu0 %vm233_vm0, %v18084_v44 }
 0x389   : > { %15437 = vmatprep.mubr.msk.f32.mxu0 %vm233_vm0, %v3679_v33 }
 0x38c   : > { %15438 = vmatmul.mubr.msk.f32.gmra.mrb[14].mxu0 %vm233_vm0, %v17751_v2  ;;  %v18182_v2 = vld [vmem:[#allocation2 + $0x1] sm:$0xff] }
 0x38d   : > { %15588 = vmatprep.mubr.msk.f32.mxu0 %vm233_vm0, %v5628_v1  ;;  %15444 = vmatprep.mubr.msk.f32.mxu1 %vm233_vm0, %v18182_v2 }
 0x390   : > { %15589 = vmatmul.mubr.msk.f32.vlgmr.msra.gmra.mrb[16].mxu0 %vm233_vm0, %v5629_v50 }
 0x391   : > { %16517 = vmatpush3.bf16.msra.mxu0 %v16514_v18  ;;  %15595 = vmatprep.mubr.msk.f32.mxu0 %vm233_vm0, %v5624_v51 }
 0x392   : > { %16519 = vmatprep.subr.bf16.mxu0 %v16518_v8 }
 0x398   : > { %15596 = vmatmul.mubr.msk.f32.vlgmr.msra.gmra.mrb[16].mxu0 %vm233_vm0, %v5625_v19 }
 0x399   : > { %16521 = vmatpush3.bf16.msra.mxu0 %v16518_v8  ;;  %15602 = vmatprep.mubr.msk.f32.mxu0 %vm233_vm0, %v5794_v21 }
 0x3a0   : > { %15603 = vmatmul.mubr.msk.f32.vlgmr.msra.gmra.mrb[16].mxu0 %vm233_vm0, %v5795_v24 }
 0x453   : > { %v15430_v56 = vpop.f32.mrb[8].mxu0 }
 0x454   : > { %v4266_v44 = vadd.f32 %v15430_v56, %v13726_v55  ;;  %v4213_v57 = vpop.f32.mrb[9].mxu0 }
 0x455   : > { %v4265_v59 = vadd.f32 %v13726_v55, %v4213_v57  ;;  %v4870_v57 = vld [vmem:[#allocation4 + $0x1f8] sm:$0xff] }
 0x456   : > { %v4274_v15 = vadd.f32 %v4266_v44, %v1602_v5  ;;  %v4575_v5 = vld [vmem:[#allocation4 + $0x1d0] sm:$0xff] }
 0x457   : > { %v4273_v16 = vadd.f32 %v4265_v59, %v1601_v23  ;;  %v15433_v52 = vpop.f32.mrb[10].mxu0  ;;  %v4576_v23 = vld [vmem:[#allocation4 + $0x1d8] sm:$0xff]  ;;  %v4869_v44 = vld [vmem:[#allocation4 + $0x1f0] sm:$0xff] }
 0x458   : > { %4282 = vst.msk [vmem:[#allocation2 + $0x21] sm:$0xff] %vm233_vm0, %v4274_v15  ;;  %v4268_v53 = vadd.f32 %v15433_v52, %v13726_v55  ;;  %v4223_v61 = vpop.f32.mrb[11].mxu0  ;;  %v16482_v40 = vpack.c.bf16 %v4576_v23, %v4575_v5  ;;  %v16490_v59 = vpack.c.bf16 %v4870_v57, %v4869_v44  ;;  %v5163_v5 = vld [vmem:[#allocation4 + $0x210] sm:$0xff]  ;;  %v5164_v23 = vld [vmem:[#allocation4 + $0x218] sm:$0xff] }
 0x459   : > { %4281 = vst.msk [vmem:[#allocation2 + $0x11] sm:$0xff] %vm233_vm0, %v4273_v16  ;;  %v4267_v58 = vadd.f32 %v13726_v55, %v4223_v61  ;;  %v13799_v57 = vld [vmem:[%s19468_s3 + $0x3] ss:$0 sm:$0xff] }
 0x45a   : > { %v4276_v4 = vadd.f32 %v4268_v53, %v1604_v29 }
 0x45b   : > { %v4275_v27 = vadd.f32 %v4267_v58, %v1603_v30  ;;  %v15436_v31 = vpop.f32.mrb[12].mxu0 }
 0x45c   : > { %4284 = vst.msk [vmem:[#allocation2 + $0x41] sm:$0xff] %vm233_vm0, %v4276_v4  ;;  %v4270_v20 = vadd.f32 %v15436_v31, %v13726_v55  ;;  %v4233_v22 = vpop.f32.mrb[13].mxu0  ;;  %v5017_v31 = vld [vmem:[#allocation4 + $0x208] sm:$0xff] }
 0x45d   : > { %4283 = vst.msk [vmem:[#allocation2 + $0x31] sm:$0xff] %vm233_vm0, %v4275_v27  ;;  %v4269_v33 = vadd.f32 %v13726_v55, %v4233_v22  ;;  %v5016_v27 = vld [vmem:[#allocation4 + $0x200] sm:$0xff] }
 0x45e   : > { %v4278_v34 = vadd.f32 %v4270_v20, %v1606_v38  ;;  %v16494_v20 = vpack.c.bf16 %v5017_v31, %v5016_v27 }
 0x45f   : > { %v4277_v25 = vadd.f32 %v4269_v33, %v1605_v39  ;;  %v15439_v29 = vpop.f32.mrb[14].mxu0  ;;  %v18211_v43 = vld [vmem:[#allocation2 + $0x21] sm:$0xff]  ;;  %v16498_v33 = vpack.c.bf16 %v5164_v23, %v5163_v5 }
 0x460   : > { %4286 = vst.msk [vmem:[#allocation2 + $0x61] sm:$0xff] %vm233_vm0, %v4278_v34  ;;  %v4272_v28 = vadd.f32 %v15439_v29, %v13726_v55  ;;  %v4243_v30 = vpop.f32.mrb[15].mxu0  ;;  %v18206_v41 = vld [vmem:[#allocation2 + $0x11] sm:$0xff]  ;;  %v18246_v1 = vld [vmem:[#allocation2 + $0x20] sm:$0xff] }
 0x461   : > { %4285 = vst.msk [vmem:[#allocation2 + $0x51] sm:$0xff] %vm233_vm0, %v4277_v25  ;;  %v4271_v26 = vadd.f32 %v13726_v55, %v4243_v30  ;;  %15445 = vmatmul.mubr.msk.f32.vlgmr.msra.gmra.mrb[8].mxu1 %vm233_vm0, %v18206_v41  ;;  %v4290_v18 = vld [vmem:[#allocation2 + $0x10] sm:$0xff]  ;;  %v18281_v55 = vld [vmem:[#allocation2 + $0x2] sm:$0xff]  ;;  %v5311_v29 = vld [vmem:[#allocation4 + $0x228] sm:$0xff] }
 0x462   : > { %v4280_v32 = vadd.f32 %v4272_v28, %v1608_v47  ;;  %16481 = vmatpush3.bf16.msra.mxu1 %v16478_v37  ;;  %15447 = vmatprep.mubr.msk.f32.mxu1 %vm233_vm0, %v18211_v43  ;;  %v18237_v47 = vld [vmem:[#allocation2] sm:$0xff]  ;;  %v4568_v15 = vld [vmem:[#allocation2 + $0x12] sm:$0xff] }
 0x463   : > { %v4279_v36 = vadd.f32 %v4271_v26, %v1607_v48  ;;  %16483 = vmatprep.subr.bf16.mxu1 %v16482_v40  ;;  %v18225_v39 = vld [vmem:[#allocation2 + $0x41] sm:$0xff]  ;;  %v5310_v25 = vld [vmem:[#allocation4 + $0x220] sm:$0xff] }
 0x464   : > { %4288 = vst.msk [vmem:[#allocation2 + $0x81] sm:$0xff] %vm233_vm0, %v4280_v32  ;;  %v18220_v38 = vld [vmem:[#allocation2 + $0x31] sm:$0xff]  ;;  %v18257_v19 = vld [vmem:[#allocation2 + $0x40] sm:$0xff] }
 0x465   : > { %4287 = vst.msk [vmem:[#allocation2 + $0x71] sm:$0xff] %vm233_vm0, %v4279_v36  ;;  %15448 = vmatmul.mubr.msk.f32.gmra.mrb[10].mxu1 %vm233_vm0, %v18220_v38  ;;  %v18253_v50 = vld [vmem:[#allocation2 + $0x30] sm:$0xff]  ;;  %v18290_v16 = vld [vmem:[#allocation2 + $0x22] sm:$0xff] }
 0x466   : > { %15450 = vmatprep.mubr.msk.f32.mxu1 %vm233_vm0, %v18225_v39  ;;  %v18294_v52 = vld [vmem:[#allocation2 + $0x32] sm:$0xff]  ;;  %v18298_v53 = vld [vmem:[#allocation2 + $0x42] sm:$0xff] }
 0x467   : > { %v18233_v45 = vld [vmem:[#allocation2 + $0x61] sm:$0xff]  ;;  %v18370_v32 = vld [vmem:[#allocation2 + $0x90] sm:$0xff] }
 0x468   : > { %v18229_v42 = vld [vmem:[#allocation2 + $0x51] sm:$0xff]  ;;  %v18273_v37 = vld [vmem:[#allocation2 + $0x60] sm:$0xff] }
 0x469   : > { %15451 = vmatmul.mubr.msk.f32.gmra.mrb[12].mxu1 %vm233_vm0, %v18229_v42  ;;  %v18265_v54 = vld [vmem:[#allocation2 + $0x50] sm:$0xff]  ;;  %v18306_v58 = vld [vmem:[#allocation2 + $0x62] sm:$0xff] }
 0x46a   : > { %15453 = vmatprep.mubr.msk.f32.mxu1 %vm233_vm0, %v18233_v45  ;;  %v18302_v61 = vld [vmem:[#allocation2 + $0x52] sm:$0xff]  ;;  %v5457_v30 = vld [vmem:[#allocation4 + $0x230] sm:$0xff] }
 0x46b   : > { %v4721_v22 = vld [vmem:[#allocation2 + $0x80] sm:$0xff]  ;;  %v5900_v36 = vld [vmem:[#allocation4 + $0x280] sm:$0xff] }
 0x46c   : > { %v18239_v48 = vld [vmem:[#allocation2 + $0x71] sm:$0xff]  ;;  %v4868_v34 = vld [vmem:[#allocation2 + $0x81] sm:$0xff]  ;;  %v16522_v63 = vpack.c.bf16 %v5901_v6, %v5900_v36 }
 0x46d   : > { %15454 = vmatmul.mubr.msk.f32.gmra.mrb[14].mxu1 %vm233_vm0, %v18239_v48  ;;  %v18283_v56 = vld [vmem:[#allocation2 + $0x70] sm:$0xff]  ;;  %v5015_v28 = vld [vmem:[#allocation2 + $0x82] sm:$0xff]  ;;  %v6337_v6 = vld [vmem:[#allocation4 + $0x2c8] sm:$0xff] }
 0x46e   : > { %15460 = vmatprep.mubr.msk.f32.mxu1 %vm233_vm0, %v18237_v47  ;;  %v18310_v4 = vld [vmem:[#allocation2 + $0x72] sm:$0xff] }
 0x471   : > { %15461 = vmatmul.mubr.msk.f32.vlgmr.msra.gmra.mrb[8].mxu1 %vm233_vm0, %v4290_v18 }
 0x472   : > { %16485 = vmatpush3.bf16.msra.mxu1 %v16482_v40  ;;  %15463 = vmatprep.mubr.msk.f32.mxu1 %vm233_vm0, %v18246_v1  ;;  %v16502_v40 = vpack.c.bf16 %v5311_v29, %v5310_v25 }
 0x473   : > { %16487 = vmatprep.subr.bf16.mxu1 %v16486_v60  ;;  %v15604_v49 = vpop.f32.mrb[16].mxu0 }
 0x474   : > { %v5887_v51 = vadd.f32 %v15604_v49, %v13806_v46  ;;  %v5870_v8 = vpop.f32.mrb[17].mxu0 }
 0x475   : > { %15464 = vmatmul.mubr.msk.f32.gmra.mrb[10].mxu1 %vm233_vm0, %v18253_v50  ;;  %v5886_v21 = vadd.f32 %v13806_v46, %v5870_v8 }
 0x476   : > { %15466 = vmatprep.mubr.msk.f32.mxu1 %vm233_vm0, %v18257_v19  ;;  %v18261_v24 = vmax.f32 %v5887_v51, 0.0 }
 0x477   : > { %v18263_v35 = vmax.f32 %v5886_v21, 0.0  ;;  %v6171_v21 = vld [vmem:[#allocation4 + $0x2b8] sm:$0xff] }
 0x478   : > { %5891 = vst.msk [vmem:[#allocation3 + $0x9] sm:$0xf] %vm5618_vm3, %v18261_v24 }
 0x479   : > { %5892 = vst.msk [vmem:[#allocation3 - $0x3] sm:$0x8] %vm5620_vm4, %v18261_v24  ;;  %15467 = vmatmul.mubr.msk.f32.gmra.mrb[12].mxu1 %vm233_vm0, %v18265_v54 }
 0x47a   : > { %5890 = vst.msk [vmem:[#allocation3 + $0x1] sm:$0xff] %vm233_vm0, %v18263_v35  ;;  %15469 = vmatprep.mubr.msk.f32.mxu1 %vm233_vm0, %v18273_v37 }
 0x47b   : > { %5893 = vst.msk [vmem:[#allocation3 + $0xd] sm:$0x1] %vm5622_vm5, %v18263_v35 }
 0x47d   : > { %15470 = vmatmul.mubr.msk.f32.gmra.mrb[14].mxu1 %vm233_vm0, %v18283_v56 }
 0x47e   : > { %15476 = vmatprep.mubr.msk.f32.mxu1 %vm233_vm0, %v18281_v55 }
 0x47f   : > { %v5899_v46 = vld [vmem:[#allocation3 + $0x9] sm:$0xf] }
 0x481   : > { %15477 = vmatmul.mubr.msk.f32.vlgmr.msra.gmra.mrb[8].mxu1 %vm233_vm0, %v4568_v15  ;;  %v5894_v49 = vld [vmem:[#allocation3] sm:$0xff] }
 0x482   : > { %16489 = vmatpush3.bf16.msra.mxu1 %v16486_v60  ;;  %15479 = vmatprep.mubr.msk.f32.mxu1 %vm233_vm0, %v18290_v16  ;;  %v5896_v60 = vld [vmem:[#allocation4 + $0x270] sm:$0xff]  ;;  %v6065_v8 = vld [vmem:[#allocation3 + $0xa] sm:$0xf] }
 0x483   : > { %16491 = vmatprep.subr.bf16.mxu1 %v16490_v59  ;;  %v6064_v51 = vld [vmem:[#allocation3 + $0x2] sm:$0xff] }
 0x485   : > { %15480 = vmatmul.mubr.msk.f32.gmra.mrb[10].mxu1 %vm233_vm0, %v18294_v52 }
 0x486   : > { %15482 = vmatprep.mubr.msk.f32.mxu1 %vm233_vm0, %v18298_v53 }
 0x489   : > { %15483 = vmatmul.mubr.msk.f32.gmra.mrb[12].mxu1 %vm233_vm0, %v18302_v61 }
 0x48a   : > { %15485 = vmatprep.mubr.msk.f32.mxu1 %vm233_vm0, %v18306_v58 }
 0x48d   : > { %15486 = vmatmul.mubr.msk.f32.gmra.mrb[14].mxu1 %vm233_vm0, %v18310_v4 }
 0x48e   : > { %15492 = vmatprep.mubr.msk.f32.mxu1 %vm233_vm0, %v4290_v18  ;;  %v5898_v18 = vld [vmem:[#allocation3 + $0x1] sm:$0xff] }
 0x491   : > { %15493 = vmatmul.mubr.msk.f32.vlgmr.msra.gmra.mrb[8].mxu1 %vm233_vm0, %v18246_v1 }
 0x492   : > { %16493 = vmatpush3.bf16.msra.mxu1 %v16490_v59  ;;  %15495 = vmatprep.mubr.msk.f32.mxu1 %vm233_vm0, %v18253_v50 }
 0x493   : > { %16495 = vmatprep.subr.bf16.mxu1 %v16494_v20 }
 0x495   : > { %15496 = vmatmul.mubr.msk.f32.gmra.mrb[10].mxu1 %vm233_vm0, %v18257_v19 }
 0x496   : > { %15498 = vmatprep.mubr.msk.f32.mxu1 %vm233_vm0, %v18265_v54 }
 0x499   : > { %15499 = vmatmul.mubr.msk.f32.gmra.mrb[12].mxu1 %vm233_vm0, %v18273_v37 }
 0x49a   : > { %15501 = vmatprep.mubr.msk.f32.mxu1 %vm233_vm0, %v18283_v56 }
 0x49d   : > { %15502 = vmatmul.mubr.msk.f32.gmra.mrb[14].mxu1 %vm233_vm0, %v4721_v22 }
 0x49e   : > { %15508 = vmatprep.mubr.msk.f32.mxu1 %vm233_vm0, %v18206_v41  ;;  %v5458_v41 = vld [vmem:[#allocation4 + $0x238] sm:$0xff] }
 0x49f   : > { %v16506_v26 = vpack.c.bf16 %v5458_v41, %v5457_v30 }
 0x4a1   : > { %15509 = vmatmul.mubr.msk.f32.vlgmr.msra.gmra.mrb[8].mxu1 %vm233_vm0, %v18211_v43 }
 0x4a2   : > { %16497 = vmatpush3.bf16.msra.mxu1 %v16494_v20  ;;  %15511 = vmatprep.mubr.msk.f32.mxu1 %vm233_vm0, %v18220_v38 }
 0x4a3   : > { %16499 = vmatprep.subr.bf16.mxu1 %v16498_v33 }
 0x4a5   : > { %15512 = vmatmul.mubr.msk.f32.gmra.mrb[10].mxu1 %vm233_vm0, %v18225_v39 }
 0x4a6   : > { %15514 = vmatprep.mubr.msk.f32.mxu1 %vm233_vm0, %v18229_v42 }
 0x4a9   : > { %15515 = vmatmul.mubr.msk.f32.gmra.mrb[12].mxu1 %vm233_vm0, %v18233_v45 }
 0x4aa   : > { %15517 = vmatprep.mubr.msk.f32.mxu1 %vm233_vm0, %v18239_v48 }
 0x4ad   : > { %15518 = vmatmul.mubr.msk.f32.gmra.mrb[14].mxu1 %vm233_vm0, %v4868_v34 }
 0x4ae   : > { %15524 = vmatprep.mubr.msk.f32.mxu1 %vm233_vm0, %v4568_v15 }
 0x4b1   : > { %15525 = vmatmul.mubr.msk.f32.vlgmr.msra.gmra.mrb[8].mxu1 %vm233_vm0, %v18290_v16 }
 0x4b2   : > { %16501 = vmatpush3.bf16.msra.mxu1 %v16498_v33  ;;  %15527 = vmatprep.mubr.msk.f32.mxu1 %vm233_vm0, %v18294_v52 }
 0x4b3   : > { %16503 = vmatprep.subr.bf16.mxu1 %v16502_v40 }
 0x4b5   : > { %15528 = vmatmul.mubr.msk.f32.gmra.mrb[10].mxu1 %vm233_vm0, %v18298_v53 }
 0x4b6   : > { %15530 = vmatprep.mubr.msk.f32.mxu1 %vm233_vm0, %v18302_v61 }
 0x4b9   : > { %15531 = vmatmul.mubr.msk.f32.gmra.mrb[12].mxu1 %vm233_vm0, %v18306_v58 }
 0x4ba   : > { %15533 = vmatprep.mubr.msk.f32.mxu1 %vm233_vm0, %v18310_v4 }
 0x4bd   : > { %15534 = vmatmul.mubr.msk.f32.gmra.mrb[14].mxu1 %vm233_vm0, %v5015_v28 }
 0x4be   : > { %15540 = vmatprep.mubr.msk.f32.mxu1 %vm233_vm0, %v18246_v1 }
 0x4c1   : > { %15541 = vmatmul.mubr.msk.f32.vlgmr.msra.gmra.mrb[8].mxu1 %vm233_vm0, %v18253_v50  ;;  %v5895_v50 = vld [vmem:[#allocation3 + $0x8] sm:$0xf] }
 0x4c2   : > { %16505 = vmatpush3.bf16.msra.mxu1 %v16502_v40  ;;  %15543 = vmatprep.mubr.msk.f32.mxu1 %vm233_vm0, %v18257_v19  ;;  %v6170_v19 = vld [vmem:[#allocation4 + $0x2b0] sm:$0xff] }
 0x4c3   : > { %16507 = vmatprep.subr.bf16.mxu1 %v16506_v26 }
 0x4c5   : > { %15544 = vmatmul.mubr.msk.f32.gmra.mrb[10].mxu1 %vm233_vm0, %v18265_v54  ;;  %v16534_v54 = vpack.c.bf16 %v6171_v21, %v6170_v19  ;;  %v6994_v19 = vld [vmem:[#allocation4 + $0x320] sm:$0xff]  ;;  %v6995_v21 = vld [vmem:[#allocation4 + $0x328] sm:$0xff] }
 0x4c6   : > { %15546 = vmatprep.mubr.msk.f32.mxu1 %vm233_vm0, %v18273_v37  ;;  %v6166_v37 = vld [vmem:[#allocation4 + $0x2a0] sm:$0xff] }
 0x4c7   : > { %16535 = vmatprep.subr.bf16.mxu0 %v16534_v54 }
 0x4c8   : > { %16537 = vmatpush3.bf16.msra.mxu0 %v16534_v54  ;;  %v16566_v54 = vpack.c.bf16 %v6995_v21, %v6994_v19  ;;  %v6436_v19 = vld [vmem:[#allocation4 + $0x2d0] sm:$0xff]  ;;  %v6437_v21 = vld [vmem:[#allocation4 + $0x2d8] sm:$0xff] }
 0x4c9   : > { %15547 = vmatmul.mubr.msk.f32.gmra.mrb[12].mxu1 %vm233_vm0, %v18283_v56  ;;  %v6167_v56 = vld [vmem:[#allocation4 + $0x2a8] sm:$0xff] }
 0x4ca   : > { %15549 = vmatprep.mubr.msk.f32.mxu1 %vm233_vm0, %v4721_v22  ;;  %v16538_v44 = vpack.c.bf16 %v6167_v56, %v6166_v37 }
 0x4cc   : > { %16539 = vmatprep.subr.bf16.mxu0 %v16538_v44 }
 0x4cd   : > { %15550 = vmatmul.mubr.msk.f32.gmra.mrb[14].mxu1 %vm233_vm0, %v18370_v32 }
 0x4ce   : > { %15556 = vmatprep.mubr.msk.f32.mxu1 %vm233_vm0, %v18211_v43  ;;  %v18387_v43 = vld [vmem:[#allocation2 + $0x91] sm:$0xff] }
 0x4d1   : > { %15557 = vmatmul.mubr.msk.f32.vlgmr.msra.gmra.mrb[8].mxu1 %vm233_vm0, %v18220_v38  ;;  %v5897_v38 = vld [vmem:[#allocation4 + $0x278] sm:$0xff] }
 0x4d2   : > { %16509 = vmatpush3.bf16.msra.mxu1 %v16506_v26  ;;  %15559 = vmatprep.mubr.msk.f32.mxu1 %vm233_vm0, %v18225_v39  ;;  %v16526_v39 = vpack.c.bf16 %v5897_v38, %v5896_v60 }
 0x4d3   : > { %16523 = vmatprep.subr.bf16.mxu1 %v16522_v63 }
 0x4d5   : > { %15560 = vmatmul.mubr.msk.f32.gmra.mrb[10].mxu1 %vm233_vm0, %v18229_v42  ;;  %v18404_v42 = vld [vmem:[#allocation2 + $0x92] sm:$0xff] }
 0x4d6   : > { %15562 = vmatprep.mubr.msk.f32.mxu1 %vm233_vm0, %v18233_v45  ;;  %v6066_v45 = vld [vmem:[#allocation4 + $0x290] sm:$0xff] }
 0x4d9   : > { %15563 = vmatmul.mubr.msk.f32.gmra.mrb[12].mxu1 %vm233_vm0, %v18239_v48  ;;  %v6067_v48 = vld [vmem:[#allocation4 + $0x298] sm:$0xff] }
 0x4da   : > { %15565 = vmatprep.mubr.msk.f32.mxu1 %vm233_vm0, %v4868_v34  ;;  %v16530_v1 = vpack.c.bf16 %v6067_v48, %v6066_v45  ;;  %v6726_v45 = vld [vmem:[#allocation4 + $0x310] sm:$0xff]  ;;  %v6727_v48 = vld [vmem:[#allocation4 + $0x318] sm:$0xff] }
 0x4dd   : > { %15566 = vmatmul.mubr.msk.f32.gmra.mrb[14].mxu1 %vm233_vm0, %v18387_v43 }
 0x4de   : > { %15572 = vmatprep.mubr.msk.f32.mxu1 %vm233_vm0, %v18290_v16 }
 0x4e1   : > { %15573 = vmatmul.mubr.msk.f32.vlgmr.msra.gmra.mrb[8].mxu1 %vm233_vm0, %v18294_v52 }
 0x4e2   : > { %16525 = vmatpush3.bf16.msra.mxu1 %v16522_v63  ;;  %15575 = vmatprep.mubr.msk.f32.mxu1 %vm233_vm0, %v18298_v53 }
 0x4e3   : > { %16527 = vmatprep.subr.bf16.mxu1 %v16526_v39 }
 0x4e5   : > { %15576 = vmatmul.mubr.msk.f32.gmra.mrb[10].mxu1 %vm233_vm0, %v18302_v61 }
 0x4e6   : > { %15578 = vmatprep.mubr.msk.f32.mxu1 %vm233_vm0, %v18306_v58 }
 0x4e9   : > { %15579 = vmatmul.mubr.msk.f32.gmra.mrb[12].mxu1 %vm233_vm0, %v18310_v4 }
 0x4ea   : > { %15581 = vmatprep.mubr.msk.f32.mxu1 %vm233_vm0, %v5015_v28 }
 0x4ed   : > { %15582 = vmatmul.mubr.msk.f32.gmra.mrb[14].mxu1 %vm233_vm0, %v18404_v42 }
 0x4ee   : > { %15609 = vmatprep.mubr.msk.f32.mxu1 %vm233_vm0, %v5898_v18  ;;  %v16558_v18 = vpack.c.bf16 %v6727_v48, %v6726_v45  ;;  %v7730_v45 = vld [vmem:[#allocation4 + $0x378] sm:$0xff] }
 0x4f1   : > { %15610 = vmatmul.mubr.msk.f32.vlgmr.msra.gmra.mrb[16].mxu1 %vm233_vm0, %v5899_v46 }
 0x4f2   : > { %16529 = vmatpush3.bf16.msra.mxu1 %v16526_v39  ;;  %15616 = vmatprep.mubr.msk.f32.mxu1 %vm233_vm0, %v5894_v49  ;;  %v6716_v49 = vld [vmem:[#allocation4 + $0x300] sm:$0xff] }
 0x4f3   : > { %16531 = vmatprep.subr.bf16.mxu1 %v16530_v1 }
 0x4f9   : > { %15617 = vmatmul.mubr.msk.f32.vlgmr.msra.gmra.mrb[16].mxu1 %vm233_vm0, %v5895_v50  ;;  %v6717_v50 = vld [vmem:[#allocation4 + $0x308] sm:$0xff] }
 0x4fa   : > { %16533 = vmatpush3.bf16.msra.mxu1 %v16530_v1  ;;  %15623 = vmatprep.mubr.msk.f32.mxu1 %vm233_vm0, %v6064_v51  ;;  %v16562_v51 = vpack.c.bf16 %v6717_v50, %v6716_v49  ;;  %v7876_v50 = vld [vmem:[#allocation4 + $0x380] sm:$0xff] }
 0x501   : > { %15624 = vmatmul.mubr.msk.f32.vlgmr.msra.gmra.mrb[16].mxu1 %vm233_vm0, %v6065_v8 }
 0x5b4   : > { %v15574_v59 = vpop.f32.mrb[8].mxu1 }
 0x5b5   : > { %v5602_v15 = vadd.f32 %v15574_v59, %v13799_v57  ;;  %v5549_v16 = vpop.f32.mrb[9].mxu1 }
 0x5b6   : > { %v5601_v52 = vadd.f32 %v13799_v57, %v5549_v16  ;;  %v7141_v16 = vld [vmem:[#allocation4 + $0x330] sm:$0xff] }
 0x5b7   : > { %v18418_v53 = vadd.f32 %v5602_v15, %v17545_v9 }
 0x5b8   : > { %v18421_v61 = vadd.f32 %v5601_v52, %v17539_v7  ;;  %v15577_v58 = vpop.f32.mrb[10].mxu1  ;;  %v7142_v52 = vld [vmem:[#allocation4 + $0x338] sm:$0xff] }
 0x5b9   : > { %6701 = vst.msk [vmem:[#allocation2 + $0x21] sm:$0xff] %vm233_vm0, %v18418_v53  ;;  %v5604_v4 = vadd.f32 %v15577_v58, %v13799_v57  ;;  %v5559_v27 = vpop.f32.mrb[11].mxu1  ;;  %v16570_v58 = vpack.c.bf16 %v7142_v52, %v7141_v16 }
 0x5ba   : > { %6700 = vst.msk [vmem:[#allocation2 + $0x11] sm:$0xff] %vm233_vm0, %v18421_v61  ;;  %v5603_v31 = vadd.f32 %v13799_v57, %v5559_v27 }
 0x5bb   : > { %v18428_v20 = vadd.f32 %v5604_v4, %v17549_v11 }
 0x5bc   : > { %v18431_v22 = vadd.f32 %v5603_v31, %v17547_v10  ;;  %v15580_v9 = vpop.f32.mrb[12].mxu1 }
 0x5bd   : > { %6703 = vst.msk [vmem:[#allocation2 + $0x41] sm:$0xff] %vm233_vm0, %v18428_v20  ;;  %v5606_v7 = vadd.f32 %v15580_v9, %v13799_v57  ;;  %v5569_v5 = vpop.f32.mrb[13].mxu1 }
 0x5be   : > { %6702 = vst.msk [vmem:[#allocation2 + $0x31] sm:$0xff] %vm233_vm0, %v18431_v22  ;;  %v5605_v23 = vadd.f32 %v13799_v57, %v5569_v5 }
 0x5bf   : > { %v18438_v33 = vadd.f32 %v5606_v7, %v17561_v13 }
 0x5c0   : > { %v18441_v34 = vadd.f32 %v5605_v23, %v17559_v12  ;;  %v15583_v11 = vpop.f32.mrb[14].mxu1  ;;  %v13813_v12 = vld [vmem:[%s19468_s3 + $0x5] ss:$0 sm:$0xff]  ;;  %v7288_v23 = vld [vmem:[#allocation4 + $0x340] sm:$0xff] }
 0x5c1   : > { %6705 = vst.msk [vmem:[#allocation2 + $0x61] sm:$0xff] %vm233_vm0, %v18438_v33  ;;  %v5608_v10 = vadd.f32 %v15583_v11, %v13799_v57  ;;  %v5579_v25 = vpop.f32.mrb[15].mxu1  ;;  %v18472_v37 = vld [vmem:[#allocation2 + $0x11] sm:$0xff]  ;;  %v18476_v56 = vld [vmem:[#allocation2 + $0x21] sm:$0xff] }
 0x5c2   : > { %6704 = vst.msk [vmem:[#allocation2 + $0x51] sm:$0xff] %vm233_vm0, %v18441_v34  ;;  %v5607_v29 = vadd.f32 %v13799_v57, %v5579_v25  ;;  %v6709_v4 = vld [vmem:[#allocation2 + $0x10] sm:$0xff]  ;;  %v18503_v27 = vld [vmem:[#allocation2 + $0x20] sm:$0xff]  ;;  %v7289_v11 = vld [vmem:[#allocation4 + $0x348] sm:$0xff] }
 0x5c3   : > { %v18448_v40 = vadd.f32 %v5608_v10, %v17571_v17  ;;  %v16574_v10 = vpack.c.bf16 %v7289_v11, %v7288_v23  ;;  %v6987_v25 = vld [vmem:[#allocation2 + $0x12] sm:$0xff]  ;;  %v13900_v11 = vld [vmem:[%s19468_s3 + $0x8] ss:$0 sm:$0xff] }
 0x5c4   : > { %v18451_v28 = vadd.f32 %v5607_v29, %v17563_v14  ;;  %v6336_v14 = vld [vmem:[#allocation4 + $0x2c0] sm:$0xff]  ;;  %v18511_v9 = vld [vmem:[#allocation2 + $0x40] sm:$0xff] }
 0x5c5   : > { %6707 = vst.msk [vmem:[#allocation2 + $0x81] sm:$0xff] %vm233_vm0, %v18448_v40  ;;  %v16542_v60 = vpack.c.bf16 %v6337_v6, %v6336_v14  ;;  %v18507_v31 = vld [vmem:[#allocation2 + $0x30] sm:$0xff]  ;;  %v18530_v29 = vld [vmem:[#allocation2 + $0x22] sm:$0xff] }
 0x5c6   : > { %6706 = vst.msk [vmem:[#allocation2 + $0x71] sm:$0xff] %vm233_vm0, %v18451_v28  ;;  %v7582_v6 = vld [vmem:[#allocation4 + $0x360] sm:$0xff] }
 0x5c8   : > { %v18492_v59 = vld [vmem:[#allocation2 + $0x61] sm:$0xff] }
 0x5c9   : > { %v18488_v57 = vld [vmem:[#allocation2 + $0x51] sm:$0xff]  ;;  %v18519_v7 = vld [vmem:[#allocation2 + $0x60] sm:$0xff] }
 0x5cc   : > { %v7140_v14 = vld [vmem:[#allocation2 + $0x80] sm:$0xff] }
 0x5cd   : > { %v18496_v15 = vld [vmem:[#allocation2 + $0x71] sm:$0xff]  ;;  %v7434_v49 = vld [vmem:[#allocation2 + $0x82] sm:$0xff] }
 0x5ce   : > { %v18523_v5 = vld [vmem:[#allocation2 + $0x70] sm:$0xff] }
 0x5d4   : > { %v15625_v13 = vpop.f32.mrb[16].mxu1 }
 0x5d5   : > { %v6157_v30 = vadd.f32 %v15625_v13, %v13813_v12  ;;  %v6140_v41 = vpop.f32.mrb[17].mxu1  ;;  %v18538_v13 = vld [vmem:[#allocation2 + $0x42] sm:$0xff] }
 0x5d6   : > { %v6156_v26 = vadd.f32 %v13813_v12, %v6140_v41  ;;  %v18534_v12 = vld [vmem:[#allocation2 + $0x32] sm:$0xff] }
 0x5d7   : > { %v6159_v36 = vmax.f32 %v6157_v30, 0.0  ;;  %v18546_v30 = vld [vmem:[#allocation2 + $0x62] sm:$0xff]  ;;  %v18550_v41 = vld [vmem:[#allocation2 + $0x72] sm:$0xff] }
 0x5d8   : > { %v6158_v17 = vmax.f32 %v6156_v26, 0.0  ;;  %v7435_v26 = vld [vmem:[#allocation4 + $0x350] sm:$0xff] }
 0x5d9   : > { %6162 = vst.msk [vmem:[#allocation3 - $0x3] sm:$0x8] %vm5620_vm4, %v6159_v36 }
 0x5da   : > { %6161 = vst.msk [vmem:[#allocation3 + $0x9] sm:$0xf] %vm5618_vm3, %v6159_v36  ;;  %v7436_v36 = vld [vmem:[#allocation4 + $0x358] sm:$0xff] }
 0x5db   : > { %6163 = vst.msk [vmem:[#allocation3 + $0xd] sm:$0x1] %vm5622_vm5, %v6158_v17 }
 0x5dc   : > { %6160 = vst.msk [vmem:[#allocation3 + $0x1] sm:$0xff] %vm233_vm0, %v6158_v17  ;;  %v16578_v17 = vpack.c.bf16 %v7436_v36, %v7435_v26 }
 0x5e1   : > { %v6169_v38 = vld [vmem:[#allocation3 + $0x9] sm:$0xf] }
 0x5e2   : > { %v6335_v8 = vld [vmem:[#allocation3 + $0xa] sm:$0xf] }
 0x5e3   : > { %v6168_v63 = vld [vmem:[#allocation3 + $0x1] sm:$0xff] }
 0x5e4   : > { %15630 = vmatprep.mubr.msk.f32.mxu0 %vm233_vm0, %v6168_v63  ;;  %v6164_v39 = vld [vmem:[#allocation3] sm:$0xff]  ;;  %v6165_v1 = vld [vmem:[#allocation3 + $0x8] sm:$0xf]  ;;  %v7583_v63 = vld [vmem:[#allocation4 + $0x368] sm:$0xff] }
 0x5e5   : > { %15631 = vmatmul.mubr.msk.f32.vlgmr.msra.gmra.mrb[18].mxu0 %vm233_vm0, %v6169_v38  ;;  %v6334_v46 = vld [vmem:[#allocation3 + $0x2] sm:$0xff] }
 0x5e6   : > { %16541 = vmatpush3.bf16.msra.mxu0 %v16538_v44  ;;  %15637 = vmatprep.mubr.msk.f32.mxu0 %vm233_vm0, %v6164_v39  ;;  %v18480_v44 = vld [vmem:[#allocation2 + $0x31] sm:$0xff]  ;;  %v7287_v38 = vld [vmem:[#allocation2 + $0x81] sm:$0xff] }
 0x5e7   : > { %16543 = vmatprep.subr.bf16.mxu0 %v16542_v60  ;;  %v7729_v39 = vld [vmem:[#allocation4 + $0x370] sm:$0xff] }
 0x5e8   : > { %v16586_v48 = vpack.c.bf16 %v7730_v45, %v7729_v39  ;;  %v8331_v39 = vld [vmem:[#allocation4 + $0x3b8] sm:$0xff] }
 0x5ed   : > { %15638 = vmatmul.mubr.msk.f32.vlgmr.msra.gmra.mrb[18].mxu0 %vm233_vm0, %v6165_v1  ;;  %v6441_v1 = vld [vmem:[#allocation4 + $0x2e8] sm:$0xff] }
 0x5ee   : > { %16545 = vmatpush3.bf16.msra.mxu0 %v16542_v60  ;;  %15644 = vmatprep.mubr.msk.f32.mxu0 %vm233_vm0, %v6334_v46  ;;  %v16582_v60 = vpack.c.bf16 %v7583_v63, %v7582_v6 }
 0x5ef   : > { %16559 = vmatprep.subr.bf16.mxu0 %v16558_v18 }
 0x5f5   : > { %15645 = vmatmul.mubr.msk.f32.vlgmr.msra.gmra.mrb[18].mxu0 %vm233_vm0, %v6335_v8 }
 0x5f6   : > { %16561 = vmatpush3.bf16.msra.mxu0 %v16558_v18  ;;  %15672 = vmatprep.mubr.msk.f32.mxu0 %vm233_vm0, %v18182_v2  ;;  %v18484_v2 = vld [vmem:[#allocation2 + $0x41] sm:$0xff]  ;;  %v6440_v18 = vld [vmem:[#allocation4 + $0x2e0] sm:$0xff] }
 0x5f7   : > { %16563 = vmatprep.subr.bf16.mxu0 %v16562_v51  ;;  %v16546_v46 = vpack.c.bf16 %v6441_v1, %v6440_v18 }
 0x5f9   : > { %15673 = vmatmul.mubr.msk.f32.vlgmr.msra.gmra.mrb[20].mxu0 %vm233_vm0, %v18472_v37  ;;  %16547 = vmatprep.subr.bf16.mxu1 %v16546_v46 }
 0x5fa   : > { %16565 = vmatpush3.bf16.msra.mxu0 %v16562_v51  ;;  %15675 = vmatprep.mubr.msk.f32.mxu0 %vm233_vm0, %v18476_v56  ;;  %v7877_v51 = vld [vmem:[#allocation4 + $0x388] sm:$0xff] }
 0x5fb   : > { %16567 = vmatprep.subr.bf16.mxu0 %v16566_v54  ;;  %16549 = vmatpush3.bf16.msra.mxu1 %v16546_v46  ;;  %v16590_v8 = vpack.c.bf16 %v7877_v51, %v7876_v50 }
 0x5fd   : > { %15676 = vmatmul.mubr.msk.f32.gmra.mrb[22].mxu0 %vm233_vm0, %v18480_v44 }
 0x5fe   : > { %15678 = vmatprep.mubr.msk.f32.mxu0 %vm233_vm0, %v18484_v2 }
 0x601   : > { %15679 = vmatmul.mubr.msk.f32.gmra.mrb[24].mxu0 %vm233_vm0, %v18488_v57 }
 0x602   : > { %15681 = vmatprep.mubr.msk.f32.mxu0 %vm233_vm0, %v18492_v59 }
 0x605   : > { %15682 = vmatmul.mubr.msk.f32.gmra.mrb[26].mxu0 %vm233_vm0, %v18496_v15 }
 0x606   : > { %15688 = vmatprep.mubr.msk.f32.mxu0 %vm233_vm0, %v18237_v47  ;;  %v18515_v47 = vld [vmem:[#allocation2 + $0x50] sm:$0xff] }
 0x609   : > { %15689 = vmatmul.mubr.msk.f32.vlgmr.msra.gmra.mrb[20].mxu0 %vm233_vm0, %v6709_v4 }
 0x60a   : > { %16569 = vmatpush3.bf16.msra.mxu0 %v16566_v54  ;;  %15691 = vmatprep.mubr.msk.f32.mxu0 %vm233_vm0, %v18503_v27  ;;  %v16550_v54 = vpack.c.bf16 %v6437_v21, %v6436_v19 }
 0x60b   : > { %16571 = vmatprep.subr.bf16.mxu0 %v16570_v58 }
 0x60c   : > { %16551 = vmatprep.subr.bf16.mxu1 %v16550_v54 }
 0x60d   : > { %15692 = vmatmul.mubr.msk.f32.gmra.mrb[22].mxu0 %vm233_vm0, %v18507_v31 }
 0x60e   : > { %15694 = vmatprep.mubr.msk.f32.mxu0 %vm233_vm0, %v18511_v9 }
 0x611   : > { %15695 = vmatmul.mubr.msk.f32.gmra.mrb[24].mxu0 %vm233_vm0, %v18515_v47 }
 0x612   : > { %15697 = vmatprep.mubr.msk.f32.mxu0 %vm233_vm0, %v18519_v7 }
 0x615   : > { %15698 = vmatmul.mubr.msk.f32.gmra.mrb[26].mxu0 %vm233_vm0, %v18523_v5 }
 0x616   : > { %15704 = vmatprep.mubr.msk.f32.mxu0 %vm233_vm0, %v18281_v55  ;;  %v18542_v55 = vld [vmem:[#allocation2 + $0x52] sm:$0xff] }
 0x619   : > { %15705 = vmatmul.mubr.msk.f32.vlgmr.msra.gmra.mrb[20].mxu0 %vm233_vm0, %v6987_v25 }
 0x61a   : > { %16573 = vmatpush3.bf16.msra.mxu0 %v16570_v58  ;;  %15707 = vmatprep.mubr.msk.f32.mxu0 %vm233_vm0, %v18530_v29  ;;  %v8062_v58 = vld [vmem:[#allocation4 + $0x3a0] sm:$0xff] }
 0x61b   : > { %16575 = vmatprep.subr.bf16.mxu0 %v16574_v10 }
 0x61d   : > { %15708 = vmatmul.mubr.msk.f32.gmra.mrb[22].mxu0 %vm233_vm0, %v18534_v12 }
 0x61e   : > { %15710 = vmatprep.mubr.msk.f32.mxu0 %vm233_vm0, %v18538_v13 }
 0x621   : > { %15711 = vmatmul.mubr.msk.f32.gmra.mrb[24].mxu0 %vm233_vm0, %v18542_v55 }
 0x622   : > { %15713 = vmatprep.mubr.msk.f32.mxu0 %vm233_vm0, %v18546_v30 }
 0x625   : > { %15714 = vmatmul.mubr.msk.f32.gmra.mrb[26].mxu0 %vm233_vm0, %v18550_v41 }
 0x626   : > { %15720 = vmatprep.mubr.msk.f32.mxu0 %vm233_vm0, %v6709_v4  ;;  %v8063_v4 = vld [vmem:[#allocation4 + $0x3a8] sm:$0xff] }
 0x629   : > { %15721 = vmatmul.mubr.msk.f32.vlgmr.msra.gmra.mrb[20].mxu0 %vm233_vm0, %v18503_v27 }
 0x62a   : > { %16577 = vmatpush3.bf16.msra.mxu0 %v16574_v10  ;;  %15723 = vmatprep.mubr.msk.f32.mxu0 %vm233_vm0, %v18507_v31 }
 0x62b   : > { %16579 = vmatprep.subr.bf16.mxu0 %v16578_v17 }
 0x62d   : > { %15724 = vmatmul.mubr.msk.f32.gmra.mrb[22].mxu0 %vm233_vm0, %v18511_v9 }
 0x62e   : > { %15726 = vmatprep.mubr.msk.f32.mxu0 %vm233_vm0, %v18515_v47 }
 0x631   : > { %15727 = vmatmul.mubr.msk.f32.gmra.mrb[24].mxu0 %vm233_vm0, %v18519_v7 }
 0x632   : > { %15729 = vmatprep.mubr.msk.f32.mxu0 %vm233_vm0, %v18523_v5 }
 0x635   : > { %15730 = vmatmul.mubr.msk.f32.gmra.mrb[26].mxu0 %vm233_vm0, %v7140_v14 }
 0x636   : > { %15736 = vmatprep.mubr.msk.f32.mxu0 %vm233_vm0, %v18472_v37 }
 0x639   : > { %15737 = vmatmul.mubr.msk.f32.vlgmr.msra.gmra.mrb[20].mxu0 %vm233_vm0, %v18476_v56 }
 0x63a   : > { %16581 = vmatpush3.bf16.msra.mxu0 %v16578_v17  ;;  %15739 = vmatprep.mubr.msk.f32.mxu0 %vm233_vm0, %v18480_v44 }
 0x63b   : > { %16583 = vmatprep.subr.bf16.mxu0 %v16582_v60 }
 0x63d   : > { %15740 = vmatmul.mubr.msk.f32.gmra.mrb[22].mxu0 %vm233_vm0, %v18484_v2 }
 0x63e   : > { %15742 = vmatprep.mubr.msk.f32.mxu0 %vm233_vm0, %v18488_v57 }
 0x641   : > { %15743 = vmatmul.mubr.msk.f32.gmra.mrb[24].mxu0 %vm233_vm0, %v18492_v59 }
 0x642   : > { %15745 = vmatprep.mubr.msk.f32.mxu0 %vm233_vm0, %v18496_v15 }
 0x645   : > { %15746 = vmatmul.mubr.msk.f32.gmra.mrb[26].mxu0 %vm233_vm0, %v7287_v38 }
 0x646   : > { %15752 = vmatprep.mubr.msk.f32.mxu0 %vm233_vm0, %v6987_v25 }
 0x649   : > { %15753 = vmatmul.mubr.msk.f32.vlgmr.msra.gmra.mrb[20].mxu0 %vm233_vm0, %v18530_v29 }
 0x64a   : > { %16585 = vmatpush3.bf16.msra.mxu0 %v16582_v60  ;;  %15755 = vmatprep.mubr.msk.f32.mxu0 %vm233_vm0, %v18534_v12 }
 0x64b   : > { %16587 = vmatprep.subr.bf16.mxu0 %v16586_v48 }
 0x64d   : > { %15756 = vmatmul.mubr.msk.f32.gmra.mrb[22].mxu0 %vm233_vm0, %v18538_v13 }
 0x64e   : > { %15758 = vmatprep.mubr.msk.f32.mxu0 %vm233_vm0, %v18542_v55 }
 0x651   : > { %15759 = vmatmul.mubr.msk.f32.gmra.mrb[24].mxu0 %vm233_vm0, %v18546_v30 }
 0x652   : > { %15761 = vmatprep.mubr.msk.f32.mxu0 %vm233_vm0, %v18550_v41 }
 0x655   : > { %15762 = vmatmul.mubr.msk.f32.gmra.mrb[26].mxu0 %vm233_vm0, %v7434_v49 }
 0x656   : > { %15768 = vmatprep.mubr.msk.f32.mxu0 %vm233_vm0, %v18503_v27  ;;  %v16594_v27 = vpack.c.bf16 %v8063_v4, %v8062_v58 }
 0x659   : > { %15769 = vmatmul.mubr.msk.f32.vlgmr.msra.gmra.mrb[20].mxu0 %vm233_vm0, %v18507_v31 }
 0x65a   : > { %16589 = vmatpush3.bf16.msra.mxu0 %v16586_v48  ;;  %15771 = vmatprep.mubr.msk.f32.mxu0 %vm233_vm0, %v18511_v9 }
 0x65b   : > { %16591 = vmatprep.subr.bf16.mxu0 %v16590_v8 }
 0x65d   : > { %15772 = vmatmul.mubr.msk.f32.gmra.mrb[22].mxu0 %vm233_vm0, %v18515_v47  ;;  %v8052_v47 = vld [vmem:[#allocation4 + $0x390] sm:$0xff] }
 0x65e   : > { %15774 = vmatprep.mubr.msk.f32.mxu0 %vm233_vm0, %v18519_v7  ;;  %v8053_v7 = vld [vmem:[#allocation4 + $0x398] sm:$0xff] }
 0x661   : > { %15775 = vmatmul.mubr.msk.f32.gmra.mrb[24].mxu0 %vm233_vm0, %v18523_v5  ;;  %v16598_v5 = vpack.c.bf16 %v8053_v7, %v8052_v47  ;;  %v18767_v47 = vld [vmem:[#allocation2 + $0x2] sm:$0xff] }
 0x662   : > { %15777 = vmatprep.mubr.msk.f32.mxu0 %vm233_vm0, %v7140_v14 }
 0x665   : > { %15778 = vmatmul.mubr.msk.f32.gmra.mrb[26].mxu0 %vm233_vm0, %v18370_v32  ;;  %v13820_v32 = vld [vmem:[%s19468_s3 + $0x6] ss:$0 sm:$0xff] }
 0x666   : > { %15784 = vmatprep.mubr.msk.f32.mxu0 %vm233_vm0, %v18476_v56 }
 0x669   : > { %15785 = vmatmul.mubr.msk.f32.vlgmr.msra.gmra.mrb[20].mxu0 %vm233_vm0, %v18480_v44 }
 0x66a   : > { %16593 = vmatpush3.bf16.msra.mxu0 %v16590_v8  ;;  %15787 = vmatprep.mubr.msk.f32.mxu0 %vm233_vm0, %v18484_v2 }
 0x66d   : > { %15788 = vmatmul.mubr.msk.f32.gmra.mrb[22].mxu0 %vm233_vm0, %v18488_v57 }
 0x66e   : > { %15790 = vmatprep.mubr.msk.f32.mxu0 %vm233_vm0, %v18492_v59  ;;  %v6607_v59 = vld [vmem:[#allocation4 + $0x2f8] sm:$0xff] }
 0x671   : > { %15791 = vmatmul.mubr.msk.f32.gmra.mrb[24].mxu0 %vm233_vm0, %v18496_v15 }
 0x672   : > { %15793 = vmatprep.mubr.msk.f32.mxu0 %vm233_vm0, %v7287_v38  ;;  %v8330_v38 = vld [vmem:[#allocation4 + $0x3b0] sm:$0xff] }
 0x673   : > { %v16602_v46 = vpack.c.bf16 %v8331_v39, %v8330_v38  ;;  %v8771_v39 = vld [vmem:[#allocation4 + $0x3e0] sm:$0xff] }
 0x675   : > { %15794 = vmatmul.mubr.msk.f32.gmra.mrb[26].mxu0 %vm233_vm0, %v18387_v43 }
 0x676   : > { %15800 = vmatprep.mubr.msk.f32.mxu0 %vm233_vm0, %v18530_v29 }
 0x679   : > { %15801 = vmatmul.mubr.msk.f32.vlgmr.msra.gmra.mrb[20].mxu0 %vm233_vm0, %v18534_v12 }
 0x67a   : > { %15803 = vmatprep.mubr.msk.f32.mxu0 %vm233_vm0, %v18538_v13 }
 0x67d   : > { %15804 = vmatmul.mubr.msk.f32.gmra.mrb[22].mxu0 %vm233_vm0, %v18542_v55 }
 0x67e   : > { %15806 = vmatprep.mubr.msk.f32.mxu0 %vm233_vm0, %v18546_v30 }
 0x681   : > { %15807 = vmatmul.mubr.msk.f32.gmra.mrb[24].mxu0 %vm233_vm0, %v18550_v41 }
 0x682   : > { %15809 = vmatprep.mubr.msk.f32.mxu0 %vm233_vm0, %v7434_v49 }
 0x685   : > { %15810 = vmatmul.mubr.msk.f32.gmra.mrb[26].mxu0 %vm233_vm0, %v18404_v42  ;;  %v6606_v42 = vld [vmem:[#allocation4 + $0x2f0] sm:$0xff] }
 0x686   : > { %v16554_v16 = vpack.c.bf16 %v6607_v59, %v6606_v42  ;;  %v8478_v42 = vld [vmem:[#allocation4 + $0x3c8] sm:$0xff]  ;;  %v9398_v59 = vld [vmem:[#allocation4 + $0x430] sm:$0xff] }
 0x6c8   : > { %v15646_v43 = vpop.f32.mrb[18].mxu0 }
 0x6c9   : > { %v6427_v37 = vadd.f32 %v15646_v43, %v13820_v32  ;;  %v6410_v56 = vpop.f32.mrb[19].mxu0 }
 0x6ca   : > { %v6426_v44 = vadd.f32 %v13820_v32, %v6410_v56 }
 0x6cb   : > { %v6429_v2 = vadd.f32 %v6427_v37, %v18261_v24 }
 0x6cc   : > { %v6428_v57 = vadd.f32 %v6426_v44, %v18263_v35  ;;  %v18654_v35 = vld [vmem:[#allocation2 + $0x1] sm:$0xff] }
 0x6cd   : > { %6432 = vst.msk [vmem:[#allocation3 - $0x3] sm:$0x8] %vm5620_vm4, %v6429_v2  ;;  %15960 = vmatprep.mubr.msk.f32.mxu0 %vm233_vm0, %v18654_v35  ;;  %v18738_v44 = vld [vmem:[#allocation2] sm:$0xff] }
 0x6ce   : > { %6431 = vst.msk [vmem:[#allocation3 + $0x9] sm:$0xf] %vm5618_vm3, %v6429_v2 }
 0x6cf   : > { %6433 = vst.msk [vmem:[#allocation3 + $0xd] sm:$0x1] %vm5622_vm5, %v6428_v57 }
 0x6d0   : > { %6430 = vst.msk [vmem:[#allocation3 + $0x1] sm:$0xff] %vm233_vm0, %v6428_v57  ;;  %v8477_v57 = vld [vmem:[#allocation4 + $0x3c0] sm:$0xff] }
 0x6d5   : > { %v6439_v52 = vld [vmem:[#allocation3 + $0x9] sm:$0xf] }
 0x6d6   : > { %v6605_v23 = vld [vmem:[#allocation3 + $0xa] sm:$0xf] }
 0x6d7   : > { %v6438_v15 = vld [vmem:[#allocation3 + $0x1] sm:$0xff] }
 0x6d8   : > { %15651 = vmatprep.mubr.msk.f32.mxu1 %vm233_vm0, %v6438_v15  ;;  %v6434_v24 = vld [vmem:[#allocation3] sm:$0xff]  ;;  %v6435_v31 = vld [vmem:[#allocation3 + $0x8] sm:$0xf] }
 0x6d9   : > { %15652 = vmatmul.mubr.msk.f32.vlgmr.msra.gmra.mrb[18].mxu1 %vm233_vm0, %v6439_v52  ;;  %v6604_v9 = vld [vmem:[#allocation3 + $0x2] sm:$0xff]  ;;  %v16606_v52 = vpack.c.bf16 %v8478_v42, %v8477_v57 }
 0x6da   : > { %15658 = vmatprep.mubr.msk.f32.mxu1 %vm233_vm0, %v6434_v24  ;;  %16553 = vmatpush3.bf16.msra.mxu1 %v16550_v54  ;;  %v9399_v15 = vld [vmem:[#allocation4 + $0x438] sm:$0xff]  ;;  %v8918_v57 = vld [vmem:[#allocation4 + $0x3f0] sm:$0xff] }
 0x6db   : > { %16555 = vmatprep.subr.bf16.mxu1 %v16554_v16  ;;  %v8919_v42 = vld [vmem:[#allocation4 + $0x3f8] sm:$0xff] }
 0x6e1   : > { %15659 = vmatmul.mubr.msk.f32.vlgmr.msra.gmra.mrb[18].mxu1 %vm233_vm0, %v6435_v31 }
 0x6e2   : > { %15665 = vmatprep.mubr.msk.f32.mxu1 %vm233_vm0, %v6604_v9  ;;  %16557 = vmatpush3.bf16.msra.mxu1 %v16554_v16  ;;  %v16630_v16 = vpack.c.bf16 %v9399_v15, %v9398_v59  ;;  %v16618_v59 = vpack.c.bf16 %v8919_v42, %v8918_v57  ;;  %v9065_v15 = vld [vmem:[#allocation4 + $0x400] sm:$0xff] }
 0x6e3   : > { %16595 = vmatprep.subr.bf16.mxu1 %v16594_v27 }
 0x6e4   : > { %16631 = vmatprep.subr.bf16.mxu0 %v16630_v16 }
 0x6e5   : > { %16633 = vmatpush3.bf16.msra.mxu0 %v16630_v16  ;;  %v9066_v16 = vld [vmem:[#allocation4 + $0x408] sm:$0xff] }
 0x6e9   : > { %15666 = vmatmul.mubr.msk.f32.vlgmr.msra.gmra.mrb[18].mxu1 %vm233_vm0, %v6605_v23  ;;  %v8625_v23 = vld [vmem:[#allocation4 + $0x3d8] sm:$0xff] }
 0x6ea   : > { %16597 = vmatpush3.bf16.msra.mxu1 %v16594_v27  ;;  %15816 = vmatprep.mubr.msk.f32.mxu1 %vm233_vm0, %v18654_v35 }
 0x6eb   : > { %16599 = vmatprep.subr.bf16.mxu1 %v16598_v5 }
 0x74c   : > { %v15802_v10 = vpop.f32.mrb[20].mxu0 }
 0x74d   : > { %v18666_v25 = vadd.f32 %v15802_v10, %v13900_v11  ;;  %v7968_v29 = vpop.f32.mrb[21].mxu0 }
 0x74e   : > { %v18668_v12 = vadd.f32 %v13900_v11, %v7968_v29 }
 0x74f   : > { %v8029_v13 = vmax.f32 %v18666_v25, 0.0 }
 0x750   : > { %v8028_v55 = vmax.f32 %v18668_v12, 0.0  ;;  %v15805_v30 = vpop.f32.mrb[22].mxu0 }
 0x751   : > { %8037 = vst.msk [vmem:[#allocation2 + $0x21] sm:$0xff] %vm233_vm0, %v8029_v13  ;;  %v18675_v41 = vadd.f32 %v15805_v30, %v13900_v11  ;;  %v7978_v26 = vpop.f32.mrb[23].mxu0 }
 0x752   : > { %8036 = vst.msk [vmem:[#allocation2 + $0x11] sm:$0xff] %vm233_vm0, %v8028_v55  ;;  %v18680_v36 = vadd.f32 %v13900_v11, %v7978_v26 }
 0x753   : > { %v8031_v17 = vmax.f32 %v18675_v41, 0.0 }
 0x754   : > { %v8030_v14 = vmax.f32 %v18680_v36, 0.0  ;;  %v15808_v6 = vpop.f32.mrb[24].mxu0 }
 0x755   : > { %8039 = vst.msk [vmem:[#allocation2 + $0x41] sm:$0xff] %vm233_vm0, %v8031_v17  ;;  %v18687_v63 = vadd.f32 %v15808_v6, %v13900_v11  ;;  %v7988_v60 = vpop.f32.mrb[25].mxu0 }
 0x756   : > { %8038 = vst.msk [vmem:[#allocation2 + $0x31] sm:$0xff] %vm233_vm0, %v8030_v14  ;;  %v18692_v45 = vadd.f32 %v13900_v11, %v7988_v60 }
 0x757   : > { %v8033_v48 = vmax.f32 %v18687_v63, 0.0 }
 0x758   : > { %v8032_v18 = vmax.f32 %v18692_v45, 0.0  ;;  %v15811_v1 = vpop.f32.mrb[26].mxu0  ;;  %v18710_v19 = vld [vmem:[#allocation2 + $0x21] sm:$0xff] }
 0x759   : > { %8041 = vst.msk [vmem:[#allocation2 + $0x61] sm:$0xff] %vm233_vm0, %v8033_v48  ;;  %v18699_v49 = vadd.f32 %v15811_v1, %v13900_v11  ;;  %v7998_v50 = vpop.f32.mrb[27].mxu0  ;;  %v18701_v51 = vld [vmem:[#allocation2 + $0x11] sm:$0xff]  ;;  %v18747_v58 = vld [vmem:[#allocation2 + $0x20] sm:$0xff] }
 0x75a   : > { %8040 = vst.msk [vmem:[#allocation2 + $0x51] sm:$0xff] %vm233_vm0, %v8032_v18  ;;  %v18706_v8 = vadd.f32 %v13900_v11, %v7998_v50  ;;  %15817 = vmatmul.mubr.msk.f32.vlgmr.msra.gmra.mrb[20].mxu1 %vm233_vm0, %v18701_v51  ;;  %v8045_v24 = vld [vmem:[#allocation2 + $0x10] sm:$0xff]  ;;  %v18776_v29 = vld [vmem:[#allocation2 + $0x22] sm:$0xff]  ;;  %v8772_v1 = vld [vmem:[#allocation4 + $0x3e8] sm:$0xff] }
 0x75b   : > { %v8035_v21 = vmax.f32 %v18699_v49, 0.0  ;;  %16601 = vmatpush3.bf16.msra.mxu1 %v16598_v5  ;;  %15819 = vmatprep.mubr.msk.f32.mxu1 %vm233_vm0, %v18710_v19  ;;  %v8624_v5 = vld [vmem:[#allocation4 + $0x3d0] sm:$0xff]  ;;  %v8323_v10 = vld [vmem:[#allocation2 + $0x12] sm:$0xff] }
 0x75c   : > { %v8034_v54 = vmax.f32 %v18706_v8, 0.0  ;;  %16603 = vmatprep.subr.bf16.mxu1 %v16602_v46  ;;  %v18726_v43 = vld [vmem:[#allocation2 + $0x41] sm:$0xff]  ;;  %v16610_v11 = vpack.c.bf16 %v8625_v23, %v8624_v5 }
 0x75d   : > { %8043 = vst.msk [vmem:[#allocation2 + $0x81] sm:$0xff] %vm233_vm0, %v8035_v21  ;;  %v18719_v32 = vld [vmem:[#allocation2 + $0x31] sm:$0xff]  ;;  %v18755_v27 = vld [vmem:[#allocation2 + $0x40] sm:$0xff]  ;;  %v9213_v23 = vld [vmem:[#allocation4 + $0x418] sm:$0xff] }
 0x75e   : > { %8042 = vst.msk [vmem:[#allocation2 + $0x71] sm:$0xff] %vm233_vm0, %v8034_v54  ;;  %15820 = vmatmul.mubr.msk.f32.gmra.mrb[22].mxu1 %vm233_vm0, %v18719_v32  ;;  %v18751_v4 = vld [vmem:[#allocation2 + $0x30] sm:$0xff]  ;;  %v18784_v26 = vld [vmem:[#allocation2 + $0x42] sm:$0xff] }
 0x75f   : > { %15822 = vmatprep.mubr.msk.f32.mxu1 %vm233_vm0, %v18726_v43  ;;  %v18780_v30 = vld [vmem:[#allocation2 + $0x32] sm:$0xff]  ;;  %v9212_v5 = vld [vmem:[#allocation4 + $0x410] sm:$0xff] }
 0x760   : > { %v18734_v56 = vld [vmem:[#allocation2 + $0x61] sm:$0xff] }
 0x761   : > { %v18730_v37 = vld [vmem:[#allocation2 + $0x51] sm:$0xff]  ;;  %v18763_v9 = vld [vmem:[#allocation2 + $0x60] sm:$0xff] }
 0x762   : > { %15823 = vmatmul.mubr.msk.f32.gmra.mrb[24].mxu1 %vm233_vm0, %v18730_v37  ;;  %v18759_v31 = vld [vmem:[#allocation2 + $0x50] sm:$0xff]  ;;  %v18792_v60 = vld [vmem:[#allocation2 + $0x62] sm:$0xff] }
 0x763   : > { %15825 = vmatprep.mubr.msk.f32.mxu1 %vm233_vm0, %v18734_v56  ;;  %v18788_v6 = vld [vmem:[#allocation2 + $0x52] sm:$0xff] }
 0x764   : > { %v8476_v50 = vld [vmem:[#allocation2 + $0x80] sm:$0xff] }
 0x765   : > { %v18740_v2 = vld [vmem:[#allocation2 + $0x71] sm:$0xff] }
 0x766   : > { %15826 = vmatmul.mubr.msk.f32.gmra.mrb[26].mxu1 %vm233_vm0, %v18740_v2  ;;  %v18769_v7 = vld [vmem:[#allocation2 + $0x70] sm:$0xff] }
 0x767   : > { %15832 = vmatprep.mubr.msk.f32.mxu1 %vm233_vm0, %v18738_v44  ;;  %v18796_v38 = vld [vmem:[#allocation2 + $0x72] sm:$0xff] }
 0x76a   : > { %15833 = vmatmul.mubr.msk.f32.vlgmr.msra.gmra.mrb[20].mxu1 %vm233_vm0, %v8045_v24 }
 0x76b   : > { %16605 = vmatpush3.bf16.msra.mxu1 %v16602_v46  ;;  %15835 = vmatprep.mubr.msk.f32.mxu1 %vm233_vm0, %v18747_v58  ;;  %v16614_v46 = vpack.c.bf16 %v8772_v1, %v8771_v39 }
 0x76c   : > { %16607 = vmatprep.subr.bf16.mxu1 %v16606_v52 }
 0x76e   : > { %15836 = vmatmul.mubr.msk.f32.gmra.mrb[22].mxu1 %vm233_vm0, %v18751_v4 }
 0x76f   : > { %15838 = vmatprep.mubr.msk.f32.mxu1 %vm233_vm0, %v18755_v27 }
 0x772   : > { %15839 = vmatmul.mubr.msk.f32.gmra.mrb[24].mxu1 %vm233_vm0, %v18759_v31 }
 0x773   : > { %15841 = vmatprep.mubr.msk.f32.mxu1 %vm233_vm0, %v18763_v9 }
 0x776   : > { %15842 = vmatmul.mubr.msk.f32.gmra.mrb[26].mxu1 %vm233_vm0, %v18769_v7 }
 0x777   : > { %15848 = vmatprep.mubr.msk.f32.mxu1 %vm233_vm0, %v18767_v47 }
 0x77a   : > { %15849 = vmatmul.mubr.msk.f32.vlgmr.msra.gmra.mrb[20].mxu1 %vm233_vm0, %v8323_v10 }
 0x77b   : > { %16609 = vmatpush3.bf16.msra.mxu1 %v16606_v52  ;;  %15851 = vmatprep.mubr.msk.f32.mxu1 %vm233_vm0, %v18776_v29  ;;  %v16622_v52 = vpack.c.bf16 %v9066_v16, %v9065_v15  ;;  %v9667_v15 = vld [vmem:[#allocation4 + $0x448] sm:$0xff] }
 0x77c   : > { %16611 = vmatprep.subr.bf16.mxu1 %v16610_v11 }
 0x77e   : > { %15852 = vmatmul.mubr.msk.f32.gmra.mrb[22].mxu1 %vm233_vm0, %v18780_v30 }
 0x77f   : > { %15854 = vmatprep.mubr.msk.f32.mxu1 %vm233_vm0, %v18784_v26 }
 0x782   : > { %15855 = vmatmul.mubr.msk.f32.gmra.mrb[24].mxu1 %vm233_vm0, %v18788_v6 }
 0x783   : > { %15857 = vmatprep.mubr.msk.f32.mxu1 %vm233_vm0, %v18792_v60 }
 0x786   : > { %15858 = vmatmul.mubr.msk.f32.gmra.mrb[26].mxu1 %vm233_vm0, %v18796_v38 }
 0x787   : > { %15864 = vmatprep.mubr.msk.f32.mxu1 %vm233_vm0, %v8045_v24  ;;  %v8770_v24 = vld [vmem:[#allocation2 + $0x82] sm:$0xff] }
 0x78a   : > { %15865 = vmatmul.mubr.msk.f32.vlgmr.msra.gmra.mrb[20].mxu1 %vm233_vm0, %v18747_v58 }
 0x78b   : > { %16613 = vmatpush3.bf16.msra.mxu1 %v16610_v11  ;;  %15867 = vmatprep.mubr.msk.f32.mxu1 %vm233_vm0, %v18751_v4  ;;  %v13827_v11 = vld [vmem:[%s19468_s3 + $0x7] ss:$0 sm:$0xff] }
 0x78c   : > { %16615 = vmatprep.subr.bf16.mxu1 %v16614_v46 }
 0x78e   : > { %15868 = vmatmul.mubr.msk.f32.gmra.mrb[22].mxu1 %vm233_vm0, %v18755_v27 }
 0x78f   : > { %15870 = vmatprep.mubr.msk.f32.mxu1 %vm233_vm0, %v18759_v31 }
 0x792   : > { %15871 = vmatmul.mubr.msk.f32.gmra.mrb[24].mxu1 %vm233_vm0, %v18763_v9 }
 0x793   : > { %15873 = vmatprep.mubr.msk.f32.mxu1 %vm233_vm0, %v18769_v7 }
 0x796   : > { %15874 = vmatmul.mubr.msk.f32.gmra.mrb[26].mxu1 %vm233_vm0, %v8476_v50 }
 0x797   : > { %15880 = vmatprep.mubr.msk.f32.mxu1 %vm233_vm0, %v18701_v51  ;;  %v8623_v51 = vld [vmem:[#allocation2 + $0x81] sm:$0xff] }
 0x79a   : > { %15881 = vmatmul.mubr.msk.f32.vlgmr.msra.gmra.mrb[20].mxu1 %vm233_vm0, %v18710_v19 }
 0x79b   : > { %16617 = vmatpush3.bf16.msra.mxu1 %v16614_v46  ;;  %15883 = vmatprep.mubr.msk.f32.mxu1 %vm233_vm0, %v18719_v32 }
 0x79c   : > { %16619 = vmatprep.subr.bf16.mxu1 %v16618_v59 }
 0x79e   : > { %15884 = vmatmul.mubr.msk.f32.gmra.mrb[22].mxu1 %vm233_vm0, %v18726_v43 }
 0x79f   : > { %15886 = vmatprep.mubr.msk.f32.mxu1 %vm233_vm0, %v18730_v37 }
 0x7a2   : > { %15887 = vmatmul.mubr.msk.f32.gmra.mrb[24].mxu1 %vm233_vm0, %v18734_v56 }
 0x7a3   : > { %15889 = vmatprep.mubr.msk.f32.mxu1 %vm233_vm0, %v18740_v2 }
 0x7a6   : > { %15890 = vmatmul.mubr.msk.f32.gmra.mrb[26].mxu1 %vm233_vm0, %v8623_v51 }
 0x7a7   : > { %15896 = vmatprep.mubr.msk.f32.mxu1 %vm233_vm0, %v8323_v10  ;;  %v16626_v10 = vpack.c.bf16 %v9213_v23, %v9212_v5 }
 0x7aa   : > { %15897 = vmatmul.mubr.msk.f32.vlgmr.msra.gmra.mrb[20].mxu1 %vm233_vm0, %v18776_v29 }
 0x7ab   : > { %16621 = vmatpush3.bf16.msra.mxu1 %v16618_v59  ;;  %15899 = vmatprep.mubr.msk.f32.mxu1 %vm233_vm0, %v18780_v30 }
 0x7ac   : > { %16623 = vmatprep.subr.bf16.mxu1 %v16622_v52 }
 0x7ae   : > { %15900 = vmatmul.mubr.msk.f32.gmra.mrb[22].mxu1 %vm233_vm0, %v18784_v26 }
 0x7af   : > { %15902 = vmatprep.mubr.msk.f32.mxu1 %vm233_vm0, %v18788_v6 }
 0x7b2   : > { %15903 = vmatmul.mubr.msk.f32.gmra.mrb[24].mxu1 %vm233_vm0, %v18792_v60 }
 0x7b3   : > { %15905 = vmatprep.mubr.msk.f32.mxu1 %vm233_vm0, %v18796_v38 }
 0x7b6   : > { %15906 = vmatmul.mubr.msk.f32.gmra.mrb[26].mxu1 %vm233_vm0, %v8770_v24 }
 0x7b7   : > { %15912 = vmatprep.mubr.msk.f32.mxu1 %vm233_vm0, %v18747_v58 }
 0x7ba   : > { %15913 = vmatmul.mubr.msk.f32.vlgmr.msra.gmra.mrb[20].mxu1 %vm233_vm0, %v18751_v4 }
 0x7bb   : > { %16625 = vmatpush3.bf16.msra.mxu1 %v16622_v52  ;;  %15915 = vmatprep.mubr.msk.f32.mxu1 %vm233_vm0, %v18755_v27 }
 0x7bc   : > { %v15667_v39 = vpop.f32.mrb[18].mxu1  ;;  %16627 = vmatprep.subr.bf16.mxu1 %v16626_v10 }
 0x7bd   : > { %v6697_v1 = vadd.f32 %v15667_v39, %v13827_v11  ;;  %v6680_v46 = vpop.f32.mrb[19].mxu1 }
 0x7be   : > { %v6696_v57 = vadd.f32 %v13827_v11, %v6680_v46  ;;  %15916 = vmatmul.mubr.msk.f32.gmra.mrb[22].mxu1 %vm233_vm0, %v18759_v31 }
 0x7bf   : > { %v18853_v42 = vadd.f32 %v6697_v1, %v18026_v3  ;;  %15918 = vmatprep.mubr.msk.f32.mxu1 %vm233_vm0, %v18763_v9  ;;  %v18890_v3 = vld [vmem:[#allocation2 + $0x91] sm:$0xff] }
 0x7c0   : > { %v18856_v58 = vadd.f32 %v6696_v57, %v18024_v62  ;;  %v18873_v62 = vld [vmem:[#allocation2 + $0x90] sm:$0xff] }
 0x7c1   : > { %12046 = vst.msk [vmem:[#allocation3 - $0x3] sm:$0x8] %vm5620_vm4, %v18853_v42 }
 0x7c2   : > { %12045 = vst.msk [vmem:[#allocation3 + $0x9] sm:$0xf] %vm5618_vm3, %v18853_v42  ;;  %15919 = vmatmul.mubr.msk.f32.gmra.mrb[24].mxu1 %vm233_vm0, %v18769_v7 }
 0x7c3   : > { %12047 = vst.msk [vmem:[#allocation3 + $0xd] sm:$0x1] %vm5622_vm5, %v18856_v58  ;;  %15921 = vmatprep.mubr.msk.f32.mxu1 %vm233_vm0, %v8476_v50 }
 0x7c4   : > { %12044 = vst.msk [vmem:[#allocation3 + $0x1] sm:$0xff] %vm233_vm0, %v18856_v58 }
 0x7c6   : > { %15922 = vmatmul.mubr.msk.f32.gmra.mrb[26].mxu1 %vm233_vm0, %v18873_v62 }
 0x7c7   : > { %15928 = vmatprep.mubr.msk.f32.mxu1 %vm233_vm0, %v18710_v19  ;;  %v18907_v19 = vld [vmem:[#allocation2 + $0x92] sm:$0xff] }
 0x7ca   : > { %15929 = vmatmul.mubr.msk.f32.vlgmr.msra.gmra.mrb[20].mxu1 %vm233_vm0, %v18719_v32  ;;  %v9388_v32 = vld [vmem:[#allocation4 + $0x420] sm:$0xff] }
 0x7cb   : > { %16629 = vmatpush3.bf16.msra.mxu1 %v16626_v10  ;;  %15931 = vmatprep.mubr.msk.f32.mxu1 %vm233_vm0, %v18726_v43  ;;  %v9389_v43 = vld [vmem:[#allocation4 + $0x428] sm:$0xff] }
 0x7ce   : > { %15932 = vmatmul.mubr.msk.f32.gmra.mrb[22].mxu1 %vm233_vm0, %v18730_v37  ;;  %v16634_v37 = vpack.c.bf16 %v9389_v43, %v9388_v32 }
 0x7cf   : > { %15934 = vmatprep.mubr.msk.f32.mxu1 %vm233_vm0, %v18734_v56  ;;  %v13973_v56 = vld [vmem:[%s19468_s3 + $0x9] ss:$0 sm:$0xff] }
 0x7d0   : > { %16635 = vmatprep.subr.bf16.mxu0 %v16634_v37 }
 0x7d2   : > { %15935 = vmatmul.mubr.msk.f32.gmra.mrb[24].mxu1 %vm233_vm0, %v18740_v2 }
 0x7d3   : > { %15937 = vmatprep.mubr.msk.f32.mxu1 %vm233_vm0, %v8623_v51  ;;  %v9666_v51 = vld [vmem:[#allocation4 + $0x440] sm:$0xff] }
 0x7d4   : > { %v16638_v23 = vpack.c.bf16 %v9667_v15, %v9666_v51 }
 0x7d6   : > { %15938 = vmatmul.mubr.msk.f32.gmra.mrb[26].mxu1 %vm233_vm0, %v18890_v3 }
 0x7d7   : > { %15944 = vmatprep.mubr.msk.f32.mxu1 %vm233_vm0, %v18776_v29 }
 0x7da   : > { %15945 = vmatmul.mubr.msk.f32.vlgmr.msra.gmra.mrb[20].mxu1 %vm233_vm0, %v18780_v30 }
 0x7db   : > { %15947 = vmatprep.mubr.msk.f32.mxu1 %vm233_vm0, %v18784_v26 }
 0x7de   : > { %15948 = vmatmul.mubr.msk.f32.gmra.mrb[22].mxu1 %vm233_vm0, %v18788_v6 }
 0x7df   : > { %15950 = vmatprep.mubr.msk.f32.mxu1 %vm233_vm0, %v18792_v60 }
 0x7e2   : > { %15951 = vmatmul.mubr.msk.f32.gmra.mrb[24].mxu1 %vm233_vm0, %v18796_v38 }
 0x7e3   : > { %15953 = vmatprep.mubr.msk.f32.mxu1 %vm233_vm0, %v8770_v24 }
 0x7e6   : > { %15954 = vmatmul.mubr.msk.f32.gmra.mrb[26].mxu1 %vm233_vm0, %v18907_v19 }
 0x7e7   : > { %16104 = vmatprep.mubr.msk.f32.mxu1 %vm233_vm0, %v18654_v35 }
 0x8ad   : > { %v15946_v2 = vpop.f32.mrb[20].mxu1 }
 0x8ae   : > { %v9357_v4 = vadd.f32 %v15946_v2, %v13973_v56  ;;  %v9304_v27 = vpop.f32.mrb[21].mxu1 }
 0x8af   : > { %v9356_v31 = vadd.f32 %v13973_v56, %v9304_v27  ;;  %v9813_v27 = vld [vmem:[#allocation4 + $0x450] sm:$0xff] }
 0x8b0   : > { %v9365_v9 = vmax.f32 %v9357_v4, 0.0 }
 0x8b1   : > { %v9364_v7 = vmax.f32 %v9356_v31, 0.0  ;;  %v15949_v29 = vpop.f32.mrb[22].mxu1  ;;  %v9814_v31 = vld [vmem:[#allocation4 + $0x458] sm:$0xff] }
 0x8b2   : > { %9373 = vst.msk [vmem:[#allocation2 + $0x21] sm:$0xff] %vm233_vm0, %v9365_v9  ;;  %v9359_v30 = vadd.f32 %v15949_v29, %v13973_v56  ;;  %v9314_v26 = vpop.f32.mrb[23].mxu1  ;;  %v16642_v9 = vpack.c.bf16 %v9814_v31, %v9813_v27 }
 0x8b3   : > { %9372 = vst.msk [vmem:[#allocation2 + $0x11] sm:$0xff] %vm233_vm0, %v9364_v7  ;;  %v9358_v35 = vadd.f32 %v13973_v56, %v9314_v26 }
 0x8b4   : > { %v9367_v6 = vmax.f32 %v9359_v30, 0.0 }
 0x8b5   : > { %v9366_v60 = vmax.f32 %v9358_v35, 0.0  ;;  %v15952_v38 = vpop.f32.mrb[24].mxu1 }
 0x8b6   : > { %9375 = vst.msk [vmem:[#allocation2 + $0x41] sm:$0xff] %vm233_vm0, %v9367_v6  ;;  %v9361_v50 = vadd.f32 %v15952_v38, %v13973_v56  ;;  %v9324_v59 = vpop.f32.mrb[25].mxu1  ;;  %v9960_v38 = vld [vmem:[#allocation4 + $0x460] sm:$0xff] }
 0x8b7   : > { %9374 = vst.msk [vmem:[#allocation2 + $0x31] sm:$0xff] %vm233_vm0, %v9366_v60  ;;  %v9360_v16 = vadd.f32 %v13973_v56, %v9324_v59 }
 0x8b8   : > { %v9369_v52 = vmax.f32 %v9361_v50, 0.0  ;;  %v9961_v50 = vld [vmem:[#allocation4 + $0x468] sm:$0xff] }
 0x8b9   : > { %v9368_v24 = vmax.f32 %v9360_v16, 0.0  ;;  %v15955_v5 = vpop.f32.mrb[26].mxu1  ;;  %v18926_v46 = vld [vmem:[#allocation2 + $0x21] sm:$0xff]  ;;  %v16646_v59 = vpack.c.bf16 %v9961_v50, %v9960_v38  ;;  %v10734_v16 = vld [vmem:[#allocation4 + $0x4c0] sm:$0xff] }
 0x8ba   : > { %9377 = vst.msk [vmem:[#allocation2 + $0x61] sm:$0xff] %vm233_vm0, %v9369_v52  ;;  %v9363_v11 = vadd.f32 %v15955_v5, %v13973_v56  ;;  %v9334_v10 = vpop.f32.mrb[27].mxu1  ;;  %v18921_v39 = vld [vmem:[#allocation2 + $0x11] sm:$0xff]  ;;  %v18955_v29 = vld [vmem:[#allocation2 + $0x20] sm:$0xff] }
 0x8bb   : > { %9376 = vst.msk [vmem:[#allocation2 + $0x51] sm:$0xff] %vm233_vm0, %v9368_v24  ;;  %v9362_v1 = vadd.f32 %v13973_v56, %v9334_v10  ;;  %15961 = vmatmul.mubr.msk.f32.vlgmr.msra.gmra.mrb[28].mxu0 %vm233_vm0, %v18921_v39  ;;  %v9381_v7 = vld [vmem:[#allocation2 + $0x10] sm:$0xff]  ;;  %v18982_v15 = vld [vmem:[#allocation2 + $0x22] sm:$0xff]  ;;  %v10735_v52 = vld [vmem:[#allocation4 + $0x4c8] sm:$0xff] }
 0x8bc   : > { %v9371_v57 = vmax.f32 %v9363_v11, 0.0  ;;  %16637 = vmatpush3.bf16.msra.mxu0 %v16634_v37  ;;  %15963 = vmatprep.mubr.msk.f32.mxu0 %vm233_vm0, %v18926_v46  ;;  %v9659_v51 = vld [vmem:[#allocation2 + $0x12] sm:$0xff]  ;;  %v16666_v24 = vpack.c.bf16 %v10735_v52, %v10734_v16  ;;  %v10401_v50 = vld [vmem:[#allocation4 + $0x490] sm:$0xff] }
 0x8bd   : > { %v9370_v32 = vmax.f32 %v9362_v1, 0.0  ;;  %16639 = vmatprep.subr.bf16.mxu0 %v16638_v23  ;;  %v18936_v56 = vld [vmem:[#allocation2 + $0x41] sm:$0xff]  ;;  %v10548_v52 = vld [vmem:[#allocation4 + $0x4a0] sm:$0xff] }
 0x8be   : > { %9379 = vst.msk [vmem:[#allocation2 + $0x81] sm:$0xff] %vm233_vm0, %v9371_v57  ;;  %v18931_v43 = vld [vmem:[#allocation2 + $0x31] sm:$0xff]  ;;  %v18963_v26 = vld [vmem:[#allocation2 + $0x40] sm:$0xff]  ;;  %16667 = vmatprep.subr.bf16.mxu1 %v16666_v24 }
 0x8bf   : > { %9378 = vst.msk [vmem:[#allocation2 + $0x71] sm:$0xff] %vm233_vm0, %v9370_v32  ;;  %15964 = vmatmul.mubr.msk.f32.gmra.mrb[30].mxu0 %vm233_vm0, %v18931_v43  ;;  %v18959_v30 = vld [vmem:[#allocation2 + $0x30] sm:$0xff]  ;;  %16669 = vmatpush3.bf16.msra.mxu1 %v16666_v24  ;;  %v10107_v57 = vld [vmem:[#allocation4 + $0x470] sm:$0xff]  ;;  %v10108_v32 = vld [vmem:[#allocation4 + $0x478] sm:$0xff] }
 0x8c0   : > { %15966 = vmatprep.mubr.msk.f32.mxu0 %vm233_vm0, %v18936_v56  ;;  %v18986_v5 = vld [vmem:[#allocation2 + $0x32] sm:$0xff]  ;;  %v16650_v27 = vpack.c.bf16 %v10108_v32, %v10107_v57  ;;  %v12055_v32 = vld [vmem:[#allocation4 + $0x558] sm:$0xff] }
 0x8c1   : > { %v18944_v2 = vld [vmem:[#allocation2 + $0x61] sm:$0xff]  ;;  %v10549_v24 = vld [vmem:[#allocation4 + $0x4a8] sm:$0xff] }
 0x8c2   : > { %v18940_v37 = vld [vmem:[#allocation2 + $0x51] sm:$0xff]  ;;  %v18971_v6 = vld [vmem:[#allocation2 + $0x60] sm:$0xff]  ;;  %v16662_v57 = vpack.c.bf16 %v10549_v24, %v10548_v52 }
 0x8c3   : > { %15967 = vmatmul.mubr.msk.f32.gmra.mrb[32].mxu0 %vm233_vm0, %v18940_v37  ;;  %v18967_v35 = vld [vmem:[#allocation2 + $0x50] sm:$0xff]  ;;  %v18998_v10 = vld [vmem:[#allocation2 + $0x62] sm:$0xff] }
 0x8c4   : > { %15969 = vmatprep.mubr.msk.f32.mxu0 %vm233_vm0, %v18944_v2  ;;  %v18994_v11 = vld [vmem:[#allocation2 + $0x52] sm:$0xff] }
 0x8c5   : > { %v9812_v31 = vld [vmem:[#allocation2 + $0x80] sm:$0xff] }
 0x8c6   : > { %v18948_v4 = vld [vmem:[#allocation2 + $0x71] sm:$0xff] }
 0x8c7   : > { %15970 = vmatmul.mubr.msk.f32.gmra.mrb[34].mxu0 %vm233_vm0, %v18948_v4  ;;  %v18975_v60 = vld [vmem:[#allocation2 + $0x70] sm:$0xff] }
 0x8c8   : > { %15976 = vmatprep.mubr.msk.f32.mxu0 %vm233_vm0, %v18738_v44  ;;  %v19002_v1 = vld [vmem:[#allocation2 + $0x72] sm:$0xff] }
 0x8cb   : > { %15977 = vmatmul.mubr.msk.f32.vlgmr.msra.gmra.mrb[28].mxu0 %vm233_vm0, %v9381_v7 }
 0x8cc   : > { %16641 = vmatpush3.bf16.msra.mxu0 %v16638_v23  ;;  %15979 = vmatprep.mubr.msk.f32.mxu0 %vm233_vm0, %v18955_v29  ;;  %v18990_v23 = vld [vmem:[#allocation2 + $0x42] sm:$0xff] }
 0x8cd   : > { %16643 = vmatprep.subr.bf16.mxu0 %v16642_v9 }
 0x8cf   : > { %15980 = vmatmul.mubr.msk.f32.gmra.mrb[30].mxu0 %vm233_vm0, %v18959_v30 }
 0x8d0   : > { %15982 = vmatprep.mubr.msk.f32.mxu0 %vm233_vm0, %v18963_v26 }
 0x8d3   : > { %15983 = vmatmul.mubr.msk.f32.gmra.mrb[32].mxu0 %vm233_vm0, %v18967_v35 }
 0x8d4   : > { %15985 = vmatprep.mubr.msk.f32.mxu0 %vm233_vm0, %v18971_v6 }
 0x8d7   : > { %15986 = vmatmul.mubr.msk.f32.gmra.mrb[34].mxu0 %vm233_vm0, %v18975_v60 }
 0x8d8   : > { %15992 = vmatprep.mubr.msk.f32.mxu0 %vm233_vm0, %v18767_v47 }
 0x8db   : > { %15993 = vmatmul.mubr.msk.f32.vlgmr.msra.gmra.mrb[28].mxu0 %vm233_vm0, %v9659_v51 }
 0x8dc   : > { %16645 = vmatpush3.bf16.msra.mxu0 %v16642_v9  ;;  %15995 = vmatprep.mubr.msk.f32.mxu0 %vm233_vm0, %v18982_v15  ;;  %v10254_v9 = vld [vmem:[#allocation4 + $0x480] sm:$0xff] }
 0x8dd   : > { %16647 = vmatprep.subr.bf16.mxu0 %v16646_v59 }
 0x8df   : > { %15996 = vmatmul.mubr.msk.f32.gmra.mrb[30].mxu0 %vm233_vm0, %v18986_v5 }
 0x8e0   : > { %15998 = vmatprep.mubr.msk.f32.mxu0 %vm233_vm0, %v18990_v23 }
 0x8e3   : > { %15999 = vmatmul.mubr.msk.f32.gmra.mrb[32].mxu0 %vm233_vm0, %v18994_v11 }
 0x8e4   : > { %16001 = vmatprep.mubr.msk.f32.mxu0 %vm233_vm0, %v18998_v10 }
 0x8e7   : > { %16002 = vmatmul.mubr.msk.f32.gmra.mrb[34].mxu0 %vm233_vm0, %v19002_v1 }
 0x8e8   : > { %16008 = vmatprep.mubr.msk.f32.mxu0 %vm233_vm0, %v9381_v7  ;;  %v10255_v7 = vld [vmem:[#allocation4 + $0x488] sm:$0xff] }
 0x8e9   : > { %v16654_v38 = vpack.c.bf16 %v10255_v7, %v10254_v9 }
 0x8eb   : > { %16009 = vmatmul.mubr.msk.f32.vlgmr.msra.gmra.mrb[28].mxu0 %vm233_vm0, %v18955_v29 }
 0x8ec   : > { %16649 = vmatpush3.bf16.msra.mxu0 %v16646_v59  ;;  %16011 = vmatprep.mubr.msk.f32.mxu0 %vm233_vm0, %v18959_v30  ;;  %v10402_v59 = vld [vmem:[#allocation4 + $0x498] sm:$0xff] }
 0x8ed   : > { %16651 = vmatprep.subr.bf16.mxu0 %v16650_v27  ;;  %v16658_v16 = vpack.c.bf16 %v10402_v59, %v10401_v50 }
 0x8ef   : > { %16012 = vmatmul.mubr.msk.f32.gmra.mrb[30].mxu0 %vm233_vm0, %v18963_v26 }
 0x8f0   : > { %16014 = vmatprep.mubr.msk.f32.mxu0 %vm233_vm0, %v18967_v35 }
 0x8f3   : > { %16015 = vmatmul.mubr.msk.f32.gmra.mrb[32].mxu0 %vm233_vm0, %v18971_v6 }
 0x8f4   : > { %16017 = vmatprep.mubr.msk.f32.mxu0 %vm233_vm0, %v18975_v60 }
 0x8f7   : > { %16018 = vmatmul.mubr.msk.f32.gmra.mrb[34].mxu0 %vm233_vm0, %v9812_v31 }
 0x8f8   : > { %16024 = vmatprep.mubr.msk.f32.mxu0 %vm233_vm0, %v18921_v39  ;;  %v9959_v39 = vld [vmem:[#allocation2 + $0x81] sm:$0xff] }
 0x8fb   : > { %16025 = vmatmul.mubr.msk.f32.vlgmr.msra.gmra.mrb[28].mxu0 %vm233_vm0, %v18926_v46 }
 0x8fc   : > { %16653 = vmatpush3.bf16.msra.mxu0 %v16650_v27  ;;  %16027 = vmatprep.mubr.msk.f32.mxu0 %vm233_vm0, %v18931_v43 }
 0x8fd   : > { %16655 = vmatprep.subr.bf16.mxu0 %v16654_v38 }
 0x8ff   : > { %16028 = vmatmul.mubr.msk.f32.gmra.mrb[30].mxu0 %vm233_vm0, %v18936_v56 }
 0x900   : > { %16030 = vmatprep.mubr.msk.f32.mxu0 %vm233_vm0, %v18940_v37 }
 0x903   : > { %16031 = vmatmul.mubr.msk.f32.gmra.mrb[32].mxu0 %vm233_vm0, %v18944_v2 }
 0x904   : > { %16033 = vmatprep.mubr.msk.f32.mxu0 %vm233_vm0, %v18948_v4 }
 0x907   : > { %16034 = vmatmul.mubr.msk.f32.gmra.mrb[34].mxu0 %vm233_vm0, %v9959_v39 }
 0x908   : > { %16040 = vmatprep.mubr.msk.f32.mxu0 %vm233_vm0, %v9659_v51  ;;  %v10106_v51 = vld [vmem:[#allocation2 + $0x82] sm:$0xff] }
 0x90b   : > { %16041 = vmatmul.mubr.msk.f32.vlgmr.msra.gmra.mrb[28].mxu0 %vm233_vm0, %v18982_v15 }
 0x90c   : > { %16657 = vmatpush3.bf16.msra.mxu0 %v16654_v38  ;;  %16043 = vmatprep.mubr.msk.f32.mxu0 %vm233_vm0, %v18986_v5 }
 0x90d   : > { %16659 = vmatprep.subr.bf16.mxu0 %v16658_v16 }
 0x90f   : > { %16044 = vmatmul.mubr.msk.f32.gmra.mrb[30].mxu0 %vm233_vm0, %v18990_v23 }
 0x910   : > { %16046 = vmatprep.mubr.msk.f32.mxu0 %vm233_vm0, %v18994_v11 }
 0x913   : > { %16047 = vmatmul.mubr.msk.f32.gmra.mrb[32].mxu0 %vm233_vm0, %v18998_v10 }
 0x914   : > { %16049 = vmatprep.mubr.msk.f32.mxu0 %vm233_vm0, %v19002_v1 }
 0x917   : > { %16050 = vmatmul.mubr.msk.f32.gmra.mrb[34].mxu0 %vm233_vm0, %v10106_v51 }
 0x918   : > { %16056 = vmatprep.mubr.msk.f32.mxu0 %vm233_vm0, %v18955_v29  ;;  %v12054_v29 = vld [vmem:[#allocation4 + $0x550] sm:$0xff] }
 0x91b   : > { %16057 = vmatmul.mubr.msk.f32.vlgmr.msra.gmra.mrb[28].mxu0 %vm233_vm0, %v18959_v30  ;;  %v16702_v30 = vpack.c.bf16 %v12055_v32, %v12054_v29 }
 0x91c   : > { %16661 = vmatpush3.bf16.msra.mxu0 %v16658_v16  ;;  %16059 = vmatprep.mubr.msk.f32.mxu0 %vm233_vm0, %v18963_v26  ;;  %v12051_v26 = vld [vmem:[#allocation4 + $0x548] sm:$0xff] }
 0x91d   : > { %16663 = vmatprep.subr.bf16.mxu0 %v16662_v57 }
 0x91f   : > { %16060 = vmatmul.mubr.msk.f32.gmra.mrb[30].mxu0 %vm233_vm0, %v18967_v35  ;;  %v12053_v35 = vld [vmem:[#allocation3 + $0x9] sm:$0xf] }
 0x920   : > { %16062 = vmatprep.mubr.msk.f32.mxu0 %vm233_vm0, %v18971_v6  ;;  %v12048_v6 = vld [vmem:[#allocation3] sm:$0xff] }
 0x923   : > { %16063 = vmatmul.mubr.msk.f32.gmra.mrb[32].mxu0 %vm233_vm0, %v18975_v60  ;;  %v12049_v60 = vld [vmem:[#allocation3 + $0x8] sm:$0xf] }
 0x924   : > { %16065 = vmatprep.mubr.msk.f32.mxu0 %vm233_vm0, %v9812_v31 }
 0x927   : > { %16066 = vmatmul.mubr.msk.f32.gmra.mrb[34].mxu0 %vm233_vm0, %v18873_v62 }
 0x928   : > { %16072 = vmatprep.mubr.msk.f32.mxu0 %vm233_vm0, %v18926_v46  ;;  %v12050_v46 = vld [vmem:[#allocation4 + $0x540] sm:$0xff] }
 0x92b   : > { %16073 = vmatmul.mubr.msk.f32.vlgmr.msra.gmra.mrb[28].mxu0 %vm233_vm0, %v18931_v43  ;;  %v16706_v43 = vpack.c.bf16 %v12051_v26, %v12050_v46 }
 0x92c   : > { %16665 = vmatpush3.bf16.msra.mxu0 %v16662_v57  ;;  %16075 = vmatprep.mubr.msk.f32.mxu0 %vm233_vm0, %v18936_v56  ;;  %v12220_v56 = vld [vmem:[#allocation4 + $0x560] sm:$0xff] }
 0x92d   : > { %16703 = vmatprep.subr.bf16.mxu0 %v16702_v30 }
 0x92f   : > { %16076 = vmatmul.mubr.msk.f32.gmra.mrb[30].mxu0 %vm233_vm0, %v18940_v37  ;;  %v12221_v37 = vld [vmem:[#allocation4 + $0x568] sm:$0xff] }
 0x930   : > { %16078 = vmatprep.mubr.msk.f32.mxu0 %vm233_vm0, %v18944_v2  ;;  %v12052_v2 = vld [vmem:[#allocation3 + $0x1] sm:$0xff] }
 0x933   : > { %16079 = vmatmul.mubr.msk.f32.gmra.mrb[32].mxu0 %vm233_vm0, %v18948_v4  ;;  %v16710_v4 = vpack.c.bf16 %v12221_v37, %v12220_v56  ;;  %v11150_v56 = vld [vmem:[#allocation4 + $0x4e8] sm:$0xff] }
 0x934   : > { %16081 = vmatprep.mubr.msk.f32.mxu0 %vm233_vm0, %v9959_v39 }
 0x937   : > { %16082 = vmatmul.mubr.msk.f32.gmra.mrb[34].mxu0 %vm233_vm0, %v18890_v3 }
 0x938   : > { %16088 = vmatprep.mubr.msk.f32.mxu0 %vm233_vm0, %v18982_v15  ;;  %v12218_v15 = vld [vmem:[#allocation3 + $0x2] sm:$0xff] }
 0x93b   : > { %16089 = vmatmul.mubr.msk.f32.vlgmr.msra.gmra.mrb[28].mxu0 %vm233_vm0, %v18986_v5  ;;  %v12219_v5 = vld [vmem:[#allocation3 + $0xa] sm:$0xf] }
 0x93c   : > { %16091 = vmatprep.mubr.msk.f32.mxu0 %vm233_vm0, %v18990_v23  ;;  %16705 = vmatpush3.bf16.msra.mxu0 %v16702_v30  ;;  %v10724_v23 = vld [vmem:[#allocation4 + $0x4b0] sm:$0xff] }
 0x93d   : > { %16707 = vmatprep.subr.bf16.mxu0 %v16706_v43 }
 0x93f   : > { %16092 = vmatmul.mubr.msk.f32.gmra.mrb[30].mxu0 %vm233_vm0, %v18994_v11  ;;  %v10725_v11 = vld [vmem:[#allocation4 + $0x4b8] sm:$0xff] }
 0x940   : > { %16094 = vmatprep.mubr.msk.f32.mxu0 %vm233_vm0, %v18998_v10  ;;  %v16670_v10 = vpack.c.bf16 %v10725_v11, %v10724_v23 }
 0x942   : > { %16671 = vmatprep.subr.bf16.mxu1 %v16670_v10 }
 0x943   : > { %16095 = vmatmul.mubr.msk.f32.gmra.mrb[32].mxu0 %vm233_vm0, %v19002_v1  ;;  %v14046_v1 = vld [vmem:[%s19468_s3 + $0xa] ss:$0 sm:$0xff] }
 0x944   : > { %16097 = vmatprep.mubr.msk.f32.mxu0 %vm233_vm0, %v10106_v51 }
 0x947   : > { %16098 = vmatmul.mubr.msk.f32.gmra.mrb[34].mxu0 %vm233_vm0, %v18907_v19 }
 0x948   : > { %16248 = vmatprep.mubr.msk.f32.mxu0 %vm233_vm0, %v12052_v2 }
 0x94b   : > { %16249 = vmatmul.mubr.msk.f32.vlgmr.msra.gmra.mrb[36].mxu0 %vm233_vm0, %v12053_v35  ;;  %v14126_v35 = vld [vmem:[%s19468_s3 + $0xc] ss:$0 sm:$0xff] }
 0x94c   : > { %16255 = vmatprep.mubr.msk.f32.mxu0 %vm233_vm0, %v12048_v6  ;;  %16709 = vmatpush3.bf16.msra.mxu0 %v16706_v43 }
 0x94d   : > { %16711 = vmatprep.subr.bf16.mxu0 %v16710_v4 }
 0x953   : > { %16256 = vmatmul.mubr.msk.f32.vlgmr.msra.gmra.mrb[36].mxu0 %vm233_vm0, %v12049_v60 }
 0x954   : > { %16262 = vmatprep.mubr.msk.f32.mxu0 %vm233_vm0, %v12218_v15  ;;  %16713 = vmatpush3.bf16.msra.mxu0 %v16710_v4 }
 0x95b   : > { %16263 = vmatmul.mubr.msk.f32.vlgmr.msra.gmra.mrb[36].mxu0 %vm233_vm0, %v12219_v5 }
 0xa0e   : > { %v16090_v27 = vpop.f32.mrb[28].mxu0 }
 0xa0f   : > { %v10693_v31 = vadd.f32 %v16090_v27, %v14046_v1  ;;  %v10640_v9 = vpop.f32.mrb[29].mxu0 }
 0xa10   : > { %v10692_v7 = vadd.f32 %v14046_v1, %v10640_v9  ;;  %v11296_v9 = vld [vmem:[#allocation4 + $0x4f0] sm:$0xff] }
 0xa11   : > { %v10701_v38 = vadd.f32 %v10693_v31, %v8029_v13  ;;  %v11002_v13 = vld [vmem:[#allocation4 + $0x4d0] sm:$0xff] }
 0xa12   : > { %v10700_v39 = vadd.f32 %v10692_v7, %v8028_v55  ;;  %v16093_v50 = vpop.f32.mrb[30].mxu0  ;;  %v11003_v55 = vld [vmem:[#allocation4 + $0x4d8] sm:$0xff] }
 0xa13   : > { %10709 = vst.msk [vmem:[#allocation2 + $0x21] sm:$0xff] %vm233_vm0, %v10701_v38  ;;  %v10695_v59 = vadd.f32 %v16093_v50, %v14046_v1  ;;  %v10650_v16 = vpop.f32.mrb[31].mxu0  ;;  %v16674_v30 = vpack.c.bf16 %v11003_v55, %v11002_v13  ;;  %v11297_v7 = vld [vmem:[#allocation4 + $0x4f8] sm:$0xff]  ;;  %v11590_v13 = vld [vmem:[#allocation4 + $0x510] sm:$0xff] }
 0xa14   : > { %10708 = vst.msk [vmem:[#allocation2 + $0x11] sm:$0xff] %vm233_vm0, %v10700_v39  ;;  %v10694_v51 = vadd.f32 %v14046_v1, %v10650_v16  ;;  %v16682_v38 = vpack.c.bf16 %v11297_v7, %v11296_v9  ;;  %v11591_v55 = vld [vmem:[#allocation4 + $0x518] sm:$0xff] }
 0xa15   : > { %v10703_v52 = vadd.f32 %v10695_v59, %v8031_v17 }
 0xa16   : > { %v10702_v24 = vadd.f32 %v10694_v51, %v8030_v14  ;;  %v16096_v57 = vpop.f32.mrb[32].mxu0 }
 0xa17   : > { %10711 = vst.msk [vmem:[#allocation2 + $0x41] sm:$0xff] %vm233_vm0, %v10703_v52  ;;  %v10697_v25 = vadd.f32 %v16096_v57, %v14046_v1  ;;  %v10660_v12 = vpop.f32.mrb[33].mxu0  ;;  %v11444_v57 = vld [vmem:[#allocation4 + $0x508] sm:$0xff] }
 0xa18   : > { %10710 = vst.msk [vmem:[#allocation2 + $0x31] sm:$0xff] %vm233_vm0, %v10702_v24  ;;  %v10696_v29 = vadd.f32 %v14046_v1, %v10660_v12  ;;  %v11443_v24 = vld [vmem:[#allocation4 + $0x500] sm:$0xff] }
 0xa19   : > { %v10705_v32 = vadd.f32 %v10697_v25, %v8033_v48  ;;  %v16686_v25 = vpack.c.bf16 %v11444_v57, %v11443_v24  ;;  %v12760_v24 = vld [vmem:[#allocation4 + $0x5c0] sm:$0xff]  ;;  %v12761_v57 = vld [vmem:[#allocation4 + $0x5c8] sm:$0xff] }
 0xa1a   : > { %v10704_v41 = vadd.f32 %v10696_v29, %v8032_v18  ;;  %v16099_v17 = vpop.f32.mrb[34].mxu0  ;;  %v19125_v43 = vld [vmem:[#allocation2 + $0x21] sm:$0xff]  ;;  %v16690_v29 = vpack.c.bf16 %v11591_v55, %v11590_v13  ;;  %v16734_v13 = vpack.c.bf16 %v12761_v57, %v12760_v24 }
 0xa1b   : > { %10713 = vst.msk [vmem:[#allocation2 + $0x61] sm:$0xff] %vm233_vm0, %v10705_v32  ;;  %v10699_v36 = vadd.f32 %v16099_v17, %v14046_v1  ;;  %v10670_v14 = vpop.f32.mrb[35].mxu0  ;;  %v19120_v46 = vld [vmem:[#allocation2 + $0x11] sm:$0xff]  ;;  %v19158_v4 = vld [vmem:[#allocation2 + $0x20] sm:$0xff] }
 0xa1c   : > { %10712 = vst.msk [vmem:[#allocation2 + $0x51] sm:$0xff] %vm233_vm0, %v10704_v41  ;;  %v10698_v26 = vadd.f32 %v14046_v1, %v10670_v14  ;;  %16105 = vmatmul.mubr.msk.f32.vlgmr.msra.gmra.mrb[28].mxu1 %vm233_vm0, %v19120_v46  ;;  %v10717_v2 = vld [vmem:[#allocation2 + $0x10] sm:$0xff]  ;;  %v19200_v50 = vld [vmem:[#allocation2 + $0x22] sm:$0xff]  ;;  %v11738_v17 = vld [vmem:[#allocation4 + $0x528] sm:$0xff] }
 0xa1d   : > { %v10707_v63 = vadd.f32 %v10699_v36, %v8035_v21  ;;  %16673 = vmatpush3.bf16.msra.mxu1 %v16670_v10  ;;  %16107 = vmatprep.mubr.msk.f32.mxu1 %vm233_vm0, %v19125_v43  ;;  %v10995_v39 = vld [vmem:[#allocation2 + $0x12] sm:$0xff]  ;;  %v11884_v14 = vld [vmem:[#allocation4 + $0x530] sm:$0xff] }
 0xa1e   : > { %v10706_v45 = vadd.f32 %v10698_v26, %v8034_v54  ;;  %16675 = vmatprep.subr.bf16.mxu1 %v16674_v30  ;;  %v19139_v18 = vld [vmem:[#allocation2 + $0x41] sm:$0xff]  ;;  %v11149_v54 = vld [vmem:[#allocation4 + $0x4e0] sm:$0xff] }
 0xa1f   : > { %10715 = vst.msk [vmem:[#allocation2 + $0x81] sm:$0xff] %vm233_vm0, %v10707_v63  ;;  %v19134_v48 = vld [vmem:[#allocation2 + $0x31] sm:$0xff]  ;;  %v16678_v37 = vpack.c.bf16 %v11150_v56, %v11149_v54  ;;  %v19169_v23 = vld [vmem:[#allocation2 + $0x40] sm:$0xff] }
 0xa20   : > { %10714 = vst.msk [vmem:[#allocation2 + $0x71] sm:$0xff] %vm233_vm0, %v10706_v45  ;;  %16108 = vmatmul.mubr.msk.f32.gmra.mrb[30].mxu1 %vm233_vm0, %v19134_v48  ;;  %v19165_v5 = vld [vmem:[#allocation2 + $0x30] sm:$0xff]  ;;  %v19208_v16 = vld [vmem:[#allocation2 + $0x42] sm:$0xff]  ;;  %v12325_v45 = vld [vmem:[#allocation4 + $0x588] sm:$0xff] }
 0xa21   : > { %16110 = vmatprep.mubr.msk.f32.mxu1 %vm233_vm0, %v19139_v18  ;;  %v19204_v59 = vld [vmem:[#allocation2 + $0x32] sm:$0xff] }
 0xa22   : > { %v19147_v8 = vld [vmem:[#allocation2 + $0x61] sm:$0xff]  ;;  %v11737_v41 = vld [vmem:[#allocation4 + $0x520] sm:$0xff] }
 0xa23   : > { %v19143_v49 = vld [vmem:[#allocation2 + $0x51] sm:$0xff]  ;;  %v19189_v27 = vld [vmem:[#allocation2 + $0x60] sm:$0xff] }
 0xa24   : > { %16111 = vmatmul.mubr.msk.f32.gmra.mrb[32].mxu1 %vm233_vm0, %v19143_v49  ;;  %v19181_v1 = vld [vmem:[#allocation2 + $0x50] sm:$0xff]  ;;  %v19216_v51 = vld [vmem:[#allocation2 + $0x62] sm:$0xff] }
 0xa25   : > { %16113 = vmatprep.mubr.msk.f32.mxu1 %vm233_vm0, %v19147_v8  ;;  %v12324_v63 = vld [vmem:[#allocation4 + $0x580] sm:$0xff] }
 0xa26   : > { %v11148_v12 = vld [vmem:[#allocation2 + $0x80] sm:$0xff]  ;;  %v16714_v54 = vpack.c.bf16 %v12325_v45, %v12324_v63 }
 0xa27   : > { %v19151_v21 = vld [vmem:[#allocation2 + $0x71] sm:$0xff]  ;;  %v11295_v32 = vld [vmem:[#allocation2 + $0x81] sm:$0xff] }
 0xa28   : > { %16114 = vmatmul.mubr.msk.f32.gmra.mrb[34].mxu1 %vm233_vm0, %v19151_v21  ;;  %v19193_v31 = vld [vmem:[#allocation2 + $0x70] sm:$0xff]  ;;  %v11442_v36 = vld [vmem:[#allocation2 + $0x82] sm:$0xff] }
 0xa29   : > { %16120 = vmatprep.mubr.msk.f32.mxu1 %vm233_vm0, %v18738_v44  ;;  %v19220_v52 = vld [vmem:[#allocation2 + $0x72] sm:$0xff] }
 0xa2c   : > { %16121 = vmatmul.mubr.msk.f32.vlgmr.msra.gmra.mrb[28].mxu1 %vm233_vm0, %v10717_v2 }
 0xa2d   : > { %16677 = vmatpush3.bf16.msra.mxu1 %v16674_v30  ;;  %16123 = vmatprep.mubr.msk.f32.mxu1 %vm233_vm0, %v19158_v4  ;;  %v16694_v30 = vpack.c.bf16 %v11738_v17, %v11737_v41 }
 0xa2e   : > { %v16264_v6 = vpop.f32.mrb[36].mxu0  ;;  %16679 = vmatprep.subr.bf16.mxu1 %v16678_v37 }
 0xa2f   : > { %v12311_v60 = vadd.f32 %v16264_v6, %v14126_v35  ;;  %v12294_v15 = vpop.f32.mrb[37].mxu0 }
 0xa30   : > { %v12310_v44 = vadd.f32 %v14126_v35, %v12294_v15  ;;  %16124 = vmatmul.mubr.msk.f32.gmra.mrb[30].mxu1 %vm233_vm0, %v19165_v5  ;;  %v12595_v35 = vld [vmem:[#allocation4 + $0x5b8] sm:$0xff]  ;;  %v12591_v15 = vld [vmem:[#allocation4 + $0x5a8] sm:$0xff] }
 0xa31   : > { %v19171_v11 = vmax.f32 %v12311_v60, 0.0  ;;  %16126 = vmatprep.mubr.msk.f32.mxu1 %vm233_vm0, %v19169_v23  ;;  %v12590_v60 = vld [vmem:[#allocation4 + $0x5a0] sm:$0xff] }
 0xa32   : > { %v19175_v10 = vmax.f32 %v12310_v44, 0.0 }
 0xa33   : > { %12315 = vst.msk [vmem:[#allocation3 + $0x9] sm:$0xf] %vm5618_vm3, %v19171_v11 }
 0xa34   : > { %12316 = vst.msk [vmem:[#allocation3 - $0x3] sm:$0x8] %vm5620_vm4, %v19171_v11  ;;  %16127 = vmatmul.mubr.msk.f32.gmra.mrb[32].mxu1 %vm233_vm0, %v19181_v1 }
 0xa35   : > { %12314 = vst.msk [vmem:[#allocation3 + $0x1] sm:$0xff] %vm233_vm0, %v19175_v10  ;;  %16129 = vmatprep.mubr.msk.f32.mxu1 %vm233_vm0, %v19189_v27 }
 0xa36   : > { %12317 = vst.msk [vmem:[#allocation3 + $0xd] sm:$0x1] %vm5622_vm5, %v19175_v10 }
 0xa38   : > { %16130 = vmatmul.mubr.msk.f32.gmra.mrb[34].mxu1 %vm233_vm0, %v19193_v31 }
 0xa39   : > { %16136 = vmatprep.mubr.msk.f32.mxu1 %vm233_vm0, %v18767_v47  ;;  %v19212_v47 = vld [vmem:[#allocation2 + $0x52] sm:$0xff] }
 0xa3c   : > { %16137 = vmatmul.mubr.msk.f32.vlgmr.msra.gmra.mrb[28].mxu1 %vm233_vm0, %v10995_v39  ;;  %v12318_v56 = vld [vmem:[#allocation3] sm:$0xff] }
 0xa3d   : > { %16681 = vmatpush3.bf16.msra.mxu1 %v16678_v37  ;;  %16139 = vmatprep.mubr.msk.f32.mxu1 %vm233_vm0, %v19200_v50  ;;  %v12319_v37 = vld [vmem:[#allocation3 + $0x8] sm:$0xf] }
 0xa3e   : > { %16683 = vmatprep.subr.bf16.mxu1 %v16682_v38 }
 0xa40   : > { %16140 = vmatmul.mubr.msk.f32.gmra.mrb[30].mxu1 %vm233_vm0, %v19204_v59 }
 0xa41   : > { %16142 = vmatprep.mubr.msk.f32.mxu1 %vm233_vm0, %v19208_v16 }
 0xa44   : > { %16143 = vmatmul.mubr.msk.f32.gmra.mrb[32].mxu1 %vm233_vm0, %v19212_v47 }
 0xa45   : > { %16145 = vmatprep.mubr.msk.f32.mxu1 %vm233_vm0, %v19216_v51 }
 0xa48   : > { %16146 = vmatmul.mubr.msk.f32.gmra.mrb[34].mxu1 %vm233_vm0, %v19220_v52 }
 0xa49   : > { %16152 = vmatprep.mubr.msk.f32.mxu1 %vm233_vm0, %v10717_v2  ;;  %v12488_v2 = vld [vmem:[#allocation3 + $0x2] sm:$0xff] }
 0xa4c   : > { %16153 = vmatmul.mubr.msk.f32.vlgmr.msra.gmra.mrb[28].mxu1 %vm233_vm0, %v19158_v4 }
 0xa4d   : > { %16685 = vmatpush3.bf16.msra.mxu1 %v16682_v38  ;;  %16155 = vmatprep.mubr.msk.f32.mxu1 %vm233_vm0, %v19165_v5 }
 0xa4e   : > { %16687 = vmatprep.subr.bf16.mxu1 %v16686_v25 }
 0xa50   : > { %16156 = vmatmul.mubr.msk.f32.gmra.mrb[30].mxu1 %vm233_vm0, %v19169_v23 }
 0xa51   : > { %16158 = vmatprep.mubr.msk.f32.mxu1 %vm233_vm0, %v19181_v1 }
 0xa54   : > { %16159 = vmatmul.mubr.msk.f32.gmra.mrb[32].mxu1 %vm233_vm0, %v19189_v27 }
 0xa55   : > { %16161 = vmatprep.mubr.msk.f32.mxu1 %vm233_vm0, %v19193_v31 }
 0xa58   : > { %16162 = vmatmul.mubr.msk.f32.gmra.mrb[34].mxu1 %vm233_vm0, %v11148_v12 }
 0xa59   : > { %16168 = vmatprep.mubr.msk.f32.mxu1 %vm233_vm0, %v19120_v46  ;;  %v11885_v46 = vld [vmem:[#allocation4 + $0x538] sm:$0xff] }
 0xa5a   : > { %v16698_v26 = vpack.c.bf16 %v11885_v46, %v11884_v14 }
 0xa5c   : > { %16169 = vmatmul.mubr.msk.f32.vlgmr.msra.gmra.mrb[28].mxu1 %vm233_vm0, %v19125_v43 }
 0xa5d   : > { %16689 = vmatpush3.bf16.msra.mxu1 %v16686_v25  ;;  %16171 = vmatprep.mubr.msk.f32.mxu1 %vm233_vm0, %v19134_v48  ;;  %v14119_v25 = vld [vmem:[%s19468_s3 + $0xb] ss:$0 sm:$0xff] }
 0xa5e   : > { %16691 = vmatprep.subr.bf16.mxu1 %v16690_v29 }
 0xa60   : > { %16172 = vmatmul.mubr.msk.f32.gmra.mrb[30].mxu1 %vm233_vm0, %v19139_v18 }
 0xa61   : > { %16174 = vmatprep.mubr.msk.f32.mxu1 %vm233_vm0, %v19143_v49 }
 0xa64   : > { %16175 = vmatmul.mubr.msk.f32.gmra.mrb[32].mxu1 %vm233_vm0, %v19147_v8 }
 0xa65   : > { %16177 = vmatprep.mubr.msk.f32.mxu1 %vm233_vm0, %v19151_v21 }
 0xa68   : > { %16178 = vmatmul.mubr.msk.f32.gmra.mrb[34].mxu1 %vm233_vm0, %v11295_v32 }
 0xa69   : > { %16184 = vmatprep.mubr.msk.f32.mxu1 %vm233_vm0, %v10995_v39  ;;  %v14133_v39 = vld [vmem:[%s19468_s3 + $0xd] ss:$0 sm:$0xff] }
 0xa6c   : > { %16185 = vmatmul.mubr.msk.f32.vlgmr.msra.gmra.mrb[28].mxu1 %vm233_vm0, %v19200_v50 }
 0xa6d   : > { %16693 = vmatpush3.bf16.msra.mxu1 %v16690_v29  ;;  %16187 = vmatprep.mubr.msk.f32.mxu1 %vm233_vm0, %v19204_v59 }
 0xa6e   : > { %16695 = vmatprep.subr.bf16.mxu1 %v16694_v30 }
 0xa70   : > { %16188 = vmatmul.mubr.msk.f32.gmra.mrb[30].mxu1 %vm233_vm0, %v19208_v16 }
 0xa71   : > { %16190 = vmatprep.mubr.msk.f32.mxu1 %vm233_vm0, %v19212_v47 }
 0xa74   : > { %16191 = vmatmul.mubr.msk.f32.gmra.mrb[32].mxu1 %vm233_vm0, %v19216_v51 }
 0xa75   : > { %16193 = vmatprep.mubr.msk.f32.mxu1 %vm233_vm0, %v19220_v52 }
 0xa78   : > { %16194 = vmatmul.mubr.msk.f32.gmra.mrb[34].mxu1 %vm233_vm0, %v11442_v36 }
 0xa79   : > { %16200 = vmatprep.mubr.msk.f32.mxu1 %vm233_vm0, %v19158_v4  ;;  %v12594_v4 = vld [vmem:[#allocation4 + $0x5b0] sm:$0xff] }
 0xa7a   : > { %v16726_v6 = vpack.c.bf16 %v12595_v35, %v12594_v4 }
 0xa7c   : > { %16201 = vmatmul.mubr.msk.f32.vlgmr.msra.gmra.mrb[28].mxu1 %vm233_vm0, %v19165_v5  ;;  %16727 = vmatprep.subr.bf16.mxu0 %v16726_v6  ;;  %v16730_v5 = vpack.c.bf16 %v12591_v15, %v12590_v60 }
 0xa7d   : > { %16697 = vmatpush3.bf16.msra.mxu1 %v16694_v30  ;;  %16203 = vmatprep.mubr.msk.f32.mxu1 %vm233_vm0, %v19169_v23 }
 0xa7e   : > { %16699 = vmatprep.subr.bf16.mxu1 %v16698_v26  ;;  %16729 = vmatpush3.bf16.msra.mxu0 %v16726_v6 }
 0xa7f   : > { %16731 = vmatprep.subr.bf16.mxu0 %v16730_v5 }
 0xa80   : > { %16204 = vmatmul.mubr.msk.f32.gmra.mrb[30].mxu1 %vm233_vm0, %v19181_v1 }
 0xa81   : > { %16206 = vmatprep.mubr.msk.f32.mxu1 %vm233_vm0, %v19189_v27 }
 0xa84   : > { %16207 = vmatmul.mubr.msk.f32.gmra.mrb[32].mxu1 %vm233_vm0, %v19193_v31 }
 0xa85   : > { %16209 = vmatprep.mubr.msk.f32.mxu1 %vm233_vm0, %v11148_v12 }
 0xa88   : > { %16210 = vmatmul.mubr.msk.f32.gmra.mrb[34].mxu1 %vm233_vm0, %v18873_v62  ;;  %v12320_v62 = vld [vmem:[#allocation4 + $0x570] sm:$0xff] }
 0xa89   : > { %16216 = vmatprep.mubr.msk.f32.mxu1 %vm233_vm0, %v19125_v43  ;;  %v12321_v43 = vld [vmem:[#allocation4 + $0x578] sm:$0xff] }
 0xa8c   : > { %16217 = vmatmul.mubr.msk.f32.vlgmr.msra.gmra.mrb[28].mxu1 %vm233_vm0, %v19134_v48  ;;  %v16718_v48 = vpack.c.bf16 %v12321_v43, %v12320_v62 }
 0xa8d   : > { %16701 = vmatpush3.bf16.msra.mxu1 %v16698_v26  ;;  %16219 = vmatprep.mubr.msk.f32.mxu1 %vm233_vm0, %v19139_v18  ;;  %v12491_v18 = vld [vmem:[#allocation4 + $0x598] sm:$0xff] }
 0xa8e   : > { %16715 = vmatprep.subr.bf16.mxu1 %v16714_v54 }
 0xa90   : > { %16220 = vmatmul.mubr.msk.f32.gmra.mrb[30].mxu1 %vm233_vm0, %v19143_v49  ;;  %v12322_v49 = vld [vmem:[#allocation3 + $0x1] sm:$0xff] }
 0xa91   : > { %16222 = vmatprep.mubr.msk.f32.mxu1 %vm233_vm0, %v19147_v8 }
 0xa94   : > { %16223 = vmatmul.mubr.msk.f32.gmra.mrb[32].mxu1 %vm233_vm0, %v19151_v21  ;;  %v12323_v21 = vld [vmem:[#allocation3 + $0x9] sm:$0xf] }
 0xa95   : > { %16225 = vmatprep.mubr.msk.f32.mxu1 %vm233_vm0, %v11295_v32 }
 0xa98   : > { %16226 = vmatmul.mubr.msk.f32.gmra.mrb[34].mxu1 %vm233_vm0, %v18890_v3  ;;  %v12490_v3 = vld [vmem:[#allocation4 + $0x590] sm:$0xff] }
 0xa99   : > { %16232 = vmatprep.mubr.msk.f32.mxu1 %vm233_vm0, %v19200_v50  ;;  %v16722_v8 = vpack.c.bf16 %v12491_v18, %v12490_v3 }
 0xa9c   : > { %16233 = vmatmul.mubr.msk.f32.vlgmr.msra.gmra.mrb[28].mxu1 %vm233_vm0, %v19204_v59 }
 0xa9d   : > { %16717 = vmatpush3.bf16.msra.mxu1 %v16714_v54  ;;  %16235 = vmatprep.mubr.msk.f32.mxu1 %vm233_vm0, %v19208_v16 }
 0xa9e   : > { %16719 = vmatprep.subr.bf16.mxu1 %v16718_v48 }
 0xaa0   : > { %16236 = vmatmul.mubr.msk.f32.gmra.mrb[30].mxu1 %vm233_vm0, %v19212_v47 }
 0xaa1   : > { %16238 = vmatprep.mubr.msk.f32.mxu1 %vm233_vm0, %v19216_v51 }
 0xaa4   : > { %16239 = vmatmul.mubr.msk.f32.gmra.mrb[32].mxu1 %vm233_vm0, %v19220_v52 }
 0xaa5   : > { %16241 = vmatprep.mubr.msk.f32.mxu1 %vm233_vm0, %v11442_v36 }
 0xaa8   : > { %16242 = vmatmul.mubr.msk.f32.gmra.mrb[34].mxu1 %vm233_vm0, %v18907_v19  ;;  %v12489_v19 = vld [vmem:[#allocation3 + $0xa] sm:$0xf] }
 0xaa9   : > { %16269 = vmatprep.mubr.msk.f32.mxu1 %vm233_vm0, %v12322_v49 }
 0xaac   : > { %16270 = vmatmul.mubr.msk.f32.vlgmr.msra.gmra.mrb[36].mxu1 %vm233_vm0, %v12323_v21  ;;  %v12864_v21 = vld [vmem:[#allocation4 + $0x5e0] sm:$0xff] }
 0xaad   : > { %16721 = vmatpush3.bf16.msra.mxu1 %v16718_v48  ;;  %16276 = vmatprep.mubr.msk.f32.mxu1 %vm233_vm0, %v12318_v56  ;;  %v12865_v56 = vld [vmem:[#allocation4 + $0x5e8] sm:$0xff] }
 0xaae   : > { %16723 = vmatprep.subr.bf16.mxu1 %v16722_v8 }
 0xab4   : > { %16277 = vmatmul.mubr.msk.f32.vlgmr.msra.gmra.mrb[36].mxu1 %vm233_vm0, %v12319_v37  ;;  %v16738_v37 = vpack.c.bf16 %v12865_v56, %v12864_v21 }
 0xab5   : > { %16725 = vmatpush3.bf16.msra.mxu1 %v16722_v8  ;;  %16283 = vmatprep.mubr.msk.f32.mxu1 %vm233_vm0, %v12488_v2 }
 0xab6   : > { %16739 = vmatprep.subr.bf16.mxu1 %v16738_v37 }
 0xabc   : > { %16284 = vmatmul.mubr.msk.f32.vlgmr.msra.gmra.mrb[36].mxu1 %vm233_vm0, %v12489_v19  ;;  %v14140_v19 = vld [vmem:[%s19468_s3 + $0xe] ss:$0 sm:$0xff] }
 0xabd   : > { %16741 = vmatpush3.bf16.msra.mxu1 %v16738_v37 }
 0xb6f   : > { %v16234_v44 = vpop.f32.mrb[28].mxu1 }
 0xb70   : > { %v11976_v23 = vpop.f32.mrb[29].mxu1  ;;  %v12029_v29 = vadd.f32 %v16234_v44, %v14119_v25  ;;  %v13030_v44 = vld [vmem:[#allocation4 + $0x5f0] sm:$0xff] }
 0xb71   : > { %v12028_v32 = vadd.f32 %v14119_v25, %v11976_v23  ;;  %v13031_v23 = vld [vmem:[#allocation4 + $0x5f8] sm:$0xff] }
 0xb72   : > { %v19332_v17 = vadd.f32 %v12029_v29, %v18418_v53 }
 0xb73   : > { %v16237_v1 = vpop.f32.mrb[30].mxu1  ;;  %v19335_v30 = vadd.f32 %v12028_v32, %v18421_v61 }
 0xb74   : > { %v11986_v27 = vpop.f32.mrb[31].mxu1  ;;  %v12031_v53 = vadd.f32 %v16237_v1, %v14119_v25 }
 0xb75   : > { %v19345_v46 = vpack.c.bf16 %v19332_v17, %v19335_v30  ;;  %v12030_v63 = vadd.f32 %v14119_v25, %v11986_v27  ;;  %v16746_v27 = vpack.c.bf16 %v13031_v23, %v13030_v44 }
 0xb76   : > { %v19353_v61 = vadd.f32 %v12031_v53, %v18428_v20 }
 0xb77   : > { %v16240_v31 = vpop.f32.mrb[32].mxu1  ;;  %v19356_v45 = vadd.f32 %v12030_v63, %v18431_v22 }
 0xb78   : > { %v11996_v9 = vpop.f32.mrb[33].mxu1  ;;  %v12033_v43 = vadd.f32 %v16240_v31, %v14119_v25 }
 0xb79   : > { %v16756_v62 = vpack.c.bf16 %v19353_v61, %v19356_v45  ;;  %v12032_v48 = vadd.f32 %v14119_v25, %v11996_v9 }
 0xb7a   : > { %v19367_v20 = vadd.f32 %v12033_v43, %v18438_v33 }
 0xb7b   : > { %v16243_v7 = vpop.f32.mrb[34].mxu1  ;;  %v19370_v22 = vadd.f32 %v12032_v48, %v18441_v34 }
 0xb7c   : > { %v12006_v38 = vpop.f32.mrb[35].mxu1  ;;  %v12035_v18 = vadd.f32 %v16243_v7, %v14119_v25 }
 0xb7d   : > { %v16762_v3 = vpack.c.bf16 %v19367_v20, %v19370_v22  ;;  %v12034_v49 = vadd.f32 %v14119_v25, %v12006_v38  ;;  %v14147_v38 = vld [vmem:[%s19468_s3 + $0xf] ss:$0 sm:$0xff] }
 0xb7e   : > { %v19379_v8 = vadd.f32 %v12035_v18, %v18448_v40  ;;  %v12860_v40 = vld [vmem:[#allocation4 + $0x5d0] sm:$0xff] }
 0xb7f   : > { %v19382_v33 = vadd.f32 %v12034_v49, %v18451_v28  ;;  %v12861_v28 = vld [vmem:[#allocation4 + $0x5d8] sm:$0xff] }
 0xb80   : > { %v16742_v2 = vpack.c.bf16 %v12861_v28, %v12860_v40 }
 0xb81   : > { %v16768_v34 = vpack.c.bf16 %v19379_v8, %v19382_v33 }
 0xb82   : > { %16743 = vmatprep.subr.bf16.mxu1 %v16742_v2 }
 0xb8f   : > { %v16285_v50 = vpop.f32.mrb[36].mxu1 }
 0xb90   : > { %v12581_v59 = vadd.f32 %v16285_v50, %v14133_v39  ;;  %v12564_v16 = vpop.f32.mrb[37].mxu1 }
 0xb91   : > { %v12580_v47 = vadd.f32 %v14133_v39, %v12564_v16 }
 0xb92   : > { %v12583_v51 = vmax.f32 %v12581_v59, 0.0 }
 0xb93   : > { %v12582_v52 = vmax.f32 %v12580_v47, 0.0 }
 0xb94   : > { %12585 = vst.msk [vmem:[#allocation3 + $0x9] sm:$0xf] %vm5618_vm3, %v12583_v51 }
 0xb95   : > { %12586 = vst.msk [vmem:[#allocation3 - $0x3] sm:$0x8] %vm5620_vm4, %v12583_v51 }
 0xb96   : > { %12584 = vst.msk [vmem:[#allocation3 + $0x1] sm:$0xff] %vm233_vm0, %v12582_v52 }
 0xb97   : > { %12587 = vst.msk [vmem:[#allocation3 + $0xd] sm:$0x1] %vm5622_vm5, %v12582_v52 }
 0xb9b   : > { %v12593_v55 = vld [vmem:[#allocation3 + $0x9] sm:$0xf] }
 0xb9d   : > { %v12592_v12 = vld [vmem:[#allocation3 + $0x1] sm:$0xff] }
 0xb9e   : > { %16290 = vmatprep.mubr.msk.f32.mxu0 %vm233_vm0, %v12592_v12  ;;  %v12588_v41 = vld [vmem:[#allocation3] sm:$0xff]  ;;  %v12589_v36 = vld [vmem:[#allocation3 + $0x8] sm:$0xf] }
 0xb9f   : > { %16291 = vmatmul.mubr.msk.f32.vlgmr.msra.gmra.mrb[38].mxu0 %vm233_vm0, %v12593_v55  ;;  %v12758_v26 = vld [vmem:[#allocation3 + $0x2] sm:$0xff]  ;;  %v12759_v54 = vld [vmem:[#allocation3 + $0xa] sm:$0xf] }
 0xba0   : > { %16733 = vmatpush3.bf16.msra.mxu0 %v16730_v5  ;;  %16297 = vmatprep.mubr.msk.f32.mxu0 %vm233_vm0, %v12588_v41 }
 0xba1   : > { %16735 = vmatprep.subr.bf16.mxu0 %v16734_v13 }
 0xba7   : > { %16298 = vmatmul.mubr.msk.f32.vlgmr.msra.gmra.mrb[38].mxu0 %vm233_vm0, %v12589_v36 }
 0xba8   : > { %16737 = vmatpush3.bf16.msra.mxu0 %v16734_v13  ;;  %16304 = vmatprep.mubr.msk.f32.mxu0 %vm233_vm0, %v12758_v26 }
 0xba9   : > { %16752 = vmatprep.subr.msk.bf16.mxu0 %vm19339_vm7, %v19345_v46 }
 0xbaf   : > { %16305 = vmatmul.mubr.msk.f32.vlgmr.msra.gmra.mrb[38].mxu0 %vm233_vm0, %v12759_v54 }
 0xbb1   : > { %16755 = vmatpush3.bf16.xpose.msk.msra.mxu0 %vm19339_vm7, %v19345_v46 }
 0xbb2   : > { %16758 = vmatprep.subr.msk.bf16.mxu0 %vm19339_vm7, %v16756_v62 }
 0xbb9   : > { %16761 = vmatpush3.bf16.xpose.msk.msra.mxu0 %vm19339_vm7, %v16756_v62 }
 0xbba   : > { %16764 = vmatprep.subr.msk.bf16.mxu0 %vm19339_vm7, %v16762_v3 }
 0xbc1   : > { %16767 = vmatpush3.bf16.xpose.msk.msra.mxu0 %vm19339_vm7, %v16762_v3 }
 0xbc2   : > { %16770 = vmatprep.subr.msk.bf16.mxu0 %vm19339_vm7, %v16768_v34 }
 0xbc9   : > { %16773 = vmatpush3.bf16.xpose.msk.msra.mxu0 %vm19339_vm7, %v16768_v34 }
 0xc82   : > { %v16306_v4 = vpop.f32.mrb[38].mxu0 }
 0xc83   : > { %v12851_v35 = vadd.f32 %v16306_v4, %v14140_v19  ;;  %v12834_v6 = vpop.f32.mrb[39].mxu0 }
 0xc84   : > { %v12850_v60 = vadd.f32 %v14140_v19, %v12834_v6 }
 0xc85   : > { %v12853_v15 = vadd.f32 %v12851_v35, %v19171_v11 }
 0xc86   : > { %v12852_v5 = vadd.f32 %v12850_v60, %v19175_v10 }
 0xc87   : > { %12855 = vst.msk [vmem:[#allocation3 + $0x9] sm:$0xf] %vm5618_vm3, %v12853_v15 }
 0xc88   : > { %12856 = vst.msk [vmem:[#allocation3 - $0x3] sm:$0x8] %vm5620_vm4, %v12853_v15 }
 0xc89   : > { %12854 = vst.msk [vmem:[#allocation3 + $0x1] sm:$0xff] %vm233_vm0, %v12852_v5 }
 0xc8a   : > { %12857 = vst.msk [vmem:[#allocation3 + $0xd] sm:$0x1] %vm5622_vm5, %v12852_v5 }
 0xc8e   : > { %v12863_v31 = vld [vmem:[#allocation3 + $0x9] sm:$0xf] }
 0xc90   : > { %v12862_v1 = vld [vmem:[#allocation3 + $0x1] sm:$0xff] }
 0xc91   : > { %16311 = vmatprep.mubr.msk.f32.mxu1 %vm233_vm0, %v12862_v1  ;;  %v12858_v11 = vld [vmem:[#allocation3] sm:$0xff]  ;;  %v12859_v10 = vld [vmem:[#allocation3 + $0x8] sm:$0xf] }
 0xc92   : > { %16312 = vmatmul.mubr.msk.f32.vlgmr.msra.gmra.mrb[38].mxu1 %vm233_vm0, %v12863_v31  ;;  %v13028_v9 = vld [vmem:[#allocation3 + $0x2] sm:$0xff]  ;;  %v13029_v7 = vld [vmem:[#allocation3 + $0xa] sm:$0xf] }
 0xc93   : > { %16745 = vmatpush3.bf16.msra.mxu1 %v16742_v2  ;;  %16318 = vmatprep.mubr.msk.f32.mxu1 %vm233_vm0, %v12858_v11 }
 0xc94   : > { %16747 = vmatprep.subr.bf16.mxu1 %v16746_v27 }
 0xc9a   : > { %16319 = vmatmul.mubr.msk.f32.vlgmr.msra.gmra.mrb[38].mxu1 %vm233_vm0, %v12859_v10 }
 0xc9b   : > { %16749 = vmatpush3.bf16.msra.mxu1 %v16746_v27  ;;  %16325 = vmatprep.mubr.msk.f32.mxu1 %vm233_vm0, %v13028_v9 }
 0xc9c   : > { %16776 = vmatprep.subr.msk.bf16.mxu1 %vm19339_vm7, %v19345_v46 }
 0xca2   : > { %16326 = vmatmul.mubr.msk.f32.vlgmr.msra.gmra.mrb[38].mxu1 %vm233_vm0, %v13029_v7 }
 0xca4   : > { %16779 = vmatpush3.bf16.xpose.msk.msra.mxu1 %vm19339_vm7, %v19345_v46 }
 0xca5   : > { %16782 = vmatprep.subr.msk.bf16.mxu1 %vm19339_vm7, %v16756_v62 }
 0xcac   : > { %16785 = vmatpush3.bf16.xpose.msk.msra.mxu1 %vm19339_vm7, %v16756_v62 }
 0xcad   : > { %16788 = vmatprep.subr.msk.bf16.mxu1 %vm19339_vm7, %v16762_v3 }
 0xcb4   : > { %16791 = vmatpush3.bf16.xpose.msk.msra.mxu1 %vm19339_vm7, %v16762_v3 }
 0xcb5   : > { %16794 = vmatprep.subr.msk.bf16.mxu1 %vm19339_vm7, %v16768_v34 }
 0xcbc   : > { %16797 = vmatpush3.bf16.xpose.msk.msra.mxu1 %vm19339_vm7, %v16768_v34 }
 0xd75   : > { %v16327_v39 = vpop.f32.mrb[38].mxu1 }
 0xd76   : > { %v13121_v50 = vadd.f32 %v16327_v39, %v14147_v38  ;;  %v13104_v59 = vpop.f32.mrb[39].mxu1 }
 0xd77   : > { %v13120_v16 = vadd.f32 %v14147_v38, %v13104_v59 }
 0xd78   : > { %v13123_v47 = vadd.f32 %v13121_v50, %v18853_v42 }
 0xd79   : > { %v13122_v51 = vadd.f32 %v13120_v16, %v18856_v58 }
 0xd7a   : > { %v13231_v52 = vsub.f32 0.0, %v13123_v47 }
 0xd7b   : > { %16344 = vmatprep.mubr.msk.f32.mxu0 %vm13124_vm6, %v13122_v51  ;;  %v13230_v42 = vsub.f32 0.0, %v13122_v51 }
 0xd7c   : > { %13236 = vrot.lane.b32.xlu1 %v13231_v52, %s17412_s16  ;;  %16345 = vmatmul.mubr.msk.f32.vlgmr.msra.gmra.mrb[40].mxu0 %vm13124_vm6, %v13123_v47 }
 0xd7d   : > { %13234 = vrot.lane.b32.xlu0 %v13230_v42, %s17412_s16 }
 0xd80   : > { %13242 = vrot.lane.b32.xlu1 %v13123_v47, %s17413_s29 }
 0xd81   : > { %13240 = vrot.lane.b32.xlu0 %v13122_v51, %s17413_s29 }
 0xd9f   : > { %13364 = vxpose.xlu0.b32.start [1/2] (short) (narrow) %v13122_v51, 8 }
 0xda3   : > { %13365 = vxpose.xlu0.b32.end [2/2] (short) (narrow) %v13123_v47, 8 }
 0xdee   : > { %v13237_v58 = vpop.permute.xlu1 %13236 }
 0xdef   : > { %v13235_v24 = vpop.permute.xlu0 %13234 }
 0xdf2   : > { %v13243_v0 = vpop.permute.xlu1 %13242 }
 0xdf3   : > { %v13241_v57 = vpop.permute.xlu0 %13240  ;;  %v13248_v12 = vsel %vm13246_vm8, %v13237_v58, %v13243_v0 }
 0xdf4   : > { %v13247_v25 = vsel %vm13246_vm8, %v13235_v24, %v13241_v57 }
 0xdf5   : > { %16363 = vmatprep.mubr.msk.f32.mxu1 %vm13124_vm6, %v13247_v25 }
 0xdf6   : > { %16364 = vmatmul.mubr.msk.f32.vlgmr.msra.gmra.mrb[40].mxu1 %vm13124_vm6, %v13248_v12 }
 0xe1f   : > { %v13380_v13 = vpop.trf.xlu0 }
 0xe20   : > { %13397 = vrot.lane.b32.xlu1 %v13380_v13, %s17414_s30 }
 0xe4f   : > { %v16346_v55 = vpop.f32.mrb[40].mxu0 }
 0xe50   : > { %13404 = vst.msk [vmem:[%s19433_s28 + $0x10] sm:$0xf] %vm13403_vm9, %v16346_v55  ;;  %v13221_v29 = vpop.f32.mrb[41].mxu0 }
 0xe51   : > { %13402 = vst.msk [vmem:[%s19433_s28 + $0x8] sm:$0xff] %vm13362_vm10, %v13221_v29 }
 0xe92   : > { %v13398_v36 = vpop.permute.xlu1 %13397 }
 0xec9   : > { %v16365_v32 = vpop.f32.mrb[40].mxu1 }
 0xeca   : > { %13409 = vrot.lane.b32.xlu1 %v16365_v32, %s17414_s30  ;;  %v13321_v41 = vpop.f32.mrb[41].mxu1 }
 0xece   : > { %13407 = vrot.lane.b32.xlu1 %v13321_v41, %s17414_s30 }
 0xef7   : > { %13330 = vxpose.xlu1.b32.start [1/8] (short) (narrow) %v19335_v30, 8 }
 0xefb   : > { %13331 = vxpose.xlu1.b32.cont [2/8] (short) (narrow) %v19332_v17, 8 }
 0xeff   : > { %13332 = vxpose.xlu1.b32.cont [3/8] (short) (narrow) %v19356_v45, 8 }
 0xf03   : > { %13333 = vxpose.xlu1.b32.cont [4/8] (short) (narrow) %v19353_v61, 8 }
 0xf07   : > { %13334 = vxpose.xlu1.b32.cont [5/8] (short) (narrow) %v19370_v22, 8 }
 0xf0b   : > { %13335 = vxpose.xlu1.b32.cont [6/8] (short) (narrow) %v19367_v20, 8 }
 0xf0f   : > { %13336 = vxpose.xlu1.b32.cont [7/8] (short) (narrow) %v19382_v33, 8 }
 0xf13   : > { %13337 = vxpose.xlu1.b32.end [8/8] (short) (narrow) %v19379_v8, 8 }
 0xf3c   : > { %v13410_v14 = vpop.permute.xlu1 %13409 }
 0xf3d   : > { %13416 = vst.msk [vmem:[%s19433_s28 + $0x10] sm:$0xf] %vm13415_vm11, %v13410_v14 }
 0xf40   : > { %v13408_v17 = vpop.permute.xlu1 %13407 }
 0xf41   : > { %13414 = vst.msk [vmem:[%s19433_s28 + $0x8] sm:$0xff] %vm13413_vm12, %v13408_v17 }
 0xf77   : > { %v13346_v30 = vpop.trf.xlu1 }
 0xf78   : > { %13363 = vst.msk [vmem:[%s19433_s28] sm:$0xff] %vm13362_vm10, %v13346_v30 }
 0xf79   : > { %13401 = vst.msk [vmem:[%s19433_s28] sm:$0xff] %vm13400_vm13, %v13398_v36 }
 0xf7a PF: > { %s15_s15 = sadd.s32 1, %s17406_s15  }
 0xf7b   : > { %p12_p3 = scmp.ge.s32.totalorder %s15_s15, 4  }
 0xf7d   :  { %14 = sbr.rel (!%p12_p3) target bundleno = 1 (0x1), region = 76 }
 0xf84   :  { %13438 = vsyncpa [#allocation5], 1 }
 0xf85   :  { %13440 = vsyncpa [#allocation5 + $0x1], 1 }

</bundles_post_ra>
